<compile_context>
chip_gen: v5e
topology: v5e:2x2
jax: 0.10.0
libtpu: 0.0.40
codegen_flags: <defaults>
</compile_context>

<pallas_src>
import functools

import jax
import jax.numpy as jnp
from jax import lax
from jax.experimental import pallas as pl
from jax.experimental.pallas import tpu as pltpu

# ----------------------------- small synthetic CLIP-vision config -----------------------------
BATCH = 2
IN_CH = 3
IMG = 32
PATCH = 16                      # patch_size (as in CLIP ViT-B/16)
HIDDEN = 32                     # hidden_size (small)
HEADS = 4
HEAD_DIM = HIDDEN // HEADS
INTER = 4 * HIDDEN              # MLP intermediate size
LAYERS = 2
PROJ = 16                       # projection_dim
NP = (IMG // PATCH) ** 2        # number of patch tokens
TOK = NP + 1                    # + class token
TOKP = 8                        # tokens padded to a full sublane tile (power of two)
CP = IN_CH * PATCH * PATCH      # flattened patch size (conv-as-matmul contraction dim)
LN_EPS = 1e-5                   # CLIP layer_norm_eps
NORM_EPS = 1e-12                # F.normalize eps
SCALE = HEAD_DIM ** -0.5        # CLIP attention scale

assert TOK <= TOKP and (TOKP & (TOKP - 1)) == 0
_TOKP_SHIFT = TOKP.bit_length() - 1


def _layernorm(x, g, b, eps=LN_EPS):
    m = jnp.mean(x, axis=-1, keepdims=True)
    v = jnp.mean((x - m) ** 2, axis=-1, keepdims=True)
    return (x - m) * lax.rsqrt(v + eps) * g + b


# ------------------------------------- the Pallas kernel --------------------------------------
def _make_kernel(bb):
    """Kernel processing `bb` batch elements folded into the row axis (bb * TOKP rows)."""
    m = bb * TOKP

    def kernel(patches_ref, posall_ref, wpe_ref, preg_ref, preb_ref,
               ln1g_ref, ln1b_ref, wqkv_ref, bqkv_ref, wo_ref, bo_ref,
               ln2g_ref, ln2b_ref, w1_ref, b1_ref, w2_ref, b2_ref,
               plng_ref, plnb_ref, wp_ref, bp_ref, out_ref):
        # --- CLIP vision embeddings: patch-embed matmul (cls slot = zero row, so cls token and
        #     padding are already folded into the pre-tiled position-embedding slab) ---
        x = jnp.dot(patches_ref[...], wpe_ref[...],
                    preferred_element_type=jnp.float32) + posall_ref[...]
        x = _layernorm(x, preg_ref[...], preb_ref[...])

        # Block-diagonal attention mask (hoisted out of the layer loop): a query row may only
        # attend keys of its own batch element, and padded token rows are never valid keys.
        rows = lax.broadcasted_iota(jnp.int32, (m, m), 0)
        cols = lax.broadcasted_iota(jnp.int32, (m, m), 1)
        mask = jnp.logical_and((rows >> _TOKP_SHIFT) == (cols >> _TOKP_SHIFT),
                               (cols & (TOKP - 1)) < TOK)

        for l in range(LAYERS):
            # ---- self-attention block (pre-LN, residual): one fused QKV matmul, one fused WO ----
            res = x
            h = _layernorm(x, ln1g_ref[l], ln1b_ref[l])
            qkv = jnp.dot(h.astype(jnp.bfloat16), wqkv_ref[l],
                          preferred_element_type=jnp.float32) + bqkv_ref[l]
            ctx_heads = []
            for hd in range(HEADS):
                c0 = hd * HEAD_DIM
                qh = qkv[:, c0:c0 + HEAD_DIM]                 # attention SCALE pre-folded into Wq
                kh = qkv[:, HIDDEN + c0:HIDDEN + c0 + HEAD_DIM]
                vh = qkv[:, 2 * HIDDEN + c0:2 * HIDDEN + c0 + HEAD_DIM]
                s = lax.dot_general(qh, kh, (((1,), (1,)), ((), ())),
                                    preferred_element_type=jnp.float32)
                s = jnp.where(mask, s, -1e30)
                s = s - jnp.max(s, axis=-1, keepdims=True)
                p = jnp.exp(s)
                p = p * pl.reciprocal(jnp.sum(p, axis=-1, keepdims=True), approx=True)
                ctx_heads.append(jnp.dot(p, vh, preferred_element_type=jnp.float32))
            ctx = jnp.concatenate(ctx_heads, axis=-1)          # [m, HIDDEN]
            attn = jnp.dot(ctx.astype(jnp.bfloat16), wo_ref[l],
                           preferred_element_type=jnp.float32) + bo_ref[l]
            x = res + attn

            # ---- MLP block (quick_gelu, as in CLIP) ----
            res = x
            h = _layernorm(x, ln2g_ref[l], ln2b_ref[l])
            h = jnp.dot(h.astype(jnp.bfloat16), w1_ref[l],
                        preferred_element_type=jnp.float32) + b1_ref[l]
            h = h * jax.nn.sigmoid(1.702 * h)
            h = jnp.dot(h.astype(jnp.bfloat16), w2_ref[l],
                        preferred_element_type=jnp.float32) + b2_ref[l]
            x = res + h

        # ---- GRAFT projector: LayerNorm -> Linear(bias) -> F.normalize(dim=-1) ----
        h = _layernorm(x, plng_ref[...], plnb_ref[...])
        feat = jnp.dot(h.astype(jnp.bfloat16), wp_ref[...],
                       preferred_element_type=jnp.float32) + bp_ref[...]
        sumsq = jnp.sum(feat * feat, axis=-1, keepdims=True)
        out_ref[...] = feat * lax.rsqrt(jnp.maximum(sumsq, NORM_EPS * NORM_EPS))

    return kernel


FUSED_ORDER = [
    "wpe", "pre_g", "pre_b",
    "ln1_g", "ln1_b", "wqkv", "bqkv", "wo", "bo",
    "ln2_g", "ln2_b", "w1", "b1", "w2", "b2",
    "pln_g", "pln_b", "wp", "bp",
]


def _zero_map(rank, g):
    return (0,) * rank


def _pick_batch_block(batch):
    """How many batch elements to fold into one grid step.
    v7x has 2 TensorCores -> keep grid=(B,) so megacore shards the batch across cores.
    v5e/v6e have a single TC -> fold the whole batch into one step (grid=(1,))."""
    try:
        kind = jax.devices()[0].device_kind.lower()
    except Exception:
        kind = ""
    n_cores = 2 if ("v7" in kind or "7x" in kind) else 1
    if n_cores > 1 and batch % n_cores == 0:
        return batch // n_cores
    return batch


def _fuse_params(p):
    """Fuse per-head attention weights into single QKV / WO matrices and cast matmul weights to
    bf16 (biases and LayerNorm parameters stay f32 — they are applied to the f32 accumulator)."""
    bf = jnp.bfloat16

    def heads_to_cols(w):                         # [L, H, HID, HD] -> [L, HID, H*HD]
        return jnp.transpose(w, (0, 2, 1, 3)).reshape(LAYERS, HIDDEN, HIDDEN)

    wqkv = jnp.concatenate([heads_to_cols(p["wq"] * SCALE),    # attention scale folded into Q
                            heads_to_cols(p["wk"]),
                            heads_to_cols(p["wv"])], axis=-1).astype(bf)   # [L, HID, 3*HID]
    bqkv = jnp.concatenate([(p["bq"] * SCALE).reshape(LAYERS, 1, HIDDEN),
                            p["bk"].reshape(LAYERS, 1, HIDDEN),
                            p["bv"].reshape(LAYERS, 1, HIDDEN)], axis=-1)  # [L, 1, 3*HID] f32
    wo = p["wo"].reshape(LAYERS, HIDDEN, HIDDEN).astype(bf)                # [L, H*HD, HID]

    return {
        "wpe": p["wpe"].astype(bf),
        "pre_g": p["pre_g"], "pre_b": p["pre_b"],
        "ln1_g": p["ln1_g"], "ln1_b": p["ln1_b"],
        "wqkv": wqkv, "bqkv": bqkv, "wo": wo, "bo": p["bo"],
        "ln2_g": p["ln2_g"], "ln2_b": p["ln2_b"],
        "w1": p["w1"].astype(bf), "b1": p["b1"],
        "w2": p["w2"].astype(bf), "b2": p["b2"],
        "pln_g": p["pln_g"], "pln_b": p["pln_b"],
        "wp": p["wp"].astype(bf), "bp": p["bp"],
    }


def graft_forward(image, params):
    """image: [B, C, H, W] float32 (NCHW, as PyTorch).  Returns normalized features [B, TOK, PROJ]."""
    B, C, H, W = image.shape
    hn, wn = H // PATCH, W // PATCH
    assert hn * wn == NP and C * PATCH * PATCH == CP

    bb = _pick_batch_block(B)
    grid = (B // bb,)
    m = bb * TOKP

    # --- wrapper glue: conv-as-matmul patch extraction, padded to TOKP sublane-aligned rows ---
    patches = image.reshape(B, C, hn, PATCH, wn, PATCH)
    patches = patches.transpose(0, 2, 4, 1, 3, 5).reshape(B, NP, CP)
    patches = jnp.pad(patches, ((0, 0), (1, TOKP - TOK), (0, 0)))   # row 0 = cls slot, tail = pad
    patches = patches.reshape(B * TOKP, CP).astype(jnp.bfloat16)

    # cls token folded into the (padded, batch-block tiled) position-embedding slab
    posc = jnp.pad(params["pos"].at[0:1].add(params["cls"]), ((0, TOKP - TOK), (0, 0)))
    pos_all = jnp.tile(posc, (bb, 1))                               # [m, HIDDEN] f32

    fused = _fuse_params(params)

    in_specs = [pl.BlockSpec((m, CP), lambda g: (g, 0)),
                pl.BlockSpec((m, HIDDEN), lambda g: (0, 0))]
    for k in FUSED_ORDER:
        shp = fused[k].shape
        in_specs.append(pl.BlockSpec(shp, functools.partial(_zero_map, len(shp))))

    # TODO(synk): at real CLIP sizes (HIDDEN=768, LAYERS=12) the layer loop must move onto a grid
    # axis and per-layer weights streamed via index_map over l instead of staying fully resident.
    out = pl.pallas_call(
        _make_kernel(bb),
        out_shape=jax.ShapeDtypeStruct((B * TOKP, PROJ), jnp.float32),
        grid_spec=pltpu.PrefetchScalarGridSpec(
            num_scalar_prefetch=0,
            grid=grid,
            in_specs=in_specs,
            out_specs=pl.BlockSpec((m, PROJ), lambda g: (g, 0)),
        ),
        compiler_params=pltpu.CompilerParams(dimension_semantics=("parallel",)),
    )(patches, pos_all, *[fused[k] for k in FUSED_ORDER])

    # drop the padded token rows -> [B, TOK, PROJ]
    return out.reshape(B, TOKP, PROJ)[:, :TOK, :]


# ---------------------------------- deterministic parameters ----------------------------------
def init_params(key):
    keys = iter(jax.random.split(key, 32))

    def rnd(shape, scale=0.02):
        return (scale * jax.random.normal(next(keys), shape)).astype(jnp.float32)

    p = {}
    # CLIP vision embeddings (patch conv has no bias)
    p["wpe"] = rnd((CP, HIDDEN))                       # conv weight [H, C, ps, ps] reshaped + transposed
    p["cls"] = rnd((1, HIDDEN))
    p["pos"] = rnd((TOK, HIDDEN))
    p["pre_g"] = jnp.ones((1, HIDDEN), jnp.float32)
    p["pre_b"] = jnp.zeros((1, HIDDEN), jnp.float32)
    # encoder layers (per-head factored attention weights; equivalent to slicing [H, H] weights)
    p["ln1_g"] = jnp.ones((LAYERS, 1, HIDDEN), jnp.float32)
    p["ln1_b"] = jnp.zeros((LAYERS, 1, HIDDEN), jnp.float32)
    p["wq"] = rnd((LAYERS, HEADS, HIDDEN, HEAD_DIM))
    p["bq"] = rnd((LAYERS, HEADS, 1, HEAD_DIM))
    p["wk"] = rnd((LAYERS, HEADS, HIDDEN, HEAD_DIM))
    p["bk"] = rnd((LAYERS, HEADS, 1, HEAD_DIM))
    p["wv"] = rnd((LAYERS, HEADS, HIDDEN, HEAD_DIM))
    p["bv"] = rnd((LAYERS, HEADS, 1, HEAD_DIM))
    p["wo"] = rnd((LAYERS, HEADS, HEAD_DIM, HIDDEN))
    p["bo"] = rnd((LAYERS, 1, HIDDEN))
    p["ln2_g"] = jnp.ones((LAYERS, 1, HIDDEN), jnp.float32)
    p["ln2_b"] = jnp.zeros((LAYERS, 1, HIDDEN), jnp.float32)
    p["w1"] = rnd((LAYERS, HIDDEN, INTER))
    p["b1"] = rnd((LAYERS, 1, INTER))
    p["w2"] = rnd((LAYERS, INTER, HIDDEN))
    p["b2"] = rnd((LAYERS, 1, HIDDEN))
    # GRAFT projector: nn.LayerNorm(hidden) + nn.Linear(hidden, projection_dim, bias=True)
    p["pln_g"] = jnp.ones((1, HIDDEN), jnp.float32)
    p["pln_b"] = jnp.zeros((1, HIDDEN), jnp.float32)
    p["wp"] = rnd((HIDDEN, PROJ))
    p["bp"] = rnd((1, PROJ))
    return p


# ------------------------------------- pure-JAX reference -------------------------------------
def graft_reference(image, p):
    B, C, H, W = image.shape
    hn, wn = H // PATCH, W // PATCH
    patches = image.reshape(B, C, hn, PATCH, wn, PATCH)
    patches = patches.transpose(0, 2, 4, 1, 3, 5).reshape(B, hn * wn, C * PATCH * PATCH)

    x = jnp.einsum("bnc,ch->bnh", patches, p["wpe"])
    cls = jnp.broadcast_to(p["cls"][None], (B, 1, HIDDEN))
    x = jnp.concatenate([cls, x], axis=1) + p["pos"][None]
    x = _layernorm(x, p["pre_g"], p["pre_b"])
    for l in range(LAYERS):
        res = x
        h = _layernorm(x, p["ln1_g"][l], p["ln1_b"][l])
        out = jnp.broadcast_to(p["bo"][l][None], (B, TOK, HIDDEN))
        for hd in range(HEADS):
            q = (jnp.einsum("bth,hd->btd", h, p["wq"][l, hd]) + p["bq"][l, hd]) * SCALE
            k = jnp.einsum("bth,hd->btd", h, p["wk"][l, hd]) + p["bk"][l, hd]
            v = jnp.einsum("bth,hd->btd", h, p["wv"][l, hd]) + p["bv"][l, hd]
            s = jnp.einsum("bqd,bkd->bqk", q, k)
            a = jax.nn.softmax(s, axis=-1)
            ctx = jnp.einsum("bqk,bkd->bqd", a, v)
            out = out + jnp.einsum("btd,dh->bth", ctx, p["wo"][l, hd])
        x = res + out
        res = x
        h = _layernorm(x, p["ln2_g"][l], p["ln2_b"][l])
        h = jnp.einsum("bth,hi->bti", h, p["w1"][l]) + p["b1"][l]
        h = h * jax.nn.sigmoid(1.702 * h)
        h = jnp.einsum("bti,ih->bth", h, p["w2"][l]) + p["b2"][l]
        x = res + h
    h = _layernorm(x, p["pln_g"], p["pln_b"])
    feat = jnp.einsum("bth,hp->btp", h, p["wp"]) + p["bp"]
    nrm = jnp.sqrt(jnp.sum(feat * feat, axis=-1, keepdims=True))
    return feat / jnp.maximum(nrm, NORM_EPS)


# TODO(synk): CLIPImageProcessor preprocessing and from_pretrained checkpoint loading are not
# translated; weights are synthetic and output_hidden_states=True pass-through is not implemented.

if __name__ == "__main__":
    key = jax.random.PRNGKey(0)
    k_img, k_par = jax.random.split(key)
    image = jax.random.normal(k_img, (BATCH, IN_CH, IMG, IMG), dtype=jnp.float32)
    params = init_params(k_par)

    out = graft_forward(image, params)          # ModelOutput.last_hidden_state equivalent
    out = jax.block_until_ready(out)

    ref = graft_reference(image, params)
    assert out.shape == (BATCH, TOK, PROJ)
    err = float(jnp.max(jnp.abs(out - ref)))
    # bf16 MXU operands + approx reciprocal -> slightly relaxed tolerance vs the f32 reference
    assert jnp.allclose(out, ref, atol=1e-2, rtol=1e-2), err

    print("KERNEL_OK")
</pallas_src>

<mosaic_0001>
module attributes {stable_mosaic.version = 11 : i64} {
  func.func @kernel(%arg0: i32, %arg1: memref<16x768xbf16, #tpu.memory_space<vmem>>, %arg2: memref<16x32xf32, #tpu.memory_space<vmem>>, %arg3: memref<768x32xbf16, #tpu.memory_space<vmem>>, %arg4: memref<1x32xf32, #tpu.memory_space<vmem>>, %arg5: memref<1x32xf32, #tpu.memory_space<vmem>>, %arg6: memref<2x1x32xf32, #tpu.memory_space<vmem>>, %arg7: memref<2x1x32xf32, #tpu.memory_space<vmem>>, %arg8: memref<2x32x96xbf16, #tpu.memory_space<vmem>>, %arg9: memref<2x1x96xf32, #tpu.memory_space<vmem>>, %arg10: memref<2x32x32xbf16, #tpu.memory_space<vmem>>, %arg11: memref<2x1x32xf32, #tpu.memory_space<vmem>>, %arg12: memref<2x1x32xf32, #tpu.memory_space<vmem>>, %arg13: memref<2x1x32xf32, #tpu.memory_space<vmem>>, %arg14: memref<2x32x128xbf16, #tpu.memory_space<vmem>>, %arg15: memref<2x1x128xf32, #tpu.memory_space<vmem>>, %arg16: memref<2x128x32xbf16, #tpu.memory_space<vmem>>, %arg17: memref<2x1x32xf32, #tpu.memory_space<vmem>>, %arg18: memref<1x32xf32, #tpu.memory_space<vmem>>, %arg19: memref<1x32xf32, #tpu.memory_space<vmem>>, %arg20: memref<32x16xbf16, #tpu.memory_space<vmem>>, %arg21: memref<1x16xf32, #tpu.memory_space<vmem>>, %arg22: memref<16x16xf32, #tpu.memory_space<vmem>>) attributes {dimension_semantics = [#tpu.dimension_semantics<parallel>], iteration_bounds = array<i64: 1>, scalar_prefetch = 0 : i64, scratch_operands = 0 : i64, tpu.core_type = #tpu.core_type<tc>, window_params = [{transform_indices = @transform_0, window_bounds = array<i64: 16, 768>}, {pipeline_mode = #tpu.pipeline_mode<synchronous>, transform_indices = @transform_1, window_bounds = array<i64: 16, 32>}, {pipeline_mode = #tpu.pipeline_mode<synchronous>, transform_indices = @transform_2, window_bounds = array<i64: 768, 32>}, {pipeline_mode = #tpu.pipeline_mode<synchronous>, transform_indices = @transform_3, window_bounds = array<i64: 1, 32>}, {pipeline_mode = #tpu.pipeline_mode<synchronous>, transform_indices = @transform_4, window_bounds = array<i64: 1, 32>}, {pipeline_mode = #tpu.pipeline_mode<synchronous>, transform_indices = @transform_5, window_bounds = array<i64: 2, 1, 32>}, {pipeline_mode = #tpu.pipeline_mode<synchronous>, transform_indices = @transform_6, window_bounds = array<i64: 2, 1, 32>}, {pipeline_mode = #tpu.pipeline_mode<synchronous>, transform_indices = @transform_7, window_bounds = array<i64: 2, 32, 96>}, {pipeline_mode = #tpu.pipeline_mode<synchronous>, transform_indices = @transform_8, window_bounds = array<i64: 2, 1, 96>}, {pipeline_mode = #tpu.pipeline_mode<synchronous>, transform_indices = @transform_9, window_bounds = array<i64: 2, 32, 32>}, {pipeline_mode = #tpu.pipeline_mode<synchronous>, transform_indices = @transform_10, window_bounds = array<i64: 2, 1, 32>}, {pipeline_mode = #tpu.pipeline_mode<synchronous>, transform_indices = @transform_11, window_bounds = array<i64: 2, 1, 32>}, {pipeline_mode = #tpu.pipeline_mode<synchronous>, transform_indices = @transform_12, window_bounds = array<i64: 2, 1, 32>}, {pipeline_mode = #tpu.pipeline_mode<synchronous>, transform_indices = @transform_13, window_bounds = array<i64: 2, 32, 128>}, {pipeline_mode = #tpu.pipeline_mode<synchronous>, transform_indices = @transform_14, window_bounds = array<i64: 2, 1, 128>}, {pipeline_mode = #tpu.pipeline_mode<synchronous>, transform_indices = @transform_15, window_bounds = array<i64: 2, 128, 32>}, {pipeline_mode = #tpu.pipeline_mode<synchronous>, transform_indices = @transform_16, window_bounds = array<i64: 2, 1, 32>}, {pipeline_mode = #tpu.pipeline_mode<synchronous>, transform_indices = @transform_17, window_bounds = array<i64: 1, 32>}, {pipeline_mode = #tpu.pipeline_mode<synchronous>, transform_indices = @transform_18, window_bounds = array<i64: 1, 32>}, {pipeline_mode = #tpu.pipeline_mode<synchronous>, transform_indices = @transform_19, window_bounds = array<i64: 32, 16>}, {pipeline_mode = #tpu.pipeline_mode<synchronous>, transform_indices = @transform_20, window_bounds = array<i64: 1, 16>}, {transform_indices = @transform_21, window_bounds = array<i64: 16, 16>}]} {
    %c0 = arith.constant 0 : index
    %c0_0 = arith.constant 0 : index
    %0 = vector.load %arg1[%c0, %c0_0] : memref<16x768xbf16, #tpu.memory_space<vmem>>, vector<16x768xbf16>
    %c0_1 = arith.constant 0 : index
    %c0_2 = arith.constant 0 : index
    %1 = vector.load %arg3[%c0_1, %c0_2] : memref<768x32xbf16, #tpu.memory_space<vmem>>, vector<768x32xbf16>
    %cst = arith.constant dense<0.000000e+00> : vector<16x32xf32>
    %2 = tpu.matmul %0, %1, %cst {dimension_numbers = #tpu.dot_dimension_numbers<[1], [0], [0], [1], [0, 0, 1, 1], [], []>} : vector<16x768xbf16>, vector<768x32xbf16>, vector<16x32xf32> -> vector<16x32xf32>
    %c0_3 = arith.constant 0 : index
    %c0_4 = arith.constant 0 : index
    %3 = vector.load %arg2[%c0_3, %c0_4] : memref<16x32xf32, #tpu.memory_space<vmem>>, vector<16x32xf32>
    %4 = arith.addf %2, %3 : vector<16x32xf32>
    %c0_5 = arith.constant 0 : index
    %c0_6 = arith.constant 0 : index
    %5 = vector.load %arg4[%c0_5, %c0_6] : memref<1x32xf32, #tpu.memory_space<vmem>>, vector<1x32xf32>
    %c0_7 = arith.constant 0 : index
    %c0_8 = arith.constant 0 : index
    %6 = vector.load %arg5[%c0_7, %c0_8] : memref<1x32xf32, #tpu.memory_space<vmem>>, vector<1x32xf32>
    %cst_9 = arith.constant dense<0.000000e+00> : vector<16xf32>
    %7 = vector.multi_reduction <add>, %4, %cst_9 [1] : vector<16x32xf32> to vector<16xf32>
    %8 = vector.shape_cast %7 : vector<16xf32> to vector<16x1xf32>
    %cst_10 = arith.constant 3.200000e+01 : f32
    %9 = vector.broadcast %cst_10 : f32 to vector<16x1xf32>
    %10 = arith.divf %8, %9 : vector<16x1xf32>
    %11 = vector.broadcast %10 : vector<16x1xf32> to vector<16x32xf32>
    %12 = arith.subf %4, %11 : vector<16x32xf32>
    %13 = arith.mulf %12, %12 : vector<16x32xf32>
    %cst_11 = arith.constant dense<0.000000e+00> : vector<16xf32>
    %14 = vector.multi_reduction <add>, %13, %cst_11 [1] : vector<16x32xf32> to vector<16xf32>
    %15 = vector.shape_cast %14 : vector<16xf32> to vector<16x1xf32>
    %cst_12 = arith.constant 3.200000e+01 : f32
    %16 = vector.broadcast %cst_12 : f32 to vector<16x1xf32>
    %17 = arith.divf %15, %16 : vector<16x1xf32>
    %18 = vector.broadcast %10 : vector<16x1xf32> to vector<16x32xf32>
    %19 = arith.subf %4, %18 : vector<16x32xf32>
    %cst_13 = arith.constant 9.99999974E-6 : f32
    %20 = vector.broadcast %cst_13 : f32 to vector<16x1xf32>
    %21 = arith.addf %17, %20 : vector<16x1xf32>
    %22 = math.rsqrt %21 : vector<16x1xf32>
    %23 = vector.broadcast %22 : vector<16x1xf32> to vector<16x32xf32>
    %24 = arith.mulf %19, %23 : vector<16x32xf32>
    %25 = vector.broadcast %5 : vector<1x32xf32> to vector<16x32xf32>
    %26 = arith.mulf %24, %25 : vector<16x32xf32>
    %27 = vector.broadcast %6 : vector<1x32xf32> to vector<16x32xf32>
    %28 = arith.addf %26, %27 : vector<16x32xf32>
    %29 = tpu.iota {dimensions = array<i32: 0>} : vector<16x16xi32>
    %30 = tpu.iota {dimensions = array<i32: 1>} : vector<16x16xi32>
    %c3_i32 = arith.constant 3 : i32
    %31 = vector.broadcast %c3_i32 : i32 to vector<16x16xi32>
    %32 = arith.shrsi %29, %31 : vector<16x16xi32>
    %c3_i32_14 = arith.constant 3 : i32
    %33 = vector.broadcast %c3_i32_14 : i32 to vector<16x16xi32>
    %34 = arith.shrsi %30, %33 : vector<16x16xi32>
    %35 = arith.cmpi eq, %32, %34 : vector<16x16xi32>
    %c7_i32 = arith.constant 7 : i32
    %36 = vector.broadcast %c7_i32 : i32 to vector<16x16xi32>
    %37 = arith.andi %30, %36 : vector<16x16xi32>
    %c5_i32 = arith.constant 5 : i32
    %38 = vector.broadcast %c5_i32 : i32 to vector<16x16xi32>
    %39 = arith.cmpi slt, %37, %38 : vector<16x16xi32>
    %40 = arith.andi %35, %39 : vector<16x16xi1>
    %c0_15 = arith.constant 0 : index
    %c0_16 = arith.constant 0 : index
    %c0_17 = arith.constant 0 : index
    %41 = vector.load %arg6[%c0_15, %c0_16, %c0_17] : memref<2x1x32xf32, #tpu.memory_space<vmem>>, vector<1x1x32xf32>
    %42 = vector.shape_cast %41 : vector<1x1x32xf32> to vector<1x32xf32>
    %c0_18 = arith.constant 0 : index
    %c0_19 = arith.constant 0 : index
    %c0_20 = arith.constant 0 : index
    %43 = vector.load %arg7[%c0_18, %c0_19, %c0_20] : memref<2x1x32xf32, #tpu.memory_space<vmem>>, vector<1x1x32xf32>
    %44 = vector.shape_cast %43 : vector<1x1x32xf32> to vector<1x32xf32>
    %cst_21 = arith.constant dense<0.000000e+00> : vector<16xf32>
    %45 = vector.multi_reduction <add>, %28, %cst_21 [1] : vector<16x32xf32> to vector<16xf32>
    %46 = vector.shape_cast %45 : vector<16xf32> to vector<16x1xf32>
    %cst_22 = arith.constant 3.200000e+01 : f32
    %47 = vector.broadcast %cst_22 : f32 to vector<16x1xf32>
    %48 = arith.divf %46, %47 : vector<16x1xf32>
    %49 = vector.broadcast %48 : vector<16x1xf32> to vector<16x32xf32>
    %50 = arith.subf %28, %49 : vector<16x32xf32>
    %51 = arith.mulf %50, %50 : vector<16x32xf32>
    %cst_23 = arith.constant dense<0.000000e+00> : vector<16xf32>
    %52 = vector.multi_reduction <add>, %51, %cst_23 [1] : vector<16x32xf32> to vector<16xf32>
    %53 = vector.shape_cast %52 : vector<16xf32> to vector<16x1xf32>
    %cst_24 = arith.constant 3.200000e+01 : f32
    %54 = vector.broadcast %cst_24 : f32 to vector<16x1xf32>
    %55 = arith.divf %53, %54 : vector<16x1xf32>
    %56 = vector.broadcast %48 : vector<16x1xf32> to vector<16x32xf32>
    %57 = arith.subf %28, %56 : vector<16x32xf32>
    %cst_25 = arith.constant 9.99999974E-6 : f32
    %58 = vector.broadcast %cst_25 : f32 to vector<16x1xf32>
    %59 = arith.addf %55, %58 : vector<16x1xf32>
    %60 = math.rsqrt %59 : vector<16x1xf32>
    %61 = vector.broadcast %60 : vector<16x1xf32> to vector<16x32xf32>
    %62 = arith.mulf %57, %61 : vector<16x32xf32>
    %63 = vector.broadcast %42 : vector<1x32xf32> to vector<16x32xf32>
    %64 = arith.mulf %62, %63 : vector<16x32xf32>
    %65 = vector.broadcast %44 : vector<1x32xf32> to vector<16x32xf32>
    %66 = arith.addf %64, %65 : vector<16x32xf32>
    %67 = arith.truncf %66 : vector<16x32xf32> to vector<16x32xbf16>
    %c0_26 = arith.constant 0 : index
    %c0_27 = arith.constant 0 : index
    %c0_28 = arith.constant 0 : index
    %68 = vector.load %arg8[%c0_26, %c0_27, %c0_28] : memref<2x32x96xbf16, #tpu.memory_space<vmem>>, vector<1x32x96xbf16>
    %69 = vector.shape_cast %68 : vector<1x32x96xbf16> to vector<32x96xbf16>
    %cst_29 = arith.constant dense<0.000000e+00> : vector<16x96xf32>
    %70 = tpu.matmul %67, %69, %cst_29 {dimension_numbers = #tpu.dot_dimension_numbers<[1], [0], [0], [1], [0, 0, 1, 1], [], []>} : vector<16x32xbf16>, vector<32x96xbf16>, vector<16x96xf32> -> vector<16x96xf32>
    %c0_30 = arith.constant 0 : index
    %c0_31 = arith.constant 0 : index
    %c0_32 = arith.constant 0 : index
    %71 = vector.load %arg9[%c0_30, %c0_31, %c0_32] : memref<2x1x96xf32, #tpu.memory_space<vmem>>, vector<1x1x96xf32>
    %72 = vector.shape_cast %71 : vector<1x1x96xf32> to vector<1x96xf32>
    %73 = vector.broadcast %72 : vector<1x96xf32> to vector<16x96xf32>
    %74 = arith.addf %70, %73 : vector<16x96xf32>
    %75 = vector.extract_strided_slice %74 {offsets = [0, 0], sizes = [16, 8], strides = [1, 1]} : vector<16x96xf32> to vector<16x8xf32>
    %76 = vector.extract_strided_slice %74 {offsets = [0, 32], sizes = [16, 8], strides = [1, 1]} : vector<16x96xf32> to vector<16x8xf32>
    %77 = vector.extract_strided_slice %74 {offsets = [0, 64], sizes = [16, 8], strides = [1, 1]} : vector<16x96xf32> to vector<16x8xf32>
    %cst_33 = arith.constant dense<0.000000e+00> : vector<16x16xf32>
    %78 = tpu.matmul %75, %76, %cst_33 {dimension_numbers = #tpu.dot_dimension_numbers<[1], [1], [0], [0], [0, 0, 1, 0], [], []>} : vector<16x8xf32>, vector<16x8xf32>, vector<16x16xf32> -> vector<16x16xf32>
    %cst_34 = arith.constant -1.000000e+30 : f32
    %79 = vector.broadcast %cst_34 : f32 to vector<16x16xf32>
    %80 = arith.select %40, %78, %79 : vector<16x16xi1>, vector<16x16xf32>
    %cst_35 = arith.constant dense<0xFF800000> : vector<16xf32>
    %81 = vector.multi_reduction <maximumf>, %80, %cst_35 [1] : vector<16x16xf32> to vector<16xf32>
    %82 = vector.shape_cast %81 : vector<16xf32> to vector<16x1xf32>
    %83 = vector.broadcast %82 : vector<16x1xf32> to vector<16x16xf32>
    %84 = arith.subf %80, %83 : vector<16x16xf32>
    %85 = math.exp %84 : vector<16x16xf32>
    %cst_36 = arith.constant dense<0.000000e+00> : vector<16xf32>
    %86 = vector.multi_reduction <add>, %85, %cst_36 [1] : vector<16x16xf32> to vector<16xf32>
    %87 = vector.shape_cast %86 : vector<16xf32> to vector<16x1xf32>
    %88 = tpu.reciprocal %87 {approx = true} : vector<16x1xf32> -> vector<16x1xf32>
    %89 = vector.broadcast %88 : vector<16x1xf32> to vector<16x16xf32>
    %90 = arith.mulf %85, %89 : vector<16x16xf32>
    %cst_37 = arith.constant dense<0.000000e+00> : vector<16x8xf32>
    %91 = tpu.matmul %90, %77, %cst_37 {dimension_numbers = #tpu.dot_dimension_numbers<[1], [0], [0], [1], [0, 0, 1, 1], [], []>} : vector<16x16xf32>, vector<16x8xf32>, vector<16x8xf32> -> vector<16x8xf32>
    %92 = vector.extract_strided_slice %74 {offsets = [0, 8], sizes = [16, 8], strides = [1, 1]} : vector<16x96xf32> to vector<16x8xf32>
    %93 = vector.extract_strided_slice %74 {offsets = [0, 40], sizes = [16, 8], strides = [1, 1]} : vector<16x96xf32> to vector<16x8xf32>
    %94 = vector.extract_strided_slice %74 {offsets = [0, 72], sizes = [16, 8], strides = [1, 1]} : vector<16x96xf32> to vector<16x8xf32>
    %cst_38 = arith.constant dense<0.000000e+00> : vector<16x16xf32>
    %95 = tpu.matmul %92, %93, %cst_38 {dimension_numbers = #tpu.dot_dimension_numbers<[1], [1], [0], [0], [0, 0, 1, 0], [], []>} : vector<16x8xf32>, vector<16x8xf32>, vector<16x16xf32> -> vector<16x16xf32>
    %cst_39 = arith.constant -1.000000e+30 : f32
    %96 = vector.broadcast %cst_39 : f32 to vector<16x16xf32>
    %97 = arith.select %40, %95, %96 : vector<16x16xi1>, vector<16x16xf32>
    %cst_40 = arith.constant dense<0xFF800000> : vector<16xf32>
    %98 = vector.multi_reduction <maximumf>, %97, %cst_40 [1] : vector<16x16xf32> to vector<16xf32>
    %99 = vector.shape_cast %98 : vector<16xf32> to vector<16x1xf32>
    %100 = vector.broadcast %99 : vector<16x1xf32> to vector<16x16xf32>
    %101 = arith.subf %97, %100 : vector<16x16xf32>
    %102 = math.exp %101 : vector<16x16xf32>
    %cst_41 = arith.constant dense<0.000000e+00> : vector<16xf32>
    %103 = vector.multi_reduction <add>, %102, %cst_41 [1] : vector<16x16xf32> to vector<16xf32>
    %104 = vector.shape_cast %103 : vector<16xf32> to vector<16x1xf32>
    %105 = tpu.reciprocal %104 {approx = true} : vector<16x1xf32> -> vector<16x1xf32>
    %106 = vector.broadcast %105 : vector<16x1xf32> to vector<16x16xf32>
    %107 = arith.mulf %102, %106 : vector<16x16xf32>
    %cst_42 = arith.constant dense<0.000000e+00> : vector<16x8xf32>
    %108 = tpu.matmul %107, %94, %cst_42 {dimension_numbers = #tpu.dot_dimension_numbers<[1], [0], [0], [1], [0, 0, 1, 1], [], []>} : vector<16x16xf32>, vector<16x8xf32>, vector<16x8xf32> -> vector<16x8xf32>
    %109 = vector.extract_strided_slice %74 {offsets = [0, 16], sizes = [16, 8], strides = [1, 1]} : vector<16x96xf32> to vector<16x8xf32>
    %110 = vector.extract_strided_slice %74 {offsets = [0, 48], sizes = [16, 8], strides = [1, 1]} : vector<16x96xf32> to vector<16x8xf32>
    %111 = vector.extract_strided_slice %74 {offsets = [0, 80], sizes = [16, 8], strides = [1, 1]} : vector<16x96xf32> to vector<16x8xf32>
    %cst_43 = arith.constant dense<0.000000e+00> : vector<16x16xf32>
    %112 = tpu.matmul %109, %110, %cst_43 {dimension_numbers = #tpu.dot_dimension_numbers<[1], [1], [0], [0], [0, 0, 1, 0], [], []>} : vector<16x8xf32>, vector<16x8xf32>, vector<16x16xf32> -> vector<16x16xf32>
    %cst_44 = arith.constant -1.000000e+30 : f32
    %113 = vector.broadcast %cst_44 : f32 to vector<16x16xf32>
    %114 = arith.select %40, %112, %113 : vector<16x16xi1>, vector<16x16xf32>
    %cst_45 = arith.constant dense<0xFF800000> : vector<16xf32>
    %115 = vector.multi_reduction <maximumf>, %114, %cst_45 [1] : vector<16x16xf32> to vector<16xf32>
    %116 = vector.shape_cast %115 : vector<16xf32> to vector<16x1xf32>
    %117 = vector.broadcast %116 : vector<16x1xf32> to vector<16x16xf32>
    %118 = arith.subf %114, %117 : vector<16x16xf32>
    %119 = math.exp %118 : vector<16x16xf32>
    %cst_46 = arith.constant dense<0.000000e+00> : vector<16xf32>
    %120 = vector.multi_reduction <add>, %119, %cst_46 [1] : vector<16x16xf32> to vector<16xf32>
    %121 = vector.shape_cast %120 : vector<16xf32> to vector<16x1xf32>
    %122 = tpu.reciprocal %121 {approx = true} : vector<16x1xf32> -> vector<16x1xf32>
    %123 = vector.broadcast %122 : vector<16x1xf32> to vector<16x16xf32>
    %124 = arith.mulf %119, %123 : vector<16x16xf32>
    %cst_47 = arith.constant dense<0.000000e+00> : vector<16x8xf32>
    %125 = tpu.matmul %124, %111, %cst_47 {dimension_numbers = #tpu.dot_dimension_numbers<[1], [0], [0], [1], [0, 0, 1, 1], [], []>} : vector<16x16xf32>, vector<16x8xf32>, vector<16x8xf32> -> vector<16x8xf32>
    %126 = vector.extract_strided_slice %74 {offsets = [0, 24], sizes = [16, 8], strides = [1, 1]} : vector<16x96xf32> to vector<16x8xf32>
    %127 = vector.extract_strided_slice %74 {offsets = [0, 56], sizes = [16, 8], strides = [1, 1]} : vector<16x96xf32> to vector<16x8xf32>
    %128 = vector.extract_strided_slice %74 {offsets = [0, 88], sizes = [16, 8], strides = [1, 1]} : vector<16x96xf32> to vector<16x8xf32>
    %cst_48 = arith.constant dense<0.000000e+00> : vector<16x16xf32>
    %129 = tpu.matmul %126, %127, %cst_48 {dimension_numbers = #tpu.dot_dimension_numbers<[1], [1], [0], [0], [0, 0, 1, 0], [], []>} : vector<16x8xf32>, vector<16x8xf32>, vector<16x16xf32> -> vector<16x16xf32>
    %cst_49 = arith.constant -1.000000e+30 : f32
    %130 = vector.broadcast %cst_49 : f32 to vector<16x16xf32>
    %131 = arith.select %40, %129, %130 : vector<16x16xi1>, vector<16x16xf32>
    %cst_50 = arith.constant dense<0xFF800000> : vector<16xf32>
    %132 = vector.multi_reduction <maximumf>, %131, %cst_50 [1] : vector<16x16xf32> to vector<16xf32>
    %133 = vector.shape_cast %132 : vector<16xf32> to vector<16x1xf32>
    %134 = vector.broadcast %133 : vector<16x1xf32> to vector<16x16xf32>
    %135 = arith.subf %131, %134 : vector<16x16xf32>
    %136 = math.exp %135 : vector<16x16xf32>
    %cst_51 = arith.constant dense<0.000000e+00> : vector<16xf32>
    %137 = vector.multi_reduction <add>, %136, %cst_51 [1] : vector<16x16xf32> to vector<16xf32>
    %138 = vector.shape_cast %137 : vector<16xf32> to vector<16x1xf32>
    %139 = tpu.reciprocal %138 {approx = true} : vector<16x1xf32> -> vector<16x1xf32>
    %140 = vector.broadcast %139 : vector<16x1xf32> to vector<16x16xf32>
    %141 = arith.mulf %136, %140 : vector<16x16xf32>
    %cst_52 = arith.constant dense<0.000000e+00> : vector<16x8xf32>
    %142 = tpu.matmul %141, %128, %cst_52 {dimension_numbers = #tpu.dot_dimension_numbers<[1], [0], [0], [1], [0, 0, 1, 1], [], []>} : vector<16x16xf32>, vector<16x8xf32>, vector<16x8xf32> -> vector<16x8xf32>
    %143 = tpu.concatenate %91, %108, %125, %142 in 1 : vector<16x8xf32>, vector<16x8xf32>, vector<16x8xf32>, vector<16x8xf32> -> vector<16x32xf32>
    %144 = arith.truncf %143 : vector<16x32xf32> to vector<16x32xbf16>
    %c0_53 = arith.constant 0 : index
    %c0_54 = arith.constant 0 : index
    %c0_55 = arith.constant 0 : index
    %145 = vector.load %arg10[%c0_53, %c0_54, %c0_55] : memref<2x32x32xbf16, #tpu.memory_space<vmem>>, vector<1x32x32xbf16>
    %146 = vector.shape_cast %145 : vector<1x32x32xbf16> to vector<32x32xbf16>
    %cst_56 = arith.constant dense<0.000000e+00> : vector<16x32xf32>
    %147 = tpu.matmul %144, %146, %cst_56 {dimension_numbers = #tpu.dot_dimension_numbers<[1], [0], [0], [1], [0, 0, 1, 1], [], []>} : vector<16x32xbf16>, vector<32x32xbf16>, vector<16x32xf32> -> vector<16x32xf32>
    %c0_57 = arith.constant 0 : index
    %c0_58 = arith.constant 0 : index
    %c0_59 = arith.constant 0 : index
    %148 = vector.load %arg11[%c0_57, %c0_58, %c0_59] : memref<2x1x32xf32, #tpu.memory_space<vmem>>, vector<1x1x32xf32>
    %149 = vector.shape_cast %148 : vector<1x1x32xf32> to vector<1x32xf32>
    %150 = vector.broadcast %149 : vector<1x32xf32> to vector<16x32xf32>
    %151 = arith.addf %147, %150 : vector<16x32xf32>
    %152 = arith.addf %28, %151 : vector<16x32xf32>
    %c0_60 = arith.constant 0 : index
    %c0_61 = arith.constant 0 : index
    %c0_62 = arith.constant 0 : index
    %153 = vector.load %arg12[%c0_60, %c0_61, %c0_62] : memref<2x1x32xf32, #tpu.memory_space<vmem>>, vector<1x1x32xf32>
    %154 = vector.shape_cast %153 : vector<1x1x32xf32> to vector<1x32xf32>
    %c0_63 = arith.constant 0 : index
    %c0_64 = arith.constant 0 : index
    %c0_65 = arith.constant 0 : index
    %155 = vector.load %arg13[%c0_63, %c0_64, %c0_65] : memref<2x1x32xf32, #tpu.memory_space<vmem>>, vector<1x1x32xf32>
    %156 = vector.shape_cast %155 : vector<1x1x32xf32> to vector<1x32xf32>
    %cst_66 = arith.constant dense<0.000000e+00> : vector<16xf32>
    %157 = vector.multi_reduction <add>, %152, %cst_66 [1] : vector<16x32xf32> to vector<16xf32>
    %158 = vector.shape_cast %157 : vector<16xf32> to vector<16x1xf32>
    %cst_67 = arith.constant 3.200000e+01 : f32
    %159 = vector.broadcast %cst_67 : f32 to vector<16x1xf32>
    %160 = arith.divf %158, %159 : vector<16x1xf32>
    %161 = vector.broadcast %160 : vector<16x1xf32> to vector<16x32xf32>
    %162 = arith.subf %152, %161 : vector<16x32xf32>
    %163 = arith.mulf %162, %162 : vector<16x32xf32>
    %cst_68 = arith.constant dense<0.000000e+00> : vector<16xf32>
    %164 = vector.multi_reduction <add>, %163, %cst_68 [1] : vector<16x32xf32> to vector<16xf32>
    %165 = vector.shape_cast %164 : vector<16xf32> to vector<16x1xf32>
    %cst_69 = arith.constant 3.200000e+01 : f32
    %166 = vector.broadcast %cst_69 : f32 to vector<16x1xf32>
    %167 = arith.divf %165, %166 : vector<16x1xf32>
    %168 = vector.broadcast %160 : vector<16x1xf32> to vector<16x32xf32>
    %169 = arith.subf %152, %168 : vector<16x32xf32>
    %cst_70 = arith.constant 9.99999974E-6 : f32
    %170 = vector.broadcast %cst_70 : f32 to vector<16x1xf32>
    %171 = arith.addf %167, %170 : vector<16x1xf32>
    %172 = math.rsqrt %171 : vector<16x1xf32>
    %173 = vector.broadcast %172 : vector<16x1xf32> to vector<16x32xf32>
    %174 = arith.mulf %169, %173 : vector<16x32xf32>
    %175 = vector.broadcast %154 : vector<1x32xf32> to vector<16x32xf32>
    %176 = arith.mulf %174, %175 : vector<16x32xf32>
    %177 = vector.broadcast %156 : vector<1x32xf32> to vector<16x32xf32>
    %178 = arith.addf %176, %177 : vector<16x32xf32>
    %179 = arith.truncf %178 : vector<16x32xf32> to vector<16x32xbf16>
    %c0_71 = arith.constant 0 : index
    %c0_72 = arith.constant 0 : index
    %c0_73 = arith.constant 0 : index
    %180 = vector.load %arg14[%c0_71, %c0_72, %c0_73] : memref<2x32x128xbf16, #tpu.memory_space<vmem>>, vector<1x32x128xbf16>
    %181 = vector.shape_cast %180 : vector<1x32x128xbf16> to vector<32x128xbf16>
    %cst_74 = arith.constant dense<0.000000e+00> : vector<16x128xf32>
    %182 = tpu.matmul %179, %181, %cst_74 {dimension_numbers = #tpu.dot_dimension_numbers<[1], [0], [0], [1], [0, 0, 1, 1], [], []>} : vector<16x32xbf16>, vector<32x128xbf16>, vector<16x128xf32> -> vector<16x128xf32>
    %c0_75 = arith.constant 0 : index
    %c0_76 = arith.constant 0 : index
    %c0_77 = arith.constant 0 : index
    %183 = vector.load %arg15[%c0_75, %c0_76, %c0_77] : memref<2x1x128xf32, #tpu.memory_space<vmem>>, vector<1x1x128xf32>
    %184 = vector.shape_cast %183 : vector<1x1x128xf32> to vector<1x128xf32>
    %185 = vector.broadcast %184 : vector<1x128xf32> to vector<16x128xf32>
    %186 = arith.addf %182, %185 : vector<16x128xf32>
    %cst_78 = arith.constant 1.702000e+00 : f32
    %187 = vector.broadcast %cst_78 : f32 to vector<16x128xf32>
    %188 = arith.mulf %187, %186 : vector<16x128xf32>
    %189 = arith.negf %188 : vector<16x128xf32>
    %190 = math.exp %189 : vector<16x128xf32>
    %cst_79 = arith.constant 1.000000e+00 : f32
    %191 = vector.broadcast %cst_79 : f32 to vector<16x128xf32>
    %192 = arith.addf %191, %190 : vector<16x128xf32>
    %193 = arith.divf %191, %192 : vector<16x128xf32>
    %194 = arith.mulf %186, %193 : vector<16x128xf32>
    %195 = arith.truncf %194 : vector<16x128xf32> to vector<16x128xbf16>
    %c0_80 = arith.constant 0 : index
    %c0_81 = arith.constant 0 : index
    %c0_82 = arith.constant 0 : index
    %196 = vector.load %arg16[%c0_80, %c0_81, %c0_82] : memref<2x128x32xbf16, #tpu.memory_space<vmem>>, vector<1x128x32xbf16>
    %197 = vector.shape_cast %196 : vector<1x128x32xbf16> to vector<128x32xbf16>
    %cst_83 = arith.constant dense<0.000000e+00> : vector<16x32xf32>
    %198 = tpu.matmul %195, %197, %cst_83 {dimension_numbers = #tpu.dot_dimension_numbers<[1], [0], [0], [1], [0, 0, 1, 1], [], []>} : vector<16x128xbf16>, vector<128x32xbf16>, vector<16x32xf32> -> vector<16x32xf32>
    %c0_84 = arith.constant 0 : index
    %c0_85 = arith.constant 0 : index
    %c0_86 = arith.constant 0 : index
    %199 = vector.load %arg17[%c0_84, %c0_85, %c0_86] : memref<2x1x32xf32, #tpu.memory_space<vmem>>, vector<1x1x32xf32>
    %200 = vector.shape_cast %199 : vector<1x1x32xf32> to vector<1x32xf32>
    %201 = vector.broadcast %200 : vector<1x32xf32> to vector<16x32xf32>
    %202 = arith.addf %198, %201 : vector<16x32xf32>
    %203 = arith.addf %152, %202 : vector<16x32xf32>
    %c1 = arith.constant 1 : index
    %c0_87 = arith.constant 0 : index
    %c0_88 = arith.constant 0 : index
    %204 = vector.load %arg6[%c1, %c0_87, %c0_88] : memref<2x1x32xf32, #tpu.memory_space<vmem>>, vector<1x1x32xf32>
    %205 = vector.shape_cast %204 : vector<1x1x32xf32> to vector<1x32xf32>
    %c1_89 = arith.constant 1 : index
    %c0_90 = arith.constant 0 : index
    %c0_91 = arith.constant 0 : index
    %206 = vector.load %arg7[%c1_89, %c0_90, %c0_91] : memref<2x1x32xf32, #tpu.memory_space<vmem>>, vector<1x1x32xf32>
    %207 = vector.shape_cast %206 : vector<1x1x32xf32> to vector<1x32xf32>
    %cst_92 = arith.constant dense<0.000000e+00> : vector<16xf32>
    %208 = vector.multi_reduction <add>, %203, %cst_92 [1] : vector<16x32xf32> to vector<16xf32>
    %209 = vector.shape_cast %208 : vector<16xf32> to vector<16x1xf32>
    %cst_93 = arith.constant 3.200000e+01 : f32
    %210 = vector.broadcast %cst_93 : f32 to vector<16x1xf32>
    %211 = arith.divf %209, %210 : vector<16x1xf32>
    %212 = vector.broadcast %211 : vector<16x1xf32> to vector<16x32xf32>
    %213 = arith.subf %203, %212 : vector<16x32xf32>
    %214 = arith.mulf %213, %213 : vector<16x32xf32>
    %cst_94 = arith.constant dense<0.000000e+00> : vector<16xf32>
    %215 = vector.multi_reduction <add>, %214, %cst_94 [1] : vector<16x32xf32> to vector<16xf32>
    %216 = vector.shape_cast %215 : vector<16xf32> to vector<16x1xf32>
    %cst_95 = arith.constant 3.200000e+01 : f32
    %217 = vector.broadcast %cst_95 : f32 to vector<16x1xf32>
    %218 = arith.divf %216, %217 : vector<16x1xf32>
    %219 = vector.broadcast %211 : vector<16x1xf32> to vector<16x32xf32>
    %220 = arith.subf %203, %219 : vector<16x32xf32>
    %cst_96 = arith.constant 9.99999974E-6 : f32
    %221 = vector.broadcast %cst_96 : f32 to vector<16x1xf32>
    %222 = arith.addf %218, %221 : vector<16x1xf32>
    %223 = math.rsqrt %222 : vector<16x1xf32>
    %224 = vector.broadcast %223 : vector<16x1xf32> to vector<16x32xf32>
    %225 = arith.mulf %220, %224 : vector<16x32xf32>
    %226 = vector.broadcast %205 : vector<1x32xf32> to vector<16x32xf32>
    %227 = arith.mulf %225, %226 : vector<16x32xf32>
    %228 = vector.broadcast %207 : vector<1x32xf32> to vector<16x32xf32>
    %229 = arith.addf %227, %228 : vector<16x32xf32>
    %230 = arith.truncf %229 : vector<16x32xf32> to vector<16x32xbf16>
    %c1_97 = arith.constant 1 : index
    %c0_98 = arith.constant 0 : index
    %c0_99 = arith.constant 0 : index
    %231 = vector.load %arg8[%c1_97, %c0_98, %c0_99] : memref<2x32x96xbf16, #tpu.memory_space<vmem>>, vector<1x32x96xbf16>
    %232 = vector.shape_cast %231 : vector<1x32x96xbf16> to vector<32x96xbf16>
    %cst_100 = arith.constant dense<0.000000e+00> : vector<16x96xf32>
    %233 = tpu.matmul %230, %232, %cst_100 {dimension_numbers = #tpu.dot_dimension_numbers<[1], [0], [0], [1], [0, 0, 1, 1], [], []>} : vector<16x32xbf16>, vector<32x96xbf16>, vector<16x96xf32> -> vector<16x96xf32>
    %c1_101 = arith.constant 1 : index
    %c0_102 = arith.constant 0 : index
    %c0_103 = arith.constant 0 : index
    %234 = vector.load %arg9[%c1_101, %c0_102, %c0_103] : memref<2x1x96xf32, #tpu.memory_space<vmem>>, vector<1x1x96xf32>
    %235 = vector.shape_cast %234 : vector<1x1x96xf32> to vector<1x96xf32>
    %236 = vector.broadcast %235 : vector<1x96xf32> to vector<16x96xf32>
    %237 = arith.addf %233, %236 : vector<16x96xf32>
    %238 = vector.extract_strided_slice %237 {offsets = [0, 0], sizes = [16, 8], strides = [1, 1]} : vector<16x96xf32> to vector<16x8xf32>
    %239 = vector.extract_strided_slice %237 {offsets = [0, 32], sizes = [16, 8], strides = [1, 1]} : vector<16x96xf32> to vector<16x8xf32>
    %240 = vector.extract_strided_slice %237 {offsets = [0, 64], sizes = [16, 8], strides = [1, 1]} : vector<16x96xf32> to vector<16x8xf32>
    %cst_104 = arith.constant dense<0.000000e+00> : vector<16x16xf32>
    %241 = tpu.matmul %238, %239, %cst_104 {dimension_numbers = #tpu.dot_dimension_numbers<[1], [1], [0], [0], [0, 0, 1, 0], [], []>} : vector<16x8xf32>, vector<16x8xf32>, vector<16x16xf32> -> vector<16x16xf32>
    %cst_105 = arith.constant -1.000000e+30 : f32
    %242 = vector.broadcast %cst_105 : f32 to vector<16x16xf32>
    %243 = arith.select %40, %241, %242 : vector<16x16xi1>, vector<16x16xf32>
    %cst_106 = arith.constant dense<0xFF800000> : vector<16xf32>
    %244 = vector.multi_reduction <maximumf>, %243, %cst_106 [1] : vector<16x16xf32> to vector<16xf32>
    %245 = vector.shape_cast %244 : vector<16xf32> to vector<16x1xf32>
    %246 = vector.broadcast %245 : vector<16x1xf32> to vector<16x16xf32>
    %247 = arith.subf %243, %246 : vector<16x16xf32>
    %248 = math.exp %247 : vector<16x16xf32>
    %cst_107 = arith.constant dense<0.000000e+00> : vector<16xf32>
    %249 = vector.multi_reduction <add>, %248, %cst_107 [1] : vector<16x16xf32> to vector<16xf32>
    %250 = vector.shape_cast %249 : vector<16xf32> to vector<16x1xf32>
    %251 = tpu.reciprocal %250 {approx = true} : vector<16x1xf32> -> vector<16x1xf32>
    %252 = vector.broadcast %251 : vector<16x1xf32> to vector<16x16xf32>
    %253 = arith.mulf %248, %252 : vector<16x16xf32>
    %cst_108 = arith.constant dense<0.000000e+00> : vector<16x8xf32>
    %254 = tpu.matmul %253, %240, %cst_108 {dimension_numbers = #tpu.dot_dimension_numbers<[1], [0], [0], [1], [0, 0, 1, 1], [], []>} : vector<16x16xf32>, vector<16x8xf32>, vector<16x8xf32> -> vector<16x8xf32>
    %255 = vector.extract_strided_slice %237 {offsets = [0, 8], sizes = [16, 8], strides = [1, 1]} : vector<16x96xf32> to vector<16x8xf32>
    %256 = vector.extract_strided_slice %237 {offsets = [0, 40], sizes = [16, 8], strides = [1, 1]} : vector<16x96xf32> to vector<16x8xf32>
    %257 = vector.extract_strided_slice %237 {offsets = [0, 72], sizes = [16, 8], strides = [1, 1]} : vector<16x96xf32> to vector<16x8xf32>
    %cst_109 = arith.constant dense<0.000000e+00> : vector<16x16xf32>
    %258 = tpu.matmul %255, %256, %cst_109 {dimension_numbers = #tpu.dot_dimension_numbers<[1], [1], [0], [0], [0, 0, 1, 0], [], []>} : vector<16x8xf32>, vector<16x8xf32>, vector<16x16xf32> -> vector<16x16xf32>
    %cst_110 = arith.constant -1.000000e+30 : f32
    %259 = vector.broadcast %cst_110 : f32 to vector<16x16xf32>
    %260 = arith.select %40, %258, %259 : vector<16x16xi1>, vector<16x16xf32>
    %cst_111 = arith.constant dense<0xFF800000> : vector<16xf32>
    %261 = vector.multi_reduction <maximumf>, %260, %cst_111 [1] : vector<16x16xf32> to vector<16xf32>
    %262 = vector.shape_cast %261 : vector<16xf32> to vector<16x1xf32>
    %263 = vector.broadcast %262 : vector<16x1xf32> to vector<16x16xf32>
    %264 = arith.subf %260, %263 : vector<16x16xf32>
    %265 = math.exp %264 : vector<16x16xf32>
    %cst_112 = arith.constant dense<0.000000e+00> : vector<16xf32>
    %266 = vector.multi_reduction <add>, %265, %cst_112 [1] : vector<16x16xf32> to vector<16xf32>
    %267 = vector.shape_cast %266 : vector<16xf32> to vector<16x1xf32>
    %268 = tpu.reciprocal %267 {approx = true} : vector<16x1xf32> -> vector<16x1xf32>
    %269 = vector.broadcast %268 : vector<16x1xf32> to vector<16x16xf32>
    %270 = arith.mulf %265, %269 : vector<16x16xf32>
    %cst_113 = arith.constant dense<0.000000e+00> : vector<16x8xf32>
    %271 = tpu.matmul %270, %257, %cst_113 {dimension_numbers = #tpu.dot_dimension_numbers<[1], [0], [0], [1], [0, 0, 1, 1], [], []>} : vector<16x16xf32>, vector<16x8xf32>, vector<16x8xf32> -> vector<16x8xf32>
    %272 = vector.extract_strided_slice %237 {offsets = [0, 16], sizes = [16, 8], strides = [1, 1]} : vector<16x96xf32> to vector<16x8xf32>
    %273 = vector.extract_strided_slice %237 {offsets = [0, 48], sizes = [16, 8], strides = [1, 1]} : vector<16x96xf32> to vector<16x8xf32>
    %274 = vector.extract_strided_slice %237 {offsets = [0, 80], sizes = [16, 8], strides = [1, 1]} : vector<16x96xf32> to vector<16x8xf32>
    %cst_114 = arith.constant dense<0.000000e+00> : vector<16x16xf32>
    %275 = tpu.matmul %272, %273, %cst_114 {dimension_numbers = #tpu.dot_dimension_numbers<[1], [1], [0], [0], [0, 0, 1, 0], [], []>} : vector<16x8xf32>, vector<16x8xf32>, vector<16x16xf32> -> vector<16x16xf32>
    %cst_115 = arith.constant -1.000000e+30 : f32
    %276 = vector.broadcast %cst_115 : f32 to vector<16x16xf32>
    %277 = arith.select %40, %275, %276 : vector<16x16xi1>, vector<16x16xf32>
    %cst_116 = arith.constant dense<0xFF800000> : vector<16xf32>
    %278 = vector.multi_reduction <maximumf>, %277, %cst_116 [1] : vector<16x16xf32> to vector<16xf32>
    %279 = vector.shape_cast %278 : vector<16xf32> to vector<16x1xf32>
    %280 = vector.broadcast %279 : vector<16x1xf32> to vector<16x16xf32>
    %281 = arith.subf %277, %280 : vector<16x16xf32>
    %282 = math.exp %281 : vector<16x16xf32>
    %cst_117 = arith.constant dense<0.000000e+00> : vector<16xf32>
    %283 = vector.multi_reduction <add>, %282, %cst_117 [1] : vector<16x16xf32> to vector<16xf32>
    %284 = vector.shape_cast %283 : vector<16xf32> to vector<16x1xf32>
    %285 = tpu.reciprocal %284 {approx = true} : vector<16x1xf32> -> vector<16x1xf32>
    %286 = vector.broadcast %285 : vector<16x1xf32> to vector<16x16xf32>
    %287 = arith.mulf %282, %286 : vector<16x16xf32>
    %cst_118 = arith.constant dense<0.000000e+00> : vector<16x8xf32>
    %288 = tpu.matmul %287, %274, %cst_118 {dimension_numbers = #tpu.dot_dimension_numbers<[1], [0], [0], [1], [0, 0, 1, 1], [], []>} : vector<16x16xf32>, vector<16x8xf32>, vector<16x8xf32> -> vector<16x8xf32>
    %289 = vector.extract_strided_slice %237 {offsets = [0, 24], sizes = [16, 8], strides = [1, 1]} : vector<16x96xf32> to vector<16x8xf32>
    %290 = vector.extract_strided_slice %237 {offsets = [0, 56], sizes = [16, 8], strides = [1, 1]} : vector<16x96xf32> to vector<16x8xf32>
    %291 = vector.extract_strided_slice %237 {offsets = [0, 88], sizes = [16, 8], strides = [1, 1]} : vector<16x96xf32> to vector<16x8xf32>
    %cst_119 = arith.constant dense<0.000000e+00> : vector<16x16xf32>
    %292 = tpu.matmul %289, %290, %cst_119 {dimension_numbers = #tpu.dot_dimension_numbers<[1], [1], [0], [0], [0, 0, 1, 0], [], []>} : vector<16x8xf32>, vector<16x8xf32>, vector<16x16xf32> -> vector<16x16xf32>
    %cst_120 = arith.constant -1.000000e+30 : f32
    %293 = vector.broadcast %cst_120 : f32 to vector<16x16xf32>
    %294 = arith.select %40, %292, %293 : vector<16x16xi1>, vector<16x16xf32>
    %cst_121 = arith.constant dense<0xFF800000> : vector<16xf32>
    %295 = vector.multi_reduction <maximumf>, %294, %cst_121 [1] : vector<16x16xf32> to vector<16xf32>
    %296 = vector.shape_cast %295 : vector<16xf32> to vector<16x1xf32>
    %297 = vector.broadcast %296 : vector<16x1xf32> to vector<16x16xf32>
    %298 = arith.subf %294, %297 : vector<16x16xf32>
    %299 = math.exp %298 : vector<16x16xf32>
    %cst_122 = arith.constant dense<0.000000e+00> : vector<16xf32>
    %300 = vector.multi_reduction <add>, %299, %cst_122 [1] : vector<16x16xf32> to vector<16xf32>
    %301 = vector.shape_cast %300 : vector<16xf32> to vector<16x1xf32>
    %302 = tpu.reciprocal %301 {approx = true} : vector<16x1xf32> -> vector<16x1xf32>
    %303 = vector.broadcast %302 : vector<16x1xf32> to vector<16x16xf32>
    %304 = arith.mulf %299, %303 : vector<16x16xf32>
    %cst_123 = arith.constant dense<0.000000e+00> : vector<16x8xf32>
    %305 = tpu.matmul %304, %291, %cst_123 {dimension_numbers = #tpu.dot_dimension_numbers<[1], [0], [0], [1], [0, 0, 1, 1], [], []>} : vector<16x16xf32>, vector<16x8xf32>, vector<16x8xf32> -> vector<16x8xf32>
    %306 = tpu.concatenate %254, %271, %288, %305 in 1 : vector<16x8xf32>, vector<16x8xf32>, vector<16x8xf32>, vector<16x8xf32> -> vector<16x32xf32>
    %307 = arith.truncf %306 : vector<16x32xf32> to vector<16x32xbf16>
    %c1_124 = arith.constant 1 : index
    %c0_125 = arith.constant 0 : index
    %c0_126 = arith.constant 0 : index
    %308 = vector.load %arg10[%c1_124, %c0_125, %c0_126] : memref<2x32x32xbf16, #tpu.memory_space<vmem>>, vector<1x32x32xbf16>
    %309 = vector.shape_cast %308 : vector<1x32x32xbf16> to vector<32x32xbf16>
    %cst_127 = arith.constant dense<0.000000e+00> : vector<16x32xf32>
    %310 = tpu.matmul %307, %309, %cst_127 {dimension_numbers = #tpu.dot_dimension_numbers<[1], [0], [0], [1], [0, 0, 1, 1], [], []>} : vector<16x32xbf16>, vector<32x32xbf16>, vector<16x32xf32> -> vector<16x32xf32>
    %c1_128 = arith.constant 1 : index
    %c0_129 = arith.constant 0 : index
    %c0_130 = arith.constant 0 : index
    %311 = vector.load %arg11[%c1_128, %c0_129, %c0_130] : memref<2x1x32xf32, #tpu.memory_space<vmem>>, vector<1x1x32xf32>
    %312 = vector.shape_cast %311 : vector<1x1x32xf32> to vector<1x32xf32>
    %313 = vector.broadcast %312 : vector<1x32xf32> to vector<16x32xf32>
    %314 = arith.addf %310, %313 : vector<16x32xf32>
    %315 = arith.addf %203, %314 : vector<16x32xf32>
    %c1_131 = arith.constant 1 : index
    %c0_132 = arith.constant 0 : index
    %c0_133 = arith.constant 0 : index
    %316 = vector.load %arg12[%c1_131, %c0_132, %c0_133] : memref<2x1x32xf32, #tpu.memory_space<vmem>>, vector<1x1x32xf32>
    %317 = vector.shape_cast %316 : vector<1x1x32xf32> to vector<1x32xf32>
    %c1_134 = arith.constant 1 : index
    %c0_135 = arith.constant 0 : index
    %c0_136 = arith.constant 0 : index
    %318 = vector.load %arg13[%c1_134, %c0_135, %c0_136] : memref<2x1x32xf32, #tpu.memory_space<vmem>>, vector<1x1x32xf32>
    %319 = vector.shape_cast %318 : vector<1x1x32xf32> to vector<1x32xf32>
    %cst_137 = arith.constant dense<0.000000e+00> : vector<16xf32>
    %320 = vector.multi_reduction <add>, %315, %cst_137 [1] : vector<16x32xf32> to vector<16xf32>
    %321 = vector.shape_cast %320 : vector<16xf32> to vector<16x1xf32>
    %cst_138 = arith.constant 3.200000e+01 : f32
    %322 = vector.broadcast %cst_138 : f32 to vector<16x1xf32>
    %323 = arith.divf %321, %322 : vector<16x1xf32>
    %324 = vector.broadcast %323 : vector<16x1xf32> to vector<16x32xf32>
    %325 = arith.subf %315, %324 : vector<16x32xf32>
    %326 = arith.mulf %325, %325 : vector<16x32xf32>
    %cst_139 = arith.constant dense<0.000000e+00> : vector<16xf32>
    %327 = vector.multi_reduction <add>, %326, %cst_139 [1] : vector<16x32xf32> to vector<16xf32>
    %328 = vector.shape_cast %327 : vector<16xf32> to vector<16x1xf32>
    %cst_140 = arith.constant 3.200000e+01 : f32
    %329 = vector.broadcast %cst_140 : f32 to vector<16x1xf32>
    %330 = arith.divf %328, %329 : vector<16x1xf32>
    %331 = vector.broadcast %323 : vector<16x1xf32> to vector<16x32xf32>
    %332 = arith.subf %315, %331 : vector<16x32xf32>
    %cst_141 = arith.constant 9.99999974E-6 : f32
    %333 = vector.broadcast %cst_141 : f32 to vector<16x1xf32>
    %334 = arith.addf %330, %333 : vector<16x1xf32>
    %335 = math.rsqrt %334 : vector<16x1xf32>
    %336 = vector.broadcast %335 : vector<16x1xf32> to vector<16x32xf32>
    %337 = arith.mulf %332, %336 : vector<16x32xf32>
    %338 = vector.broadcast %317 : vector<1x32xf32> to vector<16x32xf32>
    %339 = arith.mulf %337, %338 : vector<16x32xf32>
    %340 = vector.broadcast %319 : vector<1x32xf32> to vector<16x32xf32>
    %341 = arith.addf %339, %340 : vector<16x32xf32>
    %342 = arith.truncf %341 : vector<16x32xf32> to vector<16x32xbf16>
    %c1_142 = arith.constant 1 : index
    %c0_143 = arith.constant 0 : index
    %c0_144 = arith.constant 0 : index
    %343 = vector.load %arg14[%c1_142, %c0_143, %c0_144] : memref<2x32x128xbf16, #tpu.memory_space<vmem>>, vector<1x32x128xbf16>
    %344 = vector.shape_cast %343 : vector<1x32x128xbf16> to vector<32x128xbf16>
    %cst_145 = arith.constant dense<0.000000e+00> : vector<16x128xf32>
    %345 = tpu.matmul %342, %344, %cst_145 {dimension_numbers = #tpu.dot_dimension_numbers<[1], [0], [0], [1], [0, 0, 1, 1], [], []>} : vector<16x32xbf16>, vector<32x128xbf16>, vector<16x128xf32> -> vector<16x128xf32>
    %c1_146 = arith.constant 1 : index
    %c0_147 = arith.constant 0 : index
    %c0_148 = arith.constant 0 : index
    %346 = vector.load %arg15[%c1_146, %c0_147, %c0_148] : memref<2x1x128xf32, #tpu.memory_space<vmem>>, vector<1x1x128xf32>
    %347 = vector.shape_cast %346 : vector<1x1x128xf32> to vector<1x128xf32>
    %348 = vector.broadcast %347 : vector<1x128xf32> to vector<16x128xf32>
    %349 = arith.addf %345, %348 : vector<16x128xf32>
    %cst_149 = arith.constant 1.702000e+00 : f32
    %350 = vector.broadcast %cst_149 : f32 to vector<16x128xf32>
    %351 = arith.mulf %350, %349 : vector<16x128xf32>
    %352 = arith.negf %351 : vector<16x128xf32>
    %353 = math.exp %352 : vector<16x128xf32>
    %cst_150 = arith.constant 1.000000e+00 : f32
    %354 = vector.broadcast %cst_150 : f32 to vector<16x128xf32>
    %355 = arith.addf %354, %353 : vector<16x128xf32>
    %356 = arith.divf %354, %355 : vector<16x128xf32>
    %357 = arith.mulf %349, %356 : vector<16x128xf32>
    %358 = arith.truncf %357 : vector<16x128xf32> to vector<16x128xbf16>
    %c1_151 = arith.constant 1 : index
    %c0_152 = arith.constant 0 : index
    %c0_153 = arith.constant 0 : index
    %359 = vector.load %arg16[%c1_151, %c0_152, %c0_153] : memref<2x128x32xbf16, #tpu.memory_space<vmem>>, vector<1x128x32xbf16>
    %360 = vector.shape_cast %359 : vector<1x128x32xbf16> to vector<128x32xbf16>
    %cst_154 = arith.constant dense<0.000000e+00> : vector<16x32xf32>
    %361 = tpu.matmul %358, %360, %cst_154 {dimension_numbers = #tpu.dot_dimension_numbers<[1], [0], [0], [1], [0, 0, 1, 1], [], []>} : vector<16x128xbf16>, vector<128x32xbf16>, vector<16x32xf32> -> vector<16x32xf32>
    %c1_155 = arith.constant 1 : index
    %c0_156 = arith.constant 0 : index
    %c0_157 = arith.constant 0 : index
    %362 = vector.load %arg17[%c1_155, %c0_156, %c0_157] : memref<2x1x32xf32, #tpu.memory_space<vmem>>, vector<1x1x32xf32>
    %363 = vector.shape_cast %362 : vector<1x1x32xf32> to vector<1x32xf32>
    %364 = vector.broadcast %363 : vector<1x32xf32> to vector<16x32xf32>
    %365 = arith.addf %361, %364 : vector<16x32xf32>
    %366 = arith.addf %315, %365 : vector<16x32xf32>
    %c0_158 = arith.constant 0 : index
    %c0_159 = arith.constant 0 : index
    %367 = vector.load %arg18[%c0_158, %c0_159] : memref<1x32xf32, #tpu.memory_space<vmem>>, vector<1x32xf32>
    %c0_160 = arith.constant 0 : index
    %c0_161 = arith.constant 0 : index
    %368 = vector.load %arg19[%c0_160, %c0_161] : memref<1x32xf32, #tpu.memory_space<vmem>>, vector<1x32xf32>
    %cst_162 = arith.constant dense<0.000000e+00> : vector<16xf32>
    %369 = vector.multi_reduction <add>, %366, %cst_162 [1] : vector<16x32xf32> to vector<16xf32>
    %370 = vector.shape_cast %369 : vector<16xf32> to vector<16x1xf32>
    %cst_163 = arith.constant 3.200000e+01 : f32
    %371 = vector.broadcast %cst_163 : f32 to vector<16x1xf32>
    %372 = arith.divf %370, %371 : vector<16x1xf32>
    %373 = vector.broadcast %372 : vector<16x1xf32> to vector<16x32xf32>
    %374 = arith.subf %366, %373 : vector<16x32xf32>
    %375 = arith.mulf %374, %374 : vector<16x32xf32>
    %cst_164 = arith.constant dense<0.000000e+00> : vector<16xf32>
    %376 = vector.multi_reduction <add>, %375, %cst_164 [1] : vector<16x32xf32> to vector<16xf32>
    %377 = vector.shape_cast %376 : vector<16xf32> to vector<16x1xf32>
    %cst_165 = arith.constant 3.200000e+01 : f32
    %378 = vector.broadcast %cst_165 : f32 to vector<16x1xf32>
    %379 = arith.divf %377, %378 : vector<16x1xf32>
    %380 = vector.broadcast %372 : vector<16x1xf32> to vector<16x32xf32>
    %381 = arith.subf %366, %380 : vector<16x32xf32>
    %cst_166 = arith.constant 9.99999974E-6 : f32
    %382 = vector.broadcast %cst_166 : f32 to vector<16x1xf32>
    %383 = arith.addf %379, %382 : vector<16x1xf32>
    %384 = math.rsqrt %383 : vector<16x1xf32>
    %385 = vector.broadcast %384 : vector<16x1xf32> to vector<16x32xf32>
    %386 = arith.mulf %381, %385 : vector<16x32xf32>
    %387 = vector.broadcast %367 : vector<1x32xf32> to vector<16x32xf32>
    %388 = arith.mulf %386, %387 : vector<16x32xf32>
    %389 = vector.broadcast %368 : vector<1x32xf32> to vector<16x32xf32>
    %390 = arith.addf %388, %389 : vector<16x32xf32>
    %391 = arith.truncf %390 : vector<16x32xf32> to vector<16x32xbf16>
    %c0_167 = arith.constant 0 : index
    %c0_168 = arith.constant 0 : index
    %392 = vector.load %arg20[%c0_167, %c0_168] : memref<32x16xbf16, #tpu.memory_space<vmem>>, vector<32x16xbf16>
    %cst_169 = arith.constant dense<0.000000e+00> : vector<16x16xf32>
    %393 = tpu.matmul %391, %392, %cst_169 {dimension_numbers = #tpu.dot_dimension_numbers<[1], [0], [0], [1], [0, 0, 1, 1], [], []>} : vector<16x32xbf16>, vector<32x16xbf16>, vector<16x16xf32> -> vector<16x16xf32>
    %c0_170 = arith.constant 0 : index
    %c0_171 = arith.constant 0 : index
    %394 = vector.load %arg21[%c0_170, %c0_171] : memref<1x16xf32, #tpu.memory_space<vmem>>, vector<1x16xf32>
    %395 = vector.broadcast %394 : vector<1x16xf32> to vector<16x16xf32>
    %396 = arith.addf %393, %395 : vector<16x16xf32>
    %397 = arith.mulf %396, %396 : vector<16x16xf32>
    %cst_172 = arith.constant dense<0.000000e+00> : vector<16xf32>
    %398 = vector.multi_reduction <add>, %397, %cst_172 [1] : vector<16x16xf32> to vector<16xf32>
    %399 = vector.shape_cast %398 : vector<16xf32> to vector<16x1xf32>
    %cst_173 = arith.constant 1.000000e-24 : f32
    %400 = vector.broadcast %cst_173 : f32 to vector<16x1xf32>
    %401 = arith.maximumf %399, %400 : vector<16x1xf32>
    %402 = math.rsqrt %401 : vector<16x1xf32>
    %403 = vector.broadcast %402 : vector<16x1xf32> to vector<16x16xf32>
    %404 = arith.mulf %396, %403 : vector<16x16xf32>
    %c0_174 = arith.constant 0 : index
    %c0_175 = arith.constant 0 : index
    %405 = vector.load %arg22[%c0_174, %c0_175] : memref<16x16xf32, #tpu.memory_space<vmem>>, vector<16x16xf32>
    tpu.vector_store %arg22[%c0_174, %c0_175], %404 {strides = array<i32>} : memref<16x16xf32, #tpu.memory_space<vmem>>, vector<16x16xf32>,
    return
  }
  func.func @transform_0(%arg0: i32) -> (i32, i32) {
    %c0_i32 = arith.constant 0 : i32
    %c0_i32_0 = arith.constant 0 : i32
    return %arg0, %c0_i32 : i32, i32
  }
  func.func @transform_1(%arg0: i32) -> (i32, i32) {
    %c0_i32 = arith.constant 0 : i32
    %c0_i32_0 = arith.constant 0 : i32
    %c0_i32_1 = arith.constant 0 : i32
    return %c0_i32, %c0_i32_0 : i32, i32
  }
  func.func @transform_2(%arg0: i32) -> (i32, i32) {
    %c0_i32 = arith.constant 0 : i32
    %c0_i32_0 = arith.constant 0 : i32
    %c0_i32_1 = arith.constant 0 : i32
    return %c0_i32, %c0_i32_0 : i32, i32
  }
  func.func @transform_3(%arg0: i32) -> (i32, i32) {
    %c0_i32 = arith.constant 0 : i32
    %c0_i32_0 = arith.constant 0 : i32
    %c0_i32_1 = arith.constant 0 : i32
    return %c0_i32, %c0_i32_0 : i32, i32
  }
  func.func @transform_4(%arg0: i32) -> (i32, i32) {
    %c0_i32 = arith.constant 0 : i32
    %c0_i32_0 = arith.constant 0 : i32
    %c0_i32_1 = arith.constant 0 : i32
    return %c0_i32, %c0_i32_0 : i32, i32
  }
  func.func @transform_5(%arg0: i32) -> (i32, i32, i32) {
    %c0_i32 = arith.constant 0 : i32
    %c0_i32_0 = arith.constant 0 : i32
    %c0_i32_1 = arith.constant 0 : i32
    %c0_i32_2 = arith.constant 0 : i32
    return %c0_i32, %c0_i32_0, %c0_i32_1 : i32, i32, i32
  }
  func.func @transform_6(%arg0: i32) -> (i32, i32, i32) {
    %c0_i32 = arith.constant 0 : i32
    %c0_i32_0 = arith.constant 0 : i32
    %c0_i32_1 = arith.constant 0 : i32
    %c0_i32_2 = arith.constant 0 : i32
    return %c0_i32, %c0_i32_0, %c0_i32_1 : i32, i32, i32
  }
  func.func @transform_7(%arg0: i32) -> (i32, i32, i32) {
    %c0_i32 = arith.constant 0 : i32
    %c0_i32_0 = arith.constant 0 : i32
    %c0_i32_1 = arith.constant 0 : i32
    %c0_i32_2 = arith.constant 0 : i32
    return %c0_i32, %c0_i32_0, %c0_i32_1 : i32, i32, i32
  }
  func.func @transform_8(%arg0: i32) -> (i32, i32, i32) {
    %c0_i32 = arith.constant 0 : i32
    %c0_i32_0 = arith.constant 0 : i32
    %c0_i32_1 = arith.constant 0 : i32
    %c0_i32_2 = arith.constant 0 : i32
    return %c0_i32, %c0_i32_0, %c0_i32_1 : i32, i32, i32
  }
  func.func @transform_9(%arg0: i32) -> (i32, i32, i32) {
    %c0_i32 = arith.constant 0 : i32
    %c0_i32_0 = arith.constant 0 : i32
    %c0_i32_1 = arith.constant 0 : i32
    %c0_i32_2 = arith.constant 0 : i32
    return %c0_i32, %c0_i32_0, %c0_i32_1 : i32, i32, i32
  }
  func.func @transform_10(%arg0: i32) -> (i32, i32, i32) {
    %c0_i32 = arith.constant 0 : i32
    %c0_i32_0 = arith.constant 0 : i32
    %c0_i32_1 = arith.constant 0 : i32
    %c0_i32_2 = arith.constant 0 : i32
    return %c0_i32, %c0_i32_0, %c0_i32_1 : i32, i32, i32
  }
  func.func @transform_11(%arg0: i32) -> (i32, i32, i32) {
    %c0_i32 = arith.constant 0 : i32
    %c0_i32_0 = arith.constant 0 : i32
    %c0_i32_1 = arith.constant 0 : i32
    %c0_i32_2 = arith.constant 0 : i32
    return %c0_i32, %c0_i32_0, %c0_i32_1 : i32, i32, i32
  }
  func.func @transform_12(%arg0: i32) -> (i32, i32, i32) {
    %c0_i32 = arith.constant 0 : i32
    %c0_i32_0 = arith.constant 0 : i32
    %c0_i32_1 = arith.constant 0 : i32
    %c0_i32_2 = arith.constant 0 : i32
    return %c0_i32, %c0_i32_0, %c0_i32_1 : i32, i32, i32
  }
  func.func @transform_13(%arg0: i32) -> (i32, i32, i32) {
    %c0_i32 = arith.constant 0 : i32
    %c0_i32_0 = arith.constant 0 : i32
    %c0_i32_1 = arith.constant 0 : i32
    %c0_i32_2 = arith.constant 0 : i32
    return %c0_i32, %c0_i32_0, %c0_i32_1 : i32, i32, i32
  }
  func.func @transform_14(%arg0: i32) -> (i32, i32, i32) {
    %c0_i32 = arith.constant 0 : i32
    %c0_i32_0 = arith.constant 0 : i32
    %c0_i32_1 = arith.constant 0 : i32
    %c0_i32_2 = arith.constant 0 : i32
    return %c0_i32, %c0_i32_0, %c0_i32_1 : i32, i32, i32
  }
  func.func @transform_15(%arg0: i32) -> (i32, i32, i32) {
    %c0_i32 = arith.constant 0 : i32
    %c0_i32_0 = arith.constant 0 : i32
    %c0_i32_1 = arith.constant 0 : i32
    %c0_i32_2 = arith.constant 0 : i32
    return %c0_i32, %c0_i32_0, %c0_i32_1 : i32, i32, i32
  }
  func.func @transform_16(%arg0: i32) -> (i32, i32, i32) {
    %c0_i32 = arith.constant 0 : i32
    %c0_i32_0 = arith.constant 0 : i32
    %c0_i32_1 = arith.constant 0 : i32
    %c0_i32_2 = arith.constant 0 : i32
    return %c0_i32, %c0_i32_0, %c0_i32_1 : i32, i32, i32
  }
  func.func @transform_17(%arg0: i32) -> (i32, i32) {
    %c0_i32 = arith.constant 0 : i32
    %c0_i32_0 = arith.constant 0 : i32
    %c0_i32_1 = arith.constant 0 : i32
    return %c0_i32, %c0_i32_0 : i32, i32
  }
  func.func @transform_18(%arg0: i32) -> (i32, i32) {
    %c0_i32 = arith.constant 0 : i32
    %c0_i32_0 = arith.constant 0 : i32
    %c0_i32_1 = arith.constant 0 : i32
    return %c0_i32, %c0_i32_0 : i32, i32
  }
  func.func @transform_19(%arg0: i32) -> (i32, i32) {
    %c0_i32 = arith.constant 0 : i32
    %c0_i32_0 = arith.constant 0 : i32
    %c0_i32_1 = arith.constant 0 : i32
    return %c0_i32, %c0_i32_0 : i32, i32
  }
  func.func @transform_20(%arg0: i32) -> (i32, i32) {
    %c0_i32 = arith.constant 0 : i32
    %c0_i32_0 = arith.constant 0 : i32
    %c0_i32_1 = arith.constant 0 : i32
    return %c0_i32, %c0_i32_0 : i32, i32
  }
  func.func @transform_21(%arg0: i32) -> (i32, i32) {
    %c0_i32 = arith.constant 0 : i32
    %c0_i32_0 = arith.constant 0 : i32
    return %arg0, %c0_i32 : i32, i32
  }
}

</mosaic_0001>

<bundles_post_ra>
// kernel: tpu_custom_call.1
= control target key start
LH: loop header
LB: loop body
LE: loop exit
PB: predicated region body
PF: predicated region fallthrough
CT: control target
= control target key end

     0   :  { %s3942_s0 = inlined_call_operand.vmem [shape: bf16[16,768], index: 0, kind: input, shape index: {}]   ;;  %s3943_s1 = inlined_call_operand.vmem [shape: f32[16,32], index: 1, kind: input, shape index: {}]   ;;  %s3944_s2 = inlined_call_operand.vmem [shape: bf16[768,32], index: 2, kind: input, shape index: {}]   ;;  %s3945_s3 = inlined_call_operand.vmem [shape: f32[1,32], index: 3, kind: input, shape index: {}]   ;;  %s3946_s4 = inlined_call_operand.vmem [shape: f32[1,32], index: 4, kind: input, shape index: {}]   ;;  %s3947_s5 = inlined_call_operand.vmem [shape: f32[2,1,32], index: 5, kind: input, shape index: {}]   ;;  %s3948_s6 = inlined_call_operand.vmem [shape: f32[2,1,32], index: 6, kind: input, shape index: {}]   ;;  %s3949_s7 = inlined_call_operand.vmem [shape: bf16[2,32,96], index: 7, kind: input, shape index: {}]   ;;  %s3950_s8 = inlined_call_operand.vmem [shape: f32[2,1,96], index: 8, kind: input, shape index: {}]   ;;  %s3951_s9 = inlined_call_operand.vmem [shape: bf16[2,32,32], index: 9, kind: input, shape index: {}]   ;;  %s3952_s10 = inlined_call_operand.vmem [shape: f32[2,1,32], index: 10, kind: input, shape index: {}]   ;;  %s3953_s11 = inlined_call_operand.vmem [shape: f32[2,1,32], index: 11, kind: input, shape index: {}]   ;;  %s3954_s12 = inlined_call_operand.vmem [shape: f32[2,1,32], index: 12, kind: input, shape index: {}]   ;;  %s3955_s13 = inlined_call_operand.vmem [shape: bf16[2,32,128], index: 13, kind: input, shape index: {}]   ;;  %s3956_s14 = inlined_call_operand.vmem [shape: f32[2,1,128], index: 14, kind: input, shape index: {}]   ;;  %s3957_s15 = inlined_call_operand.vmem [shape: bf16[2,128,32], index: 15, kind: input, shape index: {}]   ;;  %s3958_s16 = inlined_call_operand.vmem [shape: f32[2,1,32], index: 16, kind: input, shape index: {}]   ;;  %s3959_s17 = inlined_call_operand.vmem [shape: f32[1,32], index: 17, kind: input, shape index: {}]   ;;  %s3960_s18 = inlined_call_operand.vmem [shape: f32[1,32], index: 18, kind: input, shape index: {}]   ;;  %s3961_s19 = inlined_call_operand.vmem [shape: bf16[32,16], index: 19, kind: input, shape index: {}]   ;;  %s3962_s20 = inlined_call_operand.vmem [shape: f32[1,16], index: 20, kind: input, shape index: {}]   ;;  %s3963_s21 = inlined_call_operand.hbm [shape: f32[16,16], index: 21, kind: output, shape index: {}]  }
   0x1   :  { %3983 = sst [smem:[#allocation5_spill]] %s3942_s0 }
   0x2   :  { %3984 = sst [smem:[#allocation6_spill]] %s3943_s1 }
   0x3   :  { %3985 = sst [smem:[#allocation7_spill]] %s3944_s2 }
   0x4   :  { %3986 = sst [smem:[#allocation8_spill]] %s3945_s3 }
   0x5   :  { %3987 = sst [smem:[#allocation9_spill]] %s3946_s4 }
   0x6   :  { %3988 = sst [smem:[#allocation10_spill]] %s3947_s5 }
   0x7   :  { %s3989_s26 = sld [smem:[#allocation7_spill]] }
   0x8   :  { %s3990_s0 = sld [smem:[#allocation5_spill]] }
   0xd   :  { %v2809_v0 = vld [vmem:[%s3989_s26 + $0x38] sm:$0xff]  ;;  %v2808_v4 = vld [vmem:[%s3989_s26 + $0x30] sm:$0xff]  ;;  %v2807_v8 = vld [vmem:[%s3989_s26 + $0x28] sm:$0xff] }
   0xe   :  { %v2817_v1 = vld [vmem:[%s3989_s26 + $0x78] sm:$0xff]  ;;  %492 = vmatpush.bf16.msra.mxu0 %v2809_v0  ;;  %v2816_v5 = vld [vmem:[%s3989_s26 + $0x70] sm:$0xff]  ;;  %v2815_v9 = vld [vmem:[%s3989_s26 + $0x68] sm:$0xff] }
   0xf   :  { %v2825_v2 = vld [vmem:[%s3989_s26 + $0xb8] sm:$0xff]  ;;  %506 = vmatpush.bf16.msra.mxu1 %v2817_v1  ;;  %v2824_v6 = vld [vmem:[%s3989_s26 + $0xb0] sm:$0xff]  ;;  %v2823_v10 = vld [vmem:[%s3989_s26 + $0xa8] sm:$0xff] }
  0x10   :  { %v2833_v3 = vld [vmem:[%s3989_s26 + $0xf8] sm:$0xff]  ;;  %520 = vmatpush.bf16.msra.mxu2 %v2825_v2  ;;  %v2832_v7 = vld [vmem:[%s3989_s26 + $0xf0] sm:$0xff]  ;;  %v2831_v11 = vld [vmem:[%s3989_s26 + $0xe8] sm:$0xff] }
  0x11   :  { %534 = vmatpush.bf16.msra.mxu3 %v2833_v3  ;;  %v2806_v12 = vld [vmem:[%s3989_s26 + $0x20] sm:$0xff]  ;;  %v2805_v16 = vld [vmem:[%s3989_s26 + $0x18] sm:$0xff]  ;;  %v2804_v20 = vld [vmem:[%s3989_s26 + $0x10] sm:$0xff] }
  0x12   :  { %493 = vmatpush.bf16.msra.mxu0 %v2808_v4  ;;  %v2814_v13 = vld [vmem:[%s3989_s26 + $0x60] sm:$0xff]  ;;  %v2813_v17 = vld [vmem:[%s3989_s26 + $0x58] sm:$0xff]  ;;  %v2812_v21 = vld [vmem:[%s3989_s26 + $0x50] sm:$0xff] }
  0x13   :  { %507 = vmatpush.bf16.msra.mxu1 %v2816_v5  ;;  %v2822_v14 = vld [vmem:[%s3989_s26 + $0xa0] sm:$0xff]  ;;  %v2821_v18 = vld [vmem:[%s3989_s26 + $0x98] sm:$0xff]  ;;  %v2820_v22 = vld [vmem:[%s3989_s26 + $0x90] sm:$0xff] }
  0x14   :  { %521 = vmatpush.bf16.msra.mxu2 %v2824_v6  ;;  %v2830_v15 = vld [vmem:[%s3989_s26 + $0xe0] sm:$0xff]  ;;  %v2829_v19 = vld [vmem:[%s3989_s26 + $0xd8] sm:$0xff]  ;;  %v2828_v23 = vld [vmem:[%s3989_s26 + $0xd0] sm:$0xff] }
  0x15   :  { %535 = vmatpush.bf16.msra.mxu3 %v2832_v7  ;;  %v2803_v24 = vld [vmem:[%s3989_s26 + $0x8] sm:$0xff]  ;;  %v2802_v28 = vld [vmem:[%s3989_s26] sm:$0xff] }
  0x16   :  { %494 = vmatpush.bf16.msra.mxu0 %v2807_v8  ;;  %v2811_v25 = vld [vmem:[%s3989_s26 + $0x48] sm:$0xff]  ;;  %v2810_v29 = vld [vmem:[%s3989_s26 + $0x40] sm:$0xff] }
  0x17   :  { %508 = vmatpush.bf16.msra.mxu1 %v2815_v9  ;;  %v2819_v26 = vld [vmem:[%s3989_s26 + $0x88] sm:$0xff]  ;;  %v2367_v30 = vld [vmem:[%s3990_s0] sm:$0xf] }
  0x18   :  { %522 = vmatpush.bf16.msra.mxu2 %v2823_v10  ;;  %v2827_v27 = vld [vmem:[%s3989_s26 + $0xc8] sm:$0xff] }
  0x19   :  { %536 = vmatpush.bf16.msra.mxu3 %v2831_v11 }
  0x1a   :  { %495 = vmatpush.bf16.msra.mxu0 %v2806_v12 }
  0x1b   :  { %509 = vmatpush.bf16.msra.mxu1 %v2814_v13 }
  0x1c   :  { %523 = vmatpush.bf16.msra.mxu2 %v2822_v14 }
  0x1d   :  { %537 = vmatpush.bf16.msra.mxu3 %v2830_v15 }
  0x1e   :  { %496 = vmatpush.bf16.msra.mxu0 %v2805_v16 }
  0x1f   :  { %510 = vmatpush.bf16.msra.mxu1 %v2813_v17 }
  0x20   :  { %524 = vmatpush.bf16.msra.mxu2 %v2821_v18 }
  0x21   :  { %538 = vmatpush.bf16.msra.mxu3 %v2829_v19 }
  0x22   :  { %497 = vmatpush.bf16.msra.mxu0 %v2804_v20 }
  0x23   :  { %511 = vmatpush.bf16.msra.mxu1 %v2812_v21 }
  0x24   :  { %525 = vmatpush.bf16.msra.mxu2 %v2820_v22 }
  0x25   :  { %539 = vmatpush.bf16.msra.mxu3 %v2828_v23 }
  0x26   :  { %26 = vsyncpa [#allocation3], 0  ;;  %498 = vmatpush.bf16.msra.mxu0 %v2803_v24  ;;  %v2799_v31 = vld [vmem:[%s3990_s0 + $0x14] sm:$0xf0]  ;;  %v2796_v32 = vld [vmem:[%s3990_s0 + $0x4] sm:$0xf] }
  0x27   :  { %512 = vmatpush.bf16.msra.mxu1 %v2811_v25  ;;  %v2369_v33 = vld [vmem:[%s3990_s0 + $0x18] sm:$0xf0]  ;;  %v2818_v36 = vld [vmem:[%s3989_s26 + $0x80] sm:$0xff]  ;;  %v2375_v38 = vld [vmem:[%s3990_s0 + $0x8] sm:$0xf]  ;;  %v2368_v40 = vor.u32 %v2799_v31, %v2367_v30  ;;  %s3991_s2 = sld [smem:[#allocation6_spill]] }
  0x28   :  { %526 = vmatpush.bf16.msra.mxu2 %v2819_v26  ;;  %v2841_v34 = vld [vmem:[%s3989_s26 + $0x138] sm:$0xff]  ;;  %v2826_v37 = vld [vmem:[%s3989_s26 + $0xc0] sm:$0xff]  ;;  %v2797_v41 = vld [vmem:[%s3990_s0 + $0xc] sm:$0xf]  ;;  %v2372_v43 = vor.u32 %v2796_v32, %v2369_v33  ;;  %vm578_vm0 = vcmask 261120   ;;  %v3126_v30 = vmov 32.0  }
  0x29   :  { %540 = vmatpush.bf16.msra.mxu3 %v2827_v27  ;;  %v2849_v35 = vld [vmem:[%s3989_s26 + $0x178] sm:$0xff]  ;;  %v2800_v39 = vld [vmem:[%s3990_s0 + $0x1c] sm:$0xf0]  ;;  %v2377_v42 = vld [vmem:[%s3990_s0 + $0x20] sm:$0xf0]  ;;  %2990 = vrcp.f32 %v3126_v30  ;;  %s3992_s28 = sld [smem:[#allocation8_spill]] }
  0x2a   :  { %499 = vmatpush.bf16.msra.mxu0 %v2802_v28  ;;  %v2840_v44 = vld [vmem:[%s3989_s26 + $0x130] sm:$0xff]  ;;  %v2376_v46 = vor.u32 %v2800_v39, %v2375_v38  ;;  %v2380_v47 = vor.u32 %v2797_v41, %v2377_v42  ;;  %v2839_v48 = vld [vmem:[%s3989_s26 + $0x128] sm:$0xff]  ;;  %v2838_v50 = vld [vmem:[%s3989_s26 + $0x120] sm:$0xff]  ;;  %s3993_s30 = sld [smem:[#allocation9_spill]]  ;;  %s3128_s29 = smov 88   ;;  %vm754_vm14 = vcmask 64512  }
  0x2b   :  { %513 = vmatpush.bf16.msra.mxu1 %v2810_v29  ;;  %v2848_v45 = vld [vmem:[%s3989_s26 + $0x170] sm:$0xff]  ;;  %v2847_v49 = vld [vmem:[%s3989_s26 + $0x168] sm:$0xff]  ;;  %v2846_v51 = vld [vmem:[%s3989_s26 + $0x160] sm:$0xff]  ;;  %s3979_s4 = smov 120   ;;  %s3981_s5 = smov 72  }
  0x2c   :  { %527 = vmatpush.bf16.msra.mxu2 %v2818_v36  ;;  %v2837_v52 = vld [vmem:[%s3989_s26 + $0x118] sm:$0xff]  ;;  %v2836_v54 = vld [vmem:[%s3989_s26 + $0x110] sm:$0xff]  ;;  %v2835_v56 = vld [vmem:[%s3989_s26 + $0x108] sm:$0xff]  ;;  %s3977_s22 = smov 112   ;;  %s3971_s23 = smov 104  }
  0x2d   :  { %541 = vmatpush.bf16.msra.mxu3 %v2826_v37  ;;  %500 = vmatmul.bf16.vlgmr.msra.gmra.mxu0 %v2368_v40  ;;  %v2845_v53 = vld [vmem:[%s3989_s26 + $0x158] sm:$0xff]  ;;  %v2844_v55 = vld [vmem:[%s3989_s26 + $0x150] sm:$0xff]  ;;  %v2843_v57 = vld [vmem:[%s3989_s26 + $0x148] sm:$0xff]  ;;  %s3134_s1 = smov 64   ;;  %s3970_s24 = smov 56  }
  0x2e   :  { %548 = vmatpush.bf16.msrb.mxu0 %v2841_v34  ;;  %514 = vmatmul.bf16.vlgmr.msra.gmra.mxu1 %v2372_v43  ;;  %v2834_v58 = vld [vmem:[%s3989_s26 + $0x100] sm:$0xff]  ;;  %v2383_v60 = vld [vmem:[%s3990_s0 + $0x10] sm:$0xf]  ;;  %v2801_v61 = vld [vmem:[%s3990_s0 + $0x24] sm:$0xf0]  ;;  %s3969_s25 = smov 40  }
  0x2f   :  { %562 = vmatpush.bf16.msrb.mxu1 %v2849_v35  ;;  %528 = vmatmul.bf16.vlgmr.msra.gmra.mxu2 %v2376_v46  ;;  %v2842_v59 = vld [vmem:[%s3989_s26 + $0x140] sm:$0xff]  ;;  %v2798_v62 = vld [vmem:[%s3990_s0 + $0x14] sm:$0xf]  ;;  %v2385_v63 = vld [vmem:[%s3990_s0 + $0x28] sm:$0xf0]  ;;  %v2384_v0 = vor.u32 %v2801_v61, %v2383_v60  ;;  %v2991_v31 = vpop.eup %2990  ;;  %s3968_s26 = smov 48  }
  0x30   :  { %542 = vmatmul.bf16.vlgmr.msra.gmra.mxu3 %v2380_v47  ;;  %v2388_v1 = vor.u32 %v2798_v62, %v2385_v63  ;;  %v172_v4 = vld [vmem:[%s3991_s2] sm:$0xff]  ;;  %v173_v8 = vld [vmem:[%s3991_s2 + $0x8] sm:$0xff]  ;;  %v586_v32 = vmul.f32 32.0, %v2991_v31  ;;  %vm590_vm1 = vweird.f32 %v2991_v31  ;;  %s3994_s2 = sld [smem:[#allocation10_spill]]  ;;  %s3975_s27 = smov 8  }
  0x31   :  { %v2969_v61 = vld [vmem:[%s3992_s28] ss:$0 sm:$0xff]  ;;  %s3127_s28 = smov 96   ;;  %s3974_s0 = smov 16  }
  0x32   :  { %549 = vmatpush.bf16.msrb.mxu0 %v2840_v44  ;;  %v587_v33 = vsub.f32 1.0, %v586_v32  ;;  %s3973_s3 = smov 24  }
  0x33   :  { %563 = vmatpush.bf16.msrb.mxu1 %v2848_v45 }
  0x34   :  { %v588_v34 = vmul.f32 %v2991_v31, %v587_v33 }
  0x36   :  { %550 = vmatpush.bf16.msrb.mxu0 %v2839_v48  ;;  %v589_v35 = vadd.f32 %v2991_v31, %v588_v34 }
  0x37   :  { %564 = vmatpush.bf16.msrb.mxu1 %v2847_v49 }
  0x38   :  { %v3441_v36 = vsel %vm590_vm1, %v2991_v31, %v589_v35 }
  0x3a   :  { %551 = vmatpush.bf16.msrb.mxu0 %v2838_v50 }
  0x3b   :  { %565 = vmatpush.bf16.msrb.mxu1 %v2846_v51 }
  0x3e   :  { %552 = vmatpush.bf16.msrb.mxu0 %v2837_v52 }
  0x3f   :  { %566 = vmatpush.bf16.msrb.mxu1 %v2845_v53 }
  0x42   :  { %553 = vmatpush.bf16.msrb.mxu0 %v2836_v54 }
  0x43   :  { %567 = vmatpush.bf16.msrb.mxu1 %v2844_v55 }
  0x46   :  { %554 = vmatpush.bf16.msrb.mxu0 %v2835_v56 }
  0x47   :  { %568 = vmatpush.bf16.msrb.mxu1 %v2843_v57 }
  0x4a   :  { %555 = vmatpush.bf16.msrb.mxu0 %v2834_v58 }
  0x4b   :  { %569 = vmatpush.bf16.msrb.mxu1 %v2842_v59 }
  0x4d   :  { %556 = vmatmul.bf16.vlgmr.msrb.gmra.mxu0 %v2384_v0 }
  0x4e   :  { %570 = vmatmul.bf16.vlgmr.msrb.gmra.mxu1 %v2388_v1  ;;  %v2970_v1 = vld [vmem:[%s3993_s30] ss:$0 sm:$0xff]  ;;  %s3130_s30 = smov 80  }
  0xaa   :  { %v501_v2 = vpop.f32.mrf.mxu0 }
  0xab   :  { %v515_v3 = vpop.f32.mrf.mxu1  ;;  %v502_v5 = vadd.f32 %v501_v2, %v172_v4 }
  0xad   :  { %v516_v7 = vadd.f32 %v515_v3, %v502_v5 }
  0xb2   :  { %v529_v6 = vpop.f32.mrf.mxu2  ;;  %v503_v9 = vpop.f32.mrf.mxu0 }
  0xb3   :  { %v517_v10 = vpop.f32.mrf.mxu1  ;;  %v543_v11 = vpop.f32.mrf.mxu3  ;;  %v530_v12 = vadd.f32 %v529_v6, %v516_v7  ;;  %v504_v13 = vadd.f32 %v503_v9, %v173_v8 }
  0xb5   :  { %v544_v14 = vadd.f32 %v543_v11, %v530_v12  ;;  %v518_v15 = vadd.f32 %v517_v10, %v504_v13 }
  0xba   :  { %v531_v16 = vpop.f32.mrf.mxu2 }
  0xbb   :  { %v532_v20 = vadd.f32 %v531_v16, %v518_v15  ;;  %v545_v22 = vpop.f32.mrf.mxu3 }
  0xbd   :  { %v546_v24 = vadd.f32 %v545_v22, %v532_v20 }
  0xca   :  { %v557_v17 = vpop.f32.mrf.mxu0 }
  0xcb   :  { %v571_v18 = vpop.f32.mrf.mxu1  ;;  %v558_v19 = vadd.f32 %v557_v17, %v544_v14 }
  0xcd   :  { %v572_v21 = vadd.f32 %v571_v18, %v558_v19 }
  0xcf   :  { %v579_v23 = vsel %vm578_vm0, %v572_v21, 0.0 }
  0xd0   :  { %580 = vadd.xlane.f32.xlu0 %v579_v23  ;;  %v2851_v23 = vld [vmem:[%s3949_s7 + $0x8] sm:$0xff] }
  0xd1   :  { %740 = vmatpush.bf16.msrb.mxu2 %v2851_v23 }
  0xd2   :  { %v559_v25 = vpop.f32.mrf.mxu0 }
  0xd3   :  { %v560_v26 = vadd.f32 %v559_v25, %v546_v24  ;;  %v573_v27 = vpop.f32.mrf.mxu1  ;;  %v2850_v25 = vld [vmem:[%s3949_s7] sm:$0xff] }
  0xd5   :  { %v574_v28 = vadd.f32 %v573_v27, %v560_v26  ;;  %741 = vmatpush.bf16.msrb.mxu2 %v2850_v25 }
  0xd7   :  { %v582_v29 = vsel %vm578_vm0, %v574_v28, 0.0 }
  0xd8   :  { %583 = vadd.xlane.f32.xlu0 %v582_v29 }
 0x143   :  { %v581_v37 = vpop.xlane.xlu0 %580 }
 0x144   :  { %v592_v38 = vmul.f32 %v3441_v36, %v581_v37 }
 0x146   :  { %v594_v39 = vsub.f32 %v572_v21, %v592_v38 }
 0x148   :  { %v596_v40 = vmul.f32 %v594_v39, %v594_v39 }
 0x14a   :  { %v598_v41 = vsel %vm578_vm0, %v596_v40, 0.0 }
 0x14b   :  { %599 = vadd.xlane.f32.xlu1 %v598_v41  ;;  %v584_v42 = vpop.xlane.xlu0 %583 }
 0x14c   :  { %v593_v43 = vmul.f32 %v3441_v36, %v584_v42 }
 0x14e   :  { %v595_v44 = vsub.f32 %v574_v28, %v593_v43 }
 0x150   :  { %v597_v45 = vmul.f32 %v595_v44, %v595_v44 }
 0x152   :  { %v601_v46 = vsel %vm578_vm0, %v597_v45, 0.0  ;;  %v2971_v45 = vld [vmem:[%s3994_s2] ss:$0 sm:$0xff] }
 0x153   :  { %602 = vadd.xlane.f32.xlu1 %v601_v46 }
 0x1be   :  { %v600_v47 = vpop.xlane.xlu1 %599 }
 0x1bf   :  { %v604_v48 = vmul.f32 %v600_v47, %v3441_v36 }
 0x1c1   :  { %v606_v49 = vadd.f32 1e-05, %v604_v48 }
 0x1c3   :  { %2992 = vrsqrt.f32 %v606_v49  ;;  %vm614_vm3 = vweird.f32 %v606_v49 }
 0x1c6   :  { %v603_v50 = vpop.xlane.xlu1 %602 }
 0x1c7   :  { %v605_v51 = vmul.f32 %v603_v50, %v3441_v36  ;;  %v2972_v50 = vld [vmem:[%s3948_s6] ss:$0 sm:$0xff] }
 0x1c9   :  { %v2993_v52 = vpop.eup %2992  ;;  %v607_v53 = vadd.f32 1e-05, %v605_v51 }
 0x1ca   :  { %v609_v54 = vmul.f32 %v2993_v52, %v606_v49  ;;  %vm615_vm2 = vweird.f32 %v2993_v52 }
 0x1cb   :  { %2994 = vrsqrt.f32 %v607_v53  ;;  %vm616_vm4 = vmor %vm614_vm3, %vm615_vm2  ;;  %vm624_vm6 = vweird.f32 %v607_v53  ;;  %vm788_vm3 = vcmask 130048  }
 0x1cc   :  { %v610_v55 = vmul.f32 %v2993_v52, %v609_v54 }
 0x1ce   :  { %v611_v56 = vmul.f32 0.5, %v610_v55  ;;  %v2973_v55 = vld [vmem:[%s3950_s8] ss:$0 sm:$0xff] }
 0x1d0   :  { %v612_v57 = vsub.f32 1.5, %v611_v56 }
 0x1d1   :  { %v2995_v58 = vpop.eup %2994 }
 0x1d2   :  { %v613_v59 = vmul.f32 %v2993_v52, %v612_v57  ;;  %v619_v60 = vmul.f32 %v2995_v58, %v607_v53  ;;  %vm625_vm5 = vweird.f32 %v2995_v58 }
 0x1d3   :  { %vm626_vm7 = vmor %vm624_vm6, %vm625_vm5  ;;  %vm1168_vm6 = vcmask 195584  }
 0x1d4   :  { %v617_v62 = vsel %vm616_vm4, %v2993_v52, %v613_v59  ;;  %v620_v63 = vmul.f32 %v2995_v58, %v619_v60 }
 0x1d5   :  { %v628_v0 = vmul.f32 %v617_v62, %v594_v39 }
 0x1d6   :  { %v621_v2 = vmul.f32 0.5, %v620_v63 }
 0x1d7   :  { %v633_v3 = vmul.f32 %v2969_v61, %v628_v0 }
 0x1d8   :  { %v622_v4 = vsub.f32 1.5, %v621_v2 }
 0x1d9   :  { %v3455_v5 = vadd.f32 %v2970_v1, %v633_v3 }
 0x1da   :  { %v623_v6 = vmul.f32 %v2995_v58, %v622_v4 }
 0x1db   :  { %v656_v7 = vsel %vm578_vm0, %v3455_v5, 0.0 }
 0x1dc   :  { %v627_v8 = vsel %vm626_vm7, %v2995_v58, %v623_v6  ;;  %657 = vadd.xlane.f32.xlu2 %v656_v7 }
 0x1dd   :  { %v629_v9 = vmul.f32 %v627_v8, %v595_v44 }
 0x1df   :  { %v634_v10 = vmul.f32 %v2969_v61, %v629_v9 }
 0x1e1   :  { %v3459_v11 = vadd.f32 %v2970_v1, %v634_v10 }
 0x1e3   :  { %v659_v12 = vsel %vm578_vm0, %v3459_v11, 0.0 }
 0x1e4   :  { %660 = vadd.xlane.f32.xlu2 %v659_v12  ;;  %v640_v12 = vlaneseq }
 0x24f   :  { %v658_v13 = vpop.xlane.xlu2 %657 }
 0x250   :  { %v662_v14 = vmul.f32 %v658_v13, %v3441_v36  ;;  %v641_v13 = vshrl.u32 %v640_v12, 7 }
 0x252   :  { %v664_v15 = vsub.f32 %v3455_v5, %v662_v14  ;;  %v644_v14 = vand.u32 127, %v640_v12 }
 0x254   :  { %v666_v16 = vmul.f32 %v664_v15, %v664_v15 }
 0x256   :  { %v668_v17 = vsel %vm578_vm0, %v666_v16, 0.0  ;;  %v647_v16 = vshra.s32 %v644_v14, 3 }
 0x257   :  { %669 = vadd.xlane.f32.xlu0 %v668_v17  ;;  %v661_v18 = vpop.xlane.xlu2 %660  ;;  %v650_v17 = vand.u32 7, %v644_v14 }
 0x258   :  { %v663_v19 = vmul.f32 %v661_v18, %v3441_v36  ;;  %v642_v18 = vadd.s32 8, %v641_v13 }
 0x259   :  { %vm651_vm1 = vcmp.lt.s32.totalorder %v650_v17, 5 }
 0x25a   :  { %v665_v20 = vsub.f32 %v3459_v11, %v663_v19 }
 0x25c   :  { %v667_v21 = vmul.f32 %v665_v20, %v665_v20 }
 0x25e   :  { %v671_v22 = vsel %vm578_vm0, %v667_v21, 0.0 }
 0x25f   :  { %672 = vadd.xlane.f32.xlu1 %v671_v22 }
 0x2ca   :  { %v670_v24 = vpop.xlane.xlu0 %669 }
 0x2cb   :  { %v674_v26 = vmul.f32 %v670_v24, %v3441_v36 }
 0x2cd   :  { %v676_v27 = vadd.f32 1e-05, %v674_v26 }
 0x2cf   :  { %2996 = vrsqrt.f32 %v676_v27  ;;  %vm684_vm9 = vweird.f32 %v676_v27 }
 0x2d2   :  { %v673_v28 = vpop.xlane.xlu1 %672 }
 0x2d3   :  { %v675_v29 = vmul.f32 %v673_v28, %v3441_v36 }
 0x2d5   :  { %v2997_v30 = vpop.eup %2996  ;;  %v677_v31 = vadd.f32 1e-05, %v675_v29 }
 0x2d6   :  { %v679_v32 = vmul.f32 %v2997_v30, %v676_v27  ;;  %vm685_vm8 = vweird.f32 %v2997_v30 }
 0x2d7   :  { %2998 = vrsqrt.f32 %v677_v31  ;;  %vm686_vm10 = vmor %vm684_vm9, %vm685_vm8  ;;  %vm694_vm12 = vweird.f32 %v677_v31 }
 0x2d8   :  { %v680_v33 = vmul.f32 %v2997_v30, %v679_v32 }
 0x2da   :  { %v681_v34 = vmul.f32 0.5, %v680_v33 }
 0x2dc   :  { %v682_v35 = vsub.f32 1.5, %v681_v34 }
 0x2dd   :  { %v2999_v37 = vpop.eup %2998 }
 0x2de   :  { %v683_v38 = vmul.f32 %v2997_v30, %v682_v35  ;;  %v689_v39 = vmul.f32 %v2999_v37, %v677_v31  ;;  %vm695_vm11 = vweird.f32 %v2999_v37 }
 0x2df   :  { %vm696_vm13 = vmor %vm694_vm12, %vm695_vm11 }
 0x2e0   :  { %v690_v40 = vmul.f32 %v2999_v37, %v689_v39  ;;  %v687_v41 = vsel %vm686_vm10, %v2997_v30, %v683_v38 }
 0x2e1   :  { %v698_v44 = vmul.f32 %v687_v41, %v664_v15  ;;  %v645_v15 = vshra.s32 %v641_v13, 3 }
 0x2e2   :  { %v691_v42 = vmul.f32 0.5, %v690_v40 }
 0x2e3   :  { %v703_v49 = vmul.f32 %v2971_v45, %v698_v44  ;;  %vm648_vm15 = vcmp.eq.s32.totalorder %v645_v15, %v647_v16 }
 0x2e4   :  { %v692_v43 = vsub.f32 1.5, %v691_v42  ;;  %vm3537_vm2 = vmand %vm648_vm15, %vm651_vm1 }
 0x2e5   :  { %v708_v52 = vadd.f32 %v2972_v50, %v703_v49 }
 0x2e6   :  { %v693_v46 = vmul.f32 %v2999_v37, %v692_v43 }
 0x2e8   :  { %v697_v47 = vsel %vm696_vm13, %v2999_v37, %v693_v46 }
 0x2e9   :  { %v699_v48 = vmul.f32 %v697_v47, %v665_v20  ;;  %v646_v20 = vshra.s32 %v642_v18, 3 }
 0x2eb   :  { %v704_v51 = vmul.f32 %v2971_v45, %v699_v48  ;;  %vm649_vm4 = vcmp.eq.s32.totalorder %v646_v20, %v647_v16 }
 0x2ec   :  { %vm3544_vm5 = vmand %vm649_vm4, %vm651_vm1 }
 0x2ed   :  { %v709_v53 = vadd.f32 %v2972_v50, %v704_v51 }
 0x2ef   :  { %v710_v54 = vpack.c.bf16 %v709_v53, %v708_v52 }
 0x2f1   :  { %2589 = vmatmul.msk.bf16.vlgmr.msrb.gmra.mxu2 %vm578_vm0, %v710_v54 }
 0x374   :  { %v743_v56 = vpop.f32.mrf.mxu2 }
 0x375   :  { %v3487_v57 = vadd.f32 %v2973_v55, %v743_v56 }
 0x377   :  { %750 = vrot.lane.b32.xlu0 %v3487_v57, %s3127_s28 }
 0x37c   :  { %v745_v58 = vpop.f32.mrf.mxu2 }
 0x37d   :  { %v3491_v59 = vadd.f32 %v2973_v55, %v745_v58 }
 0x37f   :  { %852 = vrot.lane.b32.xlu1 %v3491_v59, %s3128_s29  ;;  %752 = vrot.lane.b32.xlu2 %v3491_v59, %s3127_s28  ;;  %v2899_v47 = vpack.i.bf16 %v3487_v57, %v3491_v59 }
 0x380   :  { %846 = vrot.lane.b32.xlu0 %v3487_v57, %s3979_s4 }
 0x387   :  { %950 = vrot.lane.b32.xlu1 %v3491_v59, %s3130_s30  ;;  %850 = vrot.lane.b32.xlu2 %v3487_v57, %s3128_s29 }
 0x388   :  { %1048 = vrot.lane.b32.xlu0 %v3491_v59, %s3981_s5 }
 0x38f   :  { %1046 = vrot.lane.b32.xlu1 %v3487_v57, %s3981_s5  ;;  %848 = vrot.lane.b32.xlu2 %v3491_v59, %s3979_s4 }
 0x390   :  { %944 = vrot.lane.b32.xlu0 %v3487_v57, %s3977_s22 }
 0x397   :  { %946 = vrot.lane.b32.xlu1 %v3491_v59, %s3977_s22  ;;  %948 = vrot.lane.b32.xlu2 %v3487_v57, %s3130_s30 }
 0x398   :  { %1044 = vrot.lane.b32.xlu0 %v3491_v59, %s3971_s23 }
 0x39f   :  { %1042 = vrot.lane.b32.xlu2 %v3487_v57, %s3971_s23 }
 0x3d9   :  { %v753_v60 = vpop.permute.xlu2 %752 }
 0x3da   :  { %2590 = vmatpush.xpose.msk.msrb.mxu3 %vm754_vm14, %v753_v60 }
 0x3e1   :  { %v851_v61 = vpop.permute.xlu2 %850 }
 0x3e9   :  { %v751_v62 = vpop.permute.xlu0 %750  ;;  %v849_v1 = vpop.permute.xlu2 %848 }
 0x3ea   :  { %2591 = vmatpush.xpose.msk.msrb.mxu3 %vm754_vm14, %v751_v62 }
 0x3ed   :  { %2592 = vmatmul.msk.f32.vlgmr.msrb.gmra.mxu3 %vm754_vm14, %v3487_v57 }
 0x3f1   :  { %v853_v63 = vpop.permute.xlu1 %852  ;;  %v949_v4 = vpop.permute.xlu2 %948 }
 0x3f2   :  { %v847_v0 = vpop.permute.xlu0 %846  ;;  %2596 = vmatpush.xpose.msk.msra.mxu3 %vm754_vm14, %v853_v63 }
 0x3f5   :  { %2593 = vmatmul.msk.f32.gmra.mxu3 %vm754_vm14, %v3491_v59 }
 0x3f6   :  { %2597 = vmatpush.xpose.msk.msra.mxu3 %vm754_vm14, %v851_v61 }
 0x3f9   :  { %v951_v2 = vpop.permute.xlu1 %950  ;;  %v1043_v9 = vpop.permute.xlu2 %1042 }
 0x3fa   :  { %v1049_v3 = vpop.permute.xlu0 %1048  ;;  %2602 = vmatpush.xpose.msk.msra.mxu1 %vm754_vm14, %v951_v2 }
 0x3fb   :  { %2608 = vmatpush.xpose.msk.msrb.mxu3 %vm754_vm14, %v1049_v3 }
 0x3fd   :  { %2598 = vmatmul.msk.f32.vlgmr.msra.gmra.mxu3 %vm754_vm14, %v847_v0 }
 0x3fe   :  { %2603 = vmatpush.xpose.msk.msra.mxu1 %vm754_vm14, %v949_v4 }
 0x401   :  { %v1047_v6 = vpop.permute.xlu1 %1046 }
 0x402   :  { %v945_v7 = vpop.permute.xlu0 %944  ;;  %2609 = vmatpush.xpose.msk.msrb.mxu3 %vm754_vm14, %v1047_v6 }
 0x403   :  { %2604 = vmatmul.msk.f32.vlgmr.msra.gmra.mxu1 %vm754_vm14, %v945_v7 }
 0x405   :  { %2599 = vmatmul.msk.f32.gmra.mxu3 %vm754_vm14, %v849_v1 }
 0x409   :  { %v947_v8 = vpop.permute.xlu1 %946 }
 0x40a   :  { %v1045_v10 = vpop.permute.xlu0 %1044 }
 0x40b   :  { %2605 = vmatmul.msk.f32.gmra.mxu1 %vm754_vm14, %v947_v8 }
 0x40d   :  { %2610 = vmatmul.msk.f32.vlgmr.msrb.gmra.mxu3 %vm754_vm14, %v1043_v9 }
 0x415   :  { %2611 = vmatmul.msk.f32.gmra.mxu3 %vm754_vm14, %v1045_v10 }
 0x470   :  { %v780_v21 = vpop.f32.mrf.mxu3 }
 0x471   :  { %v786_v22 = vsel %vm3537_vm2, %v780_v21, -1e+30 }
 0x472   :  { %v789_v23 = vsel %vm788_vm3, %v786_v22, -inf }
 0x473   :  { %790 = vmax.xlane.f32.xlu2 %v789_v23 }
 0x478   :  { %v783_v25 = vpop.f32.mrf.mxu3 }
 0x479   :  { %v787_v26 = vsel %vm3544_vm5, %v783_v25, -1e+30 }
 0x47a   :  { %v792_v27 = vsel %vm788_vm3, %v787_v26, -inf }
 0x47b   :  { %793 = vmax.xlane.f32.xlu1 %v792_v27 }
 0x480   :  { %v977_v28 = vpop.f32.mrf.mxu1  ;;  %v879_v29 = vpop.f32.mrf.mxu3 }
 0x481   :  { %v983_v30 = vsel %vm3537_vm2, %v977_v28, -1e+30  ;;  %v885_v31 = vsel %vm3537_vm2, %v879_v29, -1e+30 }
 0x482   :  { %v887_v32 = vsel %vm788_vm3, %v885_v31, -inf  ;;  %v985_v33 = vsel %vm788_vm3, %v983_v30, -inf }
 0x483   :  { %888 = vmax.xlane.f32.xlu0 %v887_v32  ;;  %986 = vmax.xlane.f32.xlu1 %v985_v33 }
 0x488   :  { %v882_v34 = vpop.f32.mrf.mxu3  ;;  %v980_v38 = vpop.f32.mrf.mxu1 }
 0x489   :  { %v886_v35 = vsel %vm3544_vm5, %v882_v34, -1e+30  ;;  %v984_v39 = vsel %vm3544_vm5, %v980_v38, -1e+30 }
 0x48a   :  { %v890_v37 = vsel %vm788_vm3, %v886_v35, -inf  ;;  %v988_v43 = vsel %vm788_vm3, %v984_v39, -inf }
 0x48b   :  { %891 = vmax.xlane.f32.xlu2 %v890_v37 }
 0x490   :  { %v1075_v40 = vpop.f32.mrf.mxu3 }
 0x491   :  { %v1081_v41 = vsel %vm3537_vm2, %v1075_v40, -1e+30 }
 0x492   :  { %v1083_v42 = vsel %vm788_vm3, %v1081_v41, -inf }
 0x493   :  { %1084 = vmax.xlane.f32.xlu0 %v1083_v42  ;;  %989 = vmax.xlane.f32.xlu2 %v988_v43 }
 0x498   :  { %v1078_v44 = vpop.f32.mrf.mxu3 }
 0x499   :  { %v3568_v45 = vsel %vm3544_vm5, %v1078_v44, -1e+30 }
 0x49a   :  { %v1086_v46 = vsel %vm788_vm3, %v3568_v45, -inf }
 0x49b   :  { %1087 = vmax.xlane.f32.xlu1 %v1086_v46 }
 0x4ab   :  { %2900 = vrot.lane.b32.xlu2 %v2899_v47, %s3134_s1 }
 0x4b3   :  { %2910 = vrot.lane.b32.xlu2 %v2899_v47, %s3968_s26  ;;  %s4006_s26 = smov 8  }
 0x4b4   :  { %2905 = vrot.lane.b32.xlu1 %v2899_v47, %s3970_s24  ;;  %s4008_s24 = smov 24  }
 0x4e6   :  { %v791_v48 = vpop.xlane.xlu2 %790 }
 0x4e7   :  { %v795_v49 = vsub.f32 %v786_v22, %v791_v48 }
 0x4e9   :  { %v797_v50 = vmul.f32 1.442695, %v795_v49 }
 0x4eb   :  { %3000 = vpow2.f32 %v797_v50 }
 0x4ee   :  { %v794_v51 = vpop.xlane.xlu1 %793 }
 0x4ef   :  { %v796_v52 = vsub.f32 %v787_v26, %v794_v51 }
 0x4f1   :  { %v3577_v53 = vpop.eup %3000  ;;  %v799_v54 = vmul.f32 1.442695, %v796_v52 }
 0x4f2   :  { %v801_v55 = vsel %vm788_vm3, %v3577_v53, 0.0 }
 0x4f3   :  { %3002 = vpow2.f32 %v799_v54  ;;  %802 = vadd.xlane.f32.xlu0 %v801_v55 }
 0x4f6   :  { %v889_v56 = vpop.xlane.xlu0 %888  ;;  %v987_v62 = vpop.xlane.xlu1 %986 }
 0x4f7   :  { %v893_v57 = vsub.f32 %v885_v31, %v889_v56  ;;  %v991_v2 = vsub.f32 %v983_v30, %v987_v62 }
 0x4f9   :  { %v3581_v58 = vpop.eup %3002  ;;  %v895_v59 = vmul.f32 1.442695, %v893_v57  ;;  %v993_v4 = vmul.f32 1.442695, %v991_v2 }
 0x4fa   :  { %v804_v60 = vsel %vm788_vm3, %v3581_v58, 0.0 }
 0x4fb   :  { %805 = vadd.xlane.f32.xlu1 %v804_v60  ;;  %3004 = vpow2.f32 %v895_v59 }
 0x4fe   :  { %v892_v61 = vpop.xlane.xlu2 %891 }
 0x4ff   :  { %v894_v63 = vsub.f32 %v886_v35, %v892_v61 }
 0x501   :  { %v897_v0 = vmul.f32 1.442695, %v894_v63  ;;  %v3585_v1 = vpop.eup %3004 }
 0x502   :  { %v899_v3 = vsel %vm788_vm3, %v3585_v1, 0.0 }
 0x503   :  { %3006 = vpow2.f32 %v897_v0  ;;  %900 = vadd.xlane.f32.xlu0 %v899_v3 }
 0x504   :  { %3008 = vpow2.f32 %v993_v4 }
 0x506   :  { %v990_v6 = vpop.xlane.xlu2 %989  ;;  %v1085_v8 = vpop.xlane.xlu0 %1084 }
 0x507   :  { %v992_v7 = vsub.f32 %v984_v39, %v990_v6  ;;  %v1089_v12 = vsub.f32 %v1081_v41, %v1085_v8 }
 0x509   :  { %v3589_v9 = vpop.eup %3006  ;;  %v995_v10 = vmul.f32 1.442695, %v992_v7  ;;  %v1091_v14 = vmul.f32 1.442695, %v1089_v12 }
 0x50a   :  { %v902_v13 = vsel %vm788_vm3, %v3589_v9, 0.0  ;;  %v3009_v18 = vpop.eup %3008 }
 0x50b   :  { %3010 = vpow2.f32 %v995_v10  ;;  %903 = vadd.xlane.f32.xlu0 %v902_v13  ;;  %v997_v25 = vsel %vm788_vm3, %v3009_v18, 0.0 }
 0x50c   :  { %3012 = vpow2.f32 %v1091_v14  ;;  %v2853_v14 = vld [vmem:[%s3951_s9 + $0x8] sm:$0xff] }
 0x50d   :  { %1201 = vmatpush.bf16.msrb.mxu1 %v2853_v14  ;;  %v2976_v14 = vld [vmem:[%s3954_s12] ss:$0 sm:$0xff] }
 0x50e   :  { %v2901_v15 = vpop.permute.xlu2 %2900  ;;  %v1088_v17 = vpop.xlane.xlu1 %1087 }
 0x50f   :  { %v2902_v16 = vunpack.i.l.bf16 %v2901_v15  ;;  %v2903_v21 = vunpack.i.h.bf16 %v2901_v15  ;;  %v1090_v22 = vsub.f32 %v3568_v45, %v1088_v17  ;;  %v2852_v15 = vld [vmem:[%s3951_s9] sm:$0xff] }
 0x511   :  { %v3593_v20 = vpop.eup %3010  ;;  %837 = vmatpush.msra.mxu2 %v2902_v16  ;;  %v1093_v26 = vmul.f32 1.442695, %v1090_v22  ;;  %1202 = vmatpush.bf16.msrb.mxu1 %v2852_v15 }
 0x512   :  { %v1000_v23 = vsel %vm788_vm3, %v3593_v20, 0.0  ;;  %v3013_v27 = vpop.eup %3012 }
 0x513   :  { %1001 = vadd.xlane.f32.xlu2 %v1000_v23  ;;  %838 = vmatpush.msra.mxu2 %v2903_v21  ;;  %3014 = vpow2.f32 %v1093_v26  ;;  %v1095_v28 = vsel %vm788_vm3, %v3013_v27, 0.0 }
 0x514   :  { %998 = vadd.xlane.f32.xlu0 %v997_v25  ;;  %2915 = vrot.lane.b32.xlu1 %v2899_v47, %s3969_s25 }
 0x516   :  { %v2911_v35 = vpop.permute.xlu2 %2910 }
 0x517   :  { %v2912_v40 = vunpack.i.l.bf16 %v2911_v35  ;;  %v2913_v41 = vunpack.i.h.bf16 %v2911_v35 }
 0x519   :  { %v3015_v29 = vpop.eup %3014 }
 0x51a   :  { %v1098_v30 = vsel %vm788_vm3, %v3015_v29, 0.0 }
 0x51c   :  { %1096 = vadd.xlane.f32.xlu0 %v1095_v28 }
 0x524   :  { %1099 = vadd.xlane.f32.xlu0 %v1098_v30 }
 0x526   :  { %v2906_v31 = vpop.permute.xlu1 %2905 }
 0x527   :  { %v2907_v32 = vunpack.i.l.bf16 %v2906_v31  ;;  %v2908_v33 = vunpack.i.h.bf16 %v2906_v31 }
 0x529   :  { %935 = vmatpush.msrb.mxu2 %v2907_v32 }
 0x52b   :  { %936 = vmatpush.msrb.mxu2 %v2908_v33 }
 0x566   :  { %v803_v34 = vpop.xlane.xlu0 %802 }
 0x567   :  { %3016 = vrcp.f32 %v803_v34  ;;  %v2974_v34 = vld [vmem:[%s3952_s10] ss:$0 sm:$0xff] }
 0x56d   :  { %v3017_v37 = vpop.eup %3016 }
 0x56e   :  { %v809_v38 = vmul.f32 %v3017_v37, %v3577_v53  ;;  %v806_v39 = vpop.xlane.xlu1 %805 }
 0x56f   :  { %3018 = vrcp.f32 %v806_v39 }
 0x570   :  { %2594 = vmatmul.msk.f32.vlgmr.msra.gmra.mxu2 %vm788_vm3, %v809_v38 }
 0x571   :  { %1033 = vmatpush.msra.mxu2 %v2912_v40 }
 0x573   :  { %1034 = vmatpush.msra.mxu2 %v2913_v41 }
 0x575   :  { %v3019_v42 = vpop.eup %3018 }
 0x576   :  { %v810_v43 = vmul.f32 %v3019_v42, %v3581_v58  ;;  %v901_v44 = vpop.xlane.xlu0 %900 }
 0x577   :  { %3020 = vrcp.f32 %v901_v44 }
 0x578   :  { %2595 = vmatmul.msk.f32.gmra.mxu2 %vm788_vm3, %v810_v43 }
 0x57d   :  { %v3021_v45 = vpop.eup %3020 }
 0x57e   :  { %v907_v46 = vmul.f32 %v3021_v45, %v3585_v1  ;;  %v904_v47 = vpop.xlane.xlu0 %903 }
 0x57f   :  { %3022 = vrcp.f32 %v904_v47 }
 0x580   :  { %2600 = vmatmul.msk.f32.vlgmr.msrb.gmra.mxu2 %vm788_vm3, %v907_v46 }
 0x585   :  { %v3023_v48 = vpop.eup %3022 }
 0x586   :  { %v2916_v49 = vpop.permute.xlu1 %2915  ;;  %v908_v52 = vmul.f32 %v3023_v48, %v3589_v9  ;;  %v1002_v54 = vpop.xlane.xlu2 %1001 }
 0x587   :  { %v2917_v50 = vunpack.i.l.bf16 %v2916_v49  ;;  %v999_v51 = vpop.xlane.xlu0 %998  ;;  %v2918_v53 = vunpack.i.h.bf16 %v2916_v49 }
 0x588   :  { %3024 = vrcp.f32 %v999_v51  ;;  %2601 = vmatmul.msk.f32.gmra.mxu2 %vm788_vm3, %v908_v52  ;;  %v2855_v52 = vld [vmem:[%s3955_s13 + $0x8] sm:$0xff] }
 0x589   :  { %1131 = vmatpush.msra.mxu0 %v2917_v50  ;;  %3026 = vrcp.f32 %v1002_v54  ;;  %1297 = vmatpush.bf16.msrb.mxu2 %v2855_v52 }
 0x58b   :  { %1132 = vmatpush.msra.mxu0 %v2918_v53 }
 0x58e   :  { %v3025_v55 = vpop.eup %3024 }
 0x58f   :  { %v1005_v56 = vmul.f32 %v3025_v55, %v3009_v18  ;;  %v1097_v57 = vpop.xlane.xlu0 %1096  ;;  %v3027_v58 = vpop.eup %3026  ;;  %v2854_v55 = vld [vmem:[%s3955_s13] sm:$0xff] }
 0x590   :  { %3028 = vrcp.f32 %v1097_v57  ;;  %v1006_v62 = vmul.f32 %v3027_v58, %v3593_v20  ;;  %1298 = vmatpush.bf16.msrb.mxu2 %v2854_v55 }
 0x591   :  { %2606 = vmatmul.msk.f32.vlgmr.msra.gmra.mxu2 %vm788_vm3, %v1005_v56 }
 0x596   :  { %v3029_v59 = vpop.eup %3028 }
 0x597   :  { %v1103_v60 = vmul.f32 %v3029_v59, %v3013_v27  ;;  %v1100_v61 = vpop.xlane.xlu0 %1099 }
 0x598   :  { %3030 = vrcp.f32 %v1100_v61 }
 0x599   :  { %2607 = vmatmul.msk.f32.gmra.mxu2 %vm788_vm3, %v1006_v62  ;;  %2612 = vmatmul.msk.f32.vlgmr.msra.gmra.mxu0 %vm788_vm3, %v1103_v60 }
 0x59e   :  { %v3031_v63 = vpop.eup %3030 }
 0x59f   :  { %v1104_v0 = vmul.f32 %v3031_v63, %v3015_v29 }
 0x5a1   :  { %2613 = vmatmul.msk.f32.gmra.mxu0 %vm788_vm3, %v1104_v0 }
 0x5f3   :  { %v840_v1 = vpop.f32.mrf.mxu2 }
 0x5fb   :  { %v843_v2 = vpop.f32.mrf.mxu2 }
 0x603   :  { %v938_v3 = vpop.f32.mrf.mxu2 }
 0x60b   :  { %v941_v4 = vpop.f32.mrf.mxu2 }
 0x60c   :  { %v2919_v6 = vpack.i.bf16 %v941_v4, %v938_v3 }
 0x60e   :  { %2920 = vrot.lane.b32.xlu1 %v2919_v6, %s3975_s27 }
 0x614   :  { %v1036_v7 = vpop.f32.mrf.mxu2 }
 0x616   :  { %v1134_v8 = vpop.f32.mrf.mxu0 }
 0x61c   :  { %v1039_v9 = vpop.f32.mrf.mxu2 }
 0x61d   :  { %v2924_v10 = vpack.i.bf16 %v1039_v9, %v1036_v7  ;;  %v2975_v9 = vld [vmem:[%s3953_s11] ss:$0 sm:$0xff] }
 0x61e   :  { %v1137_v12 = vpop.f32.mrf.mxu0 }
 0x61f   :  { %v2929_v13 = vpack.i.bf16 %v1137_v12, %v1134_v8  ;;  %2925 = vrot.lane.b32.xlu0 %v2924_v10, %s3974_s0 }
 0x621   :  { %2930 = vrot.lane.b32.xlu1 %v2929_v13, %s3973_s3  ;;  %s4007_s3 = smov 16  }
 0x680   :  { %v2921_v16 = vpop.permute.xlu1 %2920 }
 0x681   :  { %v2923_v17 = vunpack.i.h.bf16 %v2921_v16  ;;  %v2922_v18 = vunpack.i.l.bf16 %v2921_v16 }
 0x683   :  { %v1165_v23 = vsel %vm754_vm14, %v843_v2, %v2923_v17  ;;  %v1164_v25 = vsel %vm754_vm14, %v840_v1, %v2922_v18 }
 0x691   :  { %v2926_v20 = vpop.permute.xlu0 %2925 }
 0x692   :  { %v2928_v21 = vunpack.i.h.bf16 %v2926_v20  ;;  %v2927_v22 = vunpack.i.l.bf16 %v2926_v20 }
 0x693   :  { %v2931_v26 = vpop.permute.xlu1 %2930 }
 0x694   :  { %v1167_v27 = vsel %vm788_vm3, %v1165_v23, %v2928_v21  ;;  %v1166_v28 = vsel %vm788_vm3, %v1164_v25, %v2927_v22  ;;  %v2933_v29 = vunpack.i.h.bf16 %v2931_v26  ;;  %v2932_v30 = vunpack.i.l.bf16 %v2931_v26  ;;  %v2863_v22 = vld [vmem:[%s3957_s15 + $0x38] sm:$0xff]  ;;  %v2862_v23 = vld [vmem:[%s3957_s15 + $0x30] sm:$0xff]  ;;  %v2861_v25 = vld [vmem:[%s3957_s15 + $0x28] sm:$0xff] }
 0x695   :  { %1416 = vmatpush.bf16.msra.mxu3 %v2863_v22  ;;  %v2860_v26 = vld [vmem:[%s3957_s15 + $0x20] sm:$0xff] }
 0x696   :  { %v1169_v31 = vsel %vm1168_vm6, %v1166_v28, %v2932_v30  ;;  %v1170_v32 = vsel %vm1168_vm6, %v1167_v27, %v2933_v29  ;;  %v2859_v27 = vld [vmem:[%s3957_s15 + $0x18] sm:$0xff]  ;;  %v2977_v28 = vld [vmem:[%s3956_s14] ss:$0 sm:$0xff]  ;;  %v2858_v30 = vld [vmem:[%s3957_s15 + $0x10] sm:$0xff] }
 0x697   :  { %v1171_v33 = vpack.c.bf16 %v1170_v32, %v1169_v31 }
 0x699   :  { %2622 = vmatmul.msk.bf16.vlgmr.msrb.gmra.mxu1 %vm578_vm0, %v1171_v33  ;;  %1417 = vmatpush.bf16.msra.mxu3 %v2862_v23  ;;  %v2857_v33 = vld [vmem:[%s3957_s15 + $0x8] sm:$0xff] }
 0x69d   :  { %1418 = vmatpush.bf16.msra.mxu3 %v2861_v25  ;;  %v2865_v25 = vld [vmem:[%s3949_s7 + $0x18] sm:$0xff] }
 0x69e   :  { %1522 = vmatpush.bf16.msrb.mxu0 %v2865_v25 }
 0x6a1   :  { %1419 = vmatpush.bf16.msra.mxu3 %v2860_v26 }
 0x6a5   :  { %1420 = vmatpush.bf16.msra.mxu3 %v2859_v27 }
 0x6a9   :  { %1421 = vmatpush.bf16.msra.mxu3 %v2858_v30 }
 0x6ad   :  { %1422 = vmatpush.bf16.msra.mxu3 %v2857_v33 }
 0x716   :  { %v1204_v35 = vpop.f32.mrf.mxu1 }
 0x717   :  { %v1205_v37 = vadd.f32 %v2974_v34, %v1204_v35 }
 0x719   :  { %v3635_v38 = vadd.f32 %v1205_v37, %v3455_v5  ;;  %v2856_v37 = vld [vmem:[%s3957_s15] sm:$0xff] }
 0x71a   :  { %1423 = vmatpush.bf16.msra.mxu3 %v2856_v37 }
 0x71b   :  { %v1213_v39 = vsel %vm578_vm0, %v3635_v38, 0.0 }
 0x71c   :  { %1214 = vadd.xlane.f32.xlu1 %v1213_v39 }
 0x71e   :  { %v1206_v40 = vpop.f32.mrf.mxu1 }
 0x71f   :  { %v1207_v41 = vadd.f32 %v2974_v34, %v1206_v40 }
 0x721   :  { %v3640_v42 = vadd.f32 %v1207_v41, %v3459_v11 }
 0x723   :  { %v1216_v43 = vsel %vm578_vm0, %v3640_v42, 0.0 }
 0x724   :  { %1217 = vadd.xlane.f32.xlu0 %v1216_v43 }
 0x78f   :  { %v1215_v44 = vpop.xlane.xlu1 %1214 }
 0x790   :  { %v1219_v45 = vmul.f32 %v1215_v44, %v3441_v36 }
 0x792   :  { %v1221_v46 = vsub.f32 %v3635_v38, %v1219_v45 }
 0x794   :  { %v1223_v5 = vmul.f32 %v1221_v46, %v1221_v46 }
 0x796   :  { %v1225_v47 = vsel %vm578_vm0, %v1223_v5, 0.0 }
 0x797   :  { %v1218_v48 = vpop.xlane.xlu0 %1217  ;;  %1226 = vadd.xlane.f32.xlu2 %v1225_v47 }
 0x798   :  { %v1220_v49 = vmul.f32 %v1218_v48, %v3441_v36 }
 0x79a   :  { %v1222_v50 = vsub.f32 %v3640_v42, %v1220_v49 }
 0x79c   :  { %v1224_v11 = vmul.f32 %v1222_v50, %v1222_v50 }
 0x79e   :  { %v1228_v51 = vsel %vm578_vm0, %v1224_v11, 0.0 }
 0x79f   :  { %1229 = vadd.xlane.f32.xlu2 %v1228_v51 }
 0x80a   :  { %v1227_v53 = vpop.xlane.xlu2 %1226 }
 0x80b   :  { %v1231_v54 = vmul.f32 %v1227_v53, %v3441_v36 }
 0x80d   :  { %v1233_v56 = vadd.f32 1e-05, %v1231_v54 }
 0x80f   :  { %3032 = vrsqrt.f32 %v1233_v56  ;;  %vm1241_vm8 = vweird.f32 %v1233_v56 }
 0x812   :  { %v1230_v57 = vpop.xlane.xlu2 %1229 }
 0x813   :  { %v1232_v58 = vmul.f32 %v1230_v57, %v3441_v36 }
 0x815   :  { %v3033_v59 = vpop.eup %3032  ;;  %v1234_v60 = vadd.f32 1e-05, %v1232_v58 }
 0x816   :  { %v1236_v61 = vmul.f32 %v3033_v59, %v1233_v56  ;;  %vm1242_vm7 = vweird.f32 %v3033_v59 }
 0x817   :  { %3034 = vrsqrt.f32 %v1234_v60  ;;  %vm1243_vm9 = vmor %vm1241_vm8, %vm1242_vm7  ;;  %vm1251_vm11 = vweird.f32 %v1234_v60 }
 0x818   :  { %v1237_v62 = vmul.f32 %v3033_v59, %v1236_v61 }
 0x81a   :  { %v1238_v63 = vmul.f32 0.5, %v1237_v62 }
 0x81c   :  { %v1239_v0 = vsub.f32 1.5, %v1238_v63 }
 0x81d   :  { %v3035_v1 = vpop.eup %3034 }
 0x81e   :  { %v1240_v2 = vmul.f32 %v3033_v59, %v1239_v0  ;;  %v1246_v3 = vmul.f32 %v3035_v1, %v1234_v60  ;;  %vm1252_vm10 = vweird.f32 %v3035_v1 }
 0x81f   :  { %vm1253_vm12 = vmor %vm1251_vm11, %vm1252_vm10 }
 0x820   :  { %v1247_v4 = vmul.f32 %v3035_v1, %v1246_v3  ;;  %v1244_v6 = vsel %vm1243_vm9, %v3033_v59, %v1240_v2 }
 0x821   :  { %v1255_v10 = vmul.f32 %v1244_v6, %v1221_v46 }
 0x822   :  { %v1248_v7 = vmul.f32 0.5, %v1247_v4  ;;  %v2978_v4 = vld [vmem:[%s3958_s16] ss:$0 sm:$0xff] }
 0x823   :  { %v1260_v15 = vmul.f32 %v2975_v9, %v1255_v10 }
 0x824   :  { %v1249_v8 = vsub.f32 1.5, %v1248_v7 }
 0x825   :  { %v1265_v18 = vadd.f32 %v2976_v14, %v1260_v15 }
 0x826   :  { %v1250_v12 = vmul.f32 %v3035_v1, %v1249_v8 }
 0x828   :  { %v1254_v13 = vsel %vm1253_vm12, %v3035_v1, %v1250_v12 }
 0x829   :  { %v1256_v16 = vmul.f32 %v1254_v13, %v1222_v50 }
 0x82b   :  { %v1261_v17 = vmul.f32 %v2975_v9, %v1256_v16 }
 0x82d   :  { %v1266_v20 = vadd.f32 %v2976_v14, %v1261_v17 }
 0x82f   :  { %v1267_v21 = vpack.c.bf16 %v1266_v20, %v1265_v18 }
 0x831   :  { %2631 = vmatmul.msk.bf16.vlgmr.msrb.gmra.mxu2 %vm578_vm0, %v1267_v21 }
 0x8b4   :  { %v1300_v29 = vpop.f32.mrf.mxu2 }
 0x8b5   :  { %v1301_v31 = vadd.f32 %v2977_v28, %v1300_v29 }
 0x8b7   :  { %v2632_v32 = vmul.f32 -1.702, %v1301_v31 }
 0x8b9   :  { %v1309_v34 = vmul.f32 1.442695, %v2632_v32 }
 0x8bb   :  { %3036 = vpow2.f32 %v1309_v34 }
 0x8bc   :  { %v1302_v35 = vpop.f32.mrf.mxu2 }
 0x8bd   :  { %v1303_v39 = vadd.f32 %v2977_v28, %v1302_v35  ;;  %v2864_v28 = vld [vmem:[%s3949_s7 + $0x10] sm:$0xff] }
 0x8be   :  { %1523 = vmatpush.bf16.msrb.mxu0 %v2864_v28 }
 0x8bf   :  { %v2633_v40 = vmul.f32 -1.702, %v1303_v39 }
 0x8c1   :  { %v3037_v41 = vpop.eup %3036  ;;  %v1311_v43 = vmul.f32 1.442695, %v2633_v40 }
 0x8c2   :  { %v1313_v44 = vadd.f32 1.0, %v3037_v41 }
 0x8c3   :  { %3038 = vpow2.f32 %v1311_v43 }
 0x8c4   :  { %3040 = vrcp.f32 %v1313_v44  ;;  %v1326_v52 = vand.u32 2147483648, %v1313_v44  ;;  %vm1320_vm15 = vweird.f32 %v1313_v44  ;;  %v1324_v53 = vand.u32 2147483647, %v1313_v44 }
 0x8c6   :  { %v1327_v59 = vor.u32 1.1754944e-38, %v1326_v52  ;;  %vm1325_vm7 = vcmp.eq.f32.partialorder %v1324_v53, 8.507059e+37 }
 0x8c9   :  { %v3039_v45 = vpop.eup %3038 }
 0x8ca   :  { %v3041_v46 = vpop.eup %3040  ;;  %v1314_v5 = vadd.f32 1.0, %v3039_v45 }
 0x8cb   :  { %v1316_v47 = vmul.f32 %v3041_v46, %v1313_v44  ;;  %vm1321_vm13 = vweird.f32 %v3041_v46 }
 0x8cc   :  { %3042 = vrcp.f32 %v1314_v5  ;;  %vm1322_vm1 = vmor %vm1320_vm15, %vm1321_vm13  ;;  %v1341_v55 = vand.u32 2147483648, %v1314_v5  ;;  %v1339_v58 = vand.u32 2147483647, %v1314_v5  ;;  %vm1335_vm8 = vweird.f32 %v1314_v5 }
 0x8cd   :  { %v1317_v48 = vsub.f32 1.0, %v1316_v47  ;;  %v2979_v47 = vld [vmem:[%s3994_s2 + $0x1] ss:$0 sm:$0xff]  ;;  %s4001_s2 = smov 112  }
 0x8ce   :  { %v1342_v62 = vor.u32 1.1754944e-38, %v1341_v55  ;;  %vm1340_vm10 = vcmp.eq.f32.partialorder %v1339_v58, 8.507059e+37 }
 0x8cf   :  { %v1318_v49 = vmul.f32 %v3041_v46, %v1317_v48 }
 0x8d1   :  { %v1319_v11 = vadd.f32 %v3041_v46, %v1318_v49 }
 0x8d2   :  { %v3043_v50 = vpop.eup %3042 }
 0x8d3   :  { %v1331_v51 = vmul.f32 %v3043_v50, %v1314_v5  ;;  %v1323_v56 = vsel %vm1322_vm1, %v3041_v46, %v1319_v11  ;;  %vm1336_vm4 = vweird.f32 %v3043_v50  ;;  %v2980_v11 = vld [vmem:[%s3948_s6 + $0x1] ss:$0 sm:$0xff]  ;;  %s3999_s6 = smov 72  }
 0x8d4   :  { %v1328_v61 = vsel %vm1325_vm7, %v1327_v59, %v1323_v56  ;;  %vm1337_vm9 = vmor %vm1335_vm8, %vm1336_vm4 }
 0x8d5   :  { %v1332_v54 = vsub.f32 1.0, %v1331_v51  ;;  %v1345_v1 = vmul.f32 %v1328_v61, %v1301_v31 }
 0x8d7   :  { %v1333_v57 = vmul.f32 %v3043_v50, %v1332_v54 }
 0x8d9   :  { %v1334_v60 = vadd.f32 %v3043_v50, %v1333_v57  ;;  %v2981_v57 = vld [vmem:[%s3950_s8 + $0x1] ss:$0 sm:$0xff]  ;;  %s4000_s8 = smov 120  }
 0x8db   :  { %v1338_v63 = vsel %vm1337_vm9, %v3043_v50, %v1334_v60 }
 0x8dc   :  { %v1343_v0 = vsel %vm1340_vm10, %v1342_v62, %v1338_v63 }
 0x8dd   :  { %v1346_v2 = vmul.f32 %v1343_v0, %v1303_v39 }
 0x8df   :  { %v1347_v3 = vpack.c.bf16 %v1346_v2, %v1345_v1 }
 0x8e1   :  { %1424 = vmatmul.bf16.vlgmr.msra.gmra.mxu3 %v1347_v3 }
 0x964   :  { %v1425_v6 = vpop.f32.mrf.mxu3 }
 0x965   :  { %v1426_v7 = vadd.f32 %v2978_v4, %v1425_v6 }
 0x967   :  { %v3696_v8 = vadd.f32 %v1426_v7, %v3635_v38 }
 0x969   :  { %v1436_v9 = vsel %vm578_vm0, %v3696_v8, 0.0 }
 0x96a   :  { %1437 = vadd.xlane.f32.xlu2 %v1436_v9 }
 0x96c   :  { %v1427_v10 = vpop.f32.mrf.mxu3 }
 0x96d   :  { %v1428_v12 = vadd.f32 %v2978_v4, %v1427_v10 }
 0x96f   :  { %v3701_v13 = vadd.f32 %v1428_v12, %v3640_v42 }
 0x971   :  { %v1439_v14 = vsel %vm578_vm0, %v3701_v13, 0.0 }
 0x972   :  { %1440 = vadd.xlane.f32.xlu2 %v1439_v14 }
 0x9dd   :  { %v1438_v15 = vpop.xlane.xlu2 %1437 }
 0x9de   :  { %v1442_v16 = vmul.f32 %v1438_v15, %v3441_v36 }
 0x9e0   :  { %v1444_v17 = vsub.f32 %v3696_v8, %v1442_v16 }
 0x9e2   :  { %v1446_v38 = vmul.f32 %v1444_v17, %v1444_v17 }
 0x9e4   :  { %v1448_v18 = vsel %vm578_vm0, %v1446_v38, 0.0 }
 0x9e5   :  { %1449 = vadd.xlane.f32.xlu1 %v1448_v18  ;;  %v1441_v20 = vpop.xlane.xlu2 %1440 }
 0x9e6   :  { %v1443_v21 = vmul.f32 %v1441_v20, %v3441_v36 }
 0x9e8   :  { %v1445_v22 = vsub.f32 %v3701_v13, %v1443_v21 }
 0x9ea   :  { %v1447_v42 = vmul.f32 %v1445_v22, %v1445_v22 }
 0x9ec   :  { %v1451_v23 = vsel %vm578_vm0, %v1447_v42, 0.0 }
 0x9ed   :  { %1452 = vadd.xlane.f32.xlu2 %v1451_v23 }
 0xa58   :  { %v1450_v26 = vpop.xlane.xlu1 %1449 }
 0xa59   :  { %v1454_v27 = vmul.f32 %v1450_v26, %v3441_v36 }
 0xa5b   :  { %v1456_v29 = vadd.f32 1e-05, %v1454_v27 }
 0xa5d   :  { %3044 = vrsqrt.f32 %v1456_v29  ;;  %vm1464_vm12 = vweird.f32 %v1456_v29 }
 0xa60   :  { %v1453_v30 = vpop.xlane.xlu2 %1452 }
 0xa61   :  { %v1455_v31 = vmul.f32 %v1453_v30, %v3441_v36 }
 0xa63   :  { %v3045_v32 = vpop.eup %3044  ;;  %v1457_v33 = vadd.f32 1e-05, %v1455_v31 }
 0xa64   :  { %v1459_v34 = vmul.f32 %v3045_v32, %v1456_v29  ;;  %vm1465_vm11 = vweird.f32 %v3045_v32 }
 0xa65   :  { %3046 = vrsqrt.f32 %v1457_v33  ;;  %vm1466_vm13 = vmor %vm1464_vm12, %vm1465_vm11  ;;  %vm1474_vm1 = vweird.f32 %v1457_v33 }
 0xa66   :  { %v1460_v35 = vmul.f32 %v3045_v32, %v1459_v34 }
 0xa68   :  { %v1461_v37 = vmul.f32 0.5, %v1460_v35 }
 0xa6a   :  { %v1462_v39 = vsub.f32 1.5, %v1461_v37 }
 0xa6b   :  { %v3047_v40 = vpop.eup %3046 }
 0xa6c   :  { %v1463_v41 = vmul.f32 %v3045_v32, %v1462_v39  ;;  %v1469_v43 = vmul.f32 %v3047_v40, %v1457_v33  ;;  %vm1475_vm15 = vweird.f32 %v3047_v40 }
 0xa6d   :  { %vm1476_vm4 = vmor %vm1474_vm1, %vm1475_vm15 }
 0xa6e   :  { %v1470_v44 = vmul.f32 %v3047_v40, %v1469_v43  ;;  %v1467_v45 = vsel %vm1466_vm13, %v3045_v32, %v1463_v41 }
 0xa6f   :  { %v1478_v48 = vmul.f32 %v1467_v45, %v1444_v17 }
 0xa70   :  { %v1471_v46 = vmul.f32 0.5, %v1470_v44 }
 0xa71   :  { %v1483_v51 = vmul.f32 %v2979_v47, %v1478_v48 }
 0xa72   :  { %v1472_v5 = vsub.f32 1.5, %v1471_v46 }
 0xa73   :  { %v1488_v54 = vadd.f32 %v2980_v11, %v1483_v51 }
 0xa74   :  { %v1473_v49 = vmul.f32 %v3047_v40, %v1472_v5 }
 0xa76   :  { %v1477_v50 = vsel %vm1476_vm4, %v3047_v40, %v1473_v49 }
 0xa77   :  { %v1479_v52 = vmul.f32 %v1477_v50, %v1445_v22 }
 0xa79   :  { %v1484_v53 = vmul.f32 %v2979_v47, %v1479_v52 }
 0xa7b   :  { %v1489_v55 = vadd.f32 %v2980_v11, %v1484_v53 }
 0xa7d   :  { %v1490_v56 = vpack.c.bf16 %v1489_v55, %v1488_v54 }
 0xa7f   :  { %2681 = vmatmul.msk.bf16.vlgmr.msrb.gmra.mxu0 %vm578_vm0, %v1490_v56 }
 0xafc   :  { %v1525_v58 = vpop.f32.mrf.mxu0 }
 0xafd   :  { %v3729_v59 = vadd.f32 %v2981_v57, %v1525_v58 }
 0xaff   :  { %1532 = vrot.lane.b32.xlu1 %v3729_v59, %s3127_s28 }
 0xb04   :  { %v1527_v60 = vpop.f32.mrf.mxu0 }
 0xb05   :  { %v1528_v61 = vadd.f32 %v2981_v57, %v1527_v60 }
 0xb07   :  { %1534 = vrot.lane.b32.xlu0 %v1528_v61, %s3127_s28  ;;  %1728 = vrot.lane.b32.xlu1 %v3729_v59, %s3130_s30  ;;  %v3737_v62 = vpack.i.bf16 %v3729_v59, %v1528_v61  ;;  %s4002_s28 = smov 104  }
 0xb09   :  { %2935 = vrot.lane.b32.xlu2 %v3737_v62, %s3134_s1  ;;  %s4005_s1 = smov 48  }
 0xb0f   :  { %1630 = vrot.lane.b32.xlu0 %v3729_v59, %s3128_s29 }
 0xb17   :  { %1828 = vrot.lane.b32.xlu0 %v1528_v61, %s3999_s6 }
 0xb63   :  { %v2936_v63 = vpop.permute.xlu2 %2935 }
 0xb64   :  { %v2937_v0 = vunpack.i.l.bf16 %v2936_v63  ;;  %v2938_v1 = vunpack.i.h.bf16 %v2936_v63 }
 0xb66   :  { %1617 = vmatpush.msra.mxu2 %v2937_v0 }
 0xb68   :  { %1618 = vmatpush.msra.mxu2 %v2938_v1 }
 0xb71   :  { %v1533_v3 = vpop.permute.xlu1 %1532 }
 0xb79   :  { %v1535_v2 = vpop.permute.xlu0 %1534  ;;  %v1729_v28 = vpop.permute.xlu1 %1728 }
 0xb7a   :  { %2682 = vmatpush.xpose.msk.msra.mxu1 %vm754_vm14, %v1535_v2 }
 0xb7e   :  { %2683 = vmatpush.xpose.msk.msra.mxu1 %vm754_vm14, %v1533_v3 }
 0xb81   :  { %2684 = vmatmul.msk.f32.vlgmr.msra.gmra.mxu1 %vm754_vm14, %v3729_v59  ;;  %v1631_v20 = vpop.permute.xlu0 %1630 }
 0xb89   :  { %2685 = vmatmul.msk.f32.gmra.mxu1 %vm754_vm14, %v1528_v61  ;;  %v1829_v26 = vpop.permute.xlu0 %1828 }
 0xbfe   :  { %v1561_v4 = vpop.f32.mrf.mxu1 }
 0xbff   :  { %v1567_v6 = vsel %vm3537_vm2, %v1561_v4, -1e+30 }
 0xc00   :  { %v1569_v7 = vsel %vm788_vm3, %v1567_v6, -inf }
 0xc01   :  { %1570 = vmax.xlane.f32.xlu2 %v1569_v7 }
 0xc06   :  { %v1564_v9 = vpop.f32.mrf.mxu1 }
 0xc07   :  { %v1568_v10 = vsel %vm3544_vm5, %v1564_v9, -1e+30 }
 0xc08   :  { %v1572_v12 = vsel %vm788_vm3, %v1568_v10, -inf }
 0xc09   :  { %1573 = vmax.xlane.f32.xlu2 %v1572_v12 }
 0xc21   :  { %1632 = vrot.lane.b32.xlu2 %v1528_v61, %s3128_s29  ;;  %s4003_s29 = smov 56  }
 0xc29   :  { %1730 = vrot.lane.b32.xlu2 %v1528_v61, %s3130_s30  ;;  %s4004_s30 = smov 40  }
 0xc31   :  { %1626 = vrot.lane.b32.xlu2 %v3729_v59, %s4000_s8 }
 0xc39   :  { %1628 = vrot.lane.b32.xlu2 %v1528_v61, %s4000_s8 }
 0xc41   :  { %1724 = vrot.lane.b32.xlu2 %v3729_v59, %s4001_s2 }
 0xc49   :  { %1726 = vrot.lane.b32.xlu2 %v1528_v61, %s4001_s2 }
 0xc51   :  { %1824 = vrot.lane.b32.xlu2 %v1528_v61, %s4002_s28 }
 0xc74   :  { %v1571_v14 = vpop.xlane.xlu2 %1570 }
 0xc75   :  { %v1575_v15 = vsub.f32 %v1567_v6, %v1571_v14 }
 0xc77   :  { %v1577_v16 = vmul.f32 1.442695, %v1575_v15 }
 0xc79   :  { %3048 = vpow2.f32 %v1577_v16 }
 0xc7c   :  { %v1574_v17 = vpop.xlane.xlu2 %1573 }
 0xc7d   :  { %v1576_v38 = vsub.f32 %v1568_v10, %v1574_v17 }
 0xc7f   :  { %v3049_v18 = vpop.eup %3048  ;;  %v1579_v21 = vmul.f32 1.442695, %v1576_v38 }
 0xc80   :  { %v1581_v22 = vsel %vm788_vm3, %v3049_v18, 0.0 }
 0xc81   :  { %3050 = vpow2.f32 %v1579_v21  ;;  %1582 = vadd.xlane.f32.xlu0 %v1581_v22 }
 0xc84   :  { %v1633_v42 = vpop.permute.xlu2 %1632 }
 0xc85   :  { %2688 = vmatpush.xpose.msk.msra.mxu0 %vm754_vm14, %v1633_v42  ;;  %2880 = vmatpush.xpose.msk.msrb.mxu3 %vm754_vm14, %v1633_v42 }
 0xc87   :  { %v3051_v23 = vpop.eup %3050 }
 0xc88   :  { %v1584_v25 = vsel %vm788_vm3, %v3051_v23, 0.0 }
 0xc89   :  { %1585 = vadd.xlane.f32.xlu1 %v1584_v25  ;;  %2689 = vmatpush.xpose.msk.msra.mxu0 %vm754_vm14, %v1631_v20 }
 0xc8a   :  { %2881 = vmatpush.xpose.msk.msrb.mxu3 %vm754_vm14, %v1631_v20 }
 0xc8c   :  { %v1731_v27 = vpop.permute.xlu2 %1730 }
 0xc8d   :  { %2700 = vmatpush.xpose.msk.msrb.mxu0 %vm754_vm14, %v1829_v26  ;;  %2694 = vmatpush.xpose.msk.msrb.mxu2 %vm754_vm14, %v1731_v27 }
 0xc91   :  { %2695 = vmatpush.xpose.msk.msrb.mxu2 %vm754_vm14, %v1729_v28 }
 0xc94   :  { %v1627_v29 = vpop.permute.xlu2 %1626 }
 0xc95   :  { %1826 = vrot.lane.b32.xlu0 %v3729_v59, %s3999_s6  ;;  %2690 = vmatmul.msk.f32.vlgmr.msra.gmra.mxu0 %vm754_vm14, %v1627_v29 }
 0xc9c   :  { %v1629_v30 = vpop.permute.xlu2 %1628 }
 0xc9d   :  { %2691 = vmatmul.msk.f32.vlgmr.msrb.gmra.mxu3 %vm754_vm14, %v1629_v30 }
 0xca2   :  { %1822 = vrot.lane.b32.xlu1 %v3729_v59, %s4002_s28 }
 0xca4   :  { %v1725_v40 = vpop.permute.xlu2 %1724 }
 0xcac   :  { %v1727_v41 = vpop.permute.xlu2 %1726 }
 0xcb4   :  { %v1825_v5 = vpop.permute.xlu2 %1824 }
 0xcf4   :  { %v1583_v31 = vpop.xlane.xlu0 %1582 }
 0xcf5   :  { %3052 = vrcp.f32 %v1583_v31 }
 0xcfb   :  { %v3053_v32 = vpop.eup %3052 }
 0xcfc   :  { %v1589_v33 = vmul.f32 %v3053_v32, %v3049_v18  ;;  %v1586_v34 = vpop.xlane.xlu1 %1585 }
 0xcfd   :  { %3054 = vrcp.f32 %v1586_v34 }
 0xcfe   :  { %2686 = vmatmul.msk.f32.vlgmr.msra.gmra.mxu2 %vm788_vm3, %v1589_v33 }
 0xd03   :  { %v3055_v35 = vpop.eup %3054 }
 0xd04   :  { %v1590_v37 = vmul.f32 %v3055_v35, %v3051_v23 }
 0xd06   :  { %2687 = vmatmul.msk.f32.gmra.mxu2 %vm788_vm3, %v1590_v37 }
 0xd07   :  { %v1827_v39 = vpop.permute.xlu0 %1826 }
 0xd08   :  { %2701 = vmatpush.xpose.msk.msrb.mxu0 %vm754_vm14, %v1827_v39 }
 0xd0e   :  { %2696 = vmatmul.msk.f32.vlgmr.msrb.gmra.mxu2 %vm754_vm14, %v1725_v40 }
 0xd12   :  { %v1659_v43 = vpop.f32.mrf.mxu0 }
 0xd13   :  { %v1665_v44 = vsel %vm3537_vm2, %v1659_v43, -1e+30 }
 0xd14   :  { %v1823_v45 = vpop.permute.xlu1 %1822  ;;  %v1667_v46 = vsel %vm788_vm3, %v1665_v44, -inf }
 0xd15   :  { %1668 = vmax.xlane.f32.xlu0 %v1667_v46  ;;  %2702 = vmatmul.msk.f32.vlgmr.msrb.gmra.mxu0 %vm754_vm14, %v1823_v45 }
 0xd16   :  { %2697 = vmatmul.msk.f32.gmra.mxu2 %vm754_vm14, %v1727_v41 }
 0xd1d   :  { %2703 = vmatmul.msk.f32.gmra.mxu0 %vm754_vm14, %v1825_v5 }
 0xd20   :  { %v1662_v47 = vpop.f32.mrf.mxu3 }
 0xd21   :  { %v1666_v48 = vsel %vm3544_vm5, %v1662_v47, -1e+30 }
 0xd22   :  { %v1670_v49 = vsel %vm788_vm3, %v1666_v48, -inf }
 0xd23   :  { %1671 = vmax.xlane.f32.xlu1 %v1670_v49 }
 0xd81   :  { %v3792_v50 = vpop.f32.mrf.mxu2 }
 0xd88   :  { %v1669_v11 = vpop.xlane.xlu0 %1668 }
 0xd89   :  { %v3794_v51 = vpop.f32.mrf.mxu2  ;;  %v1673_v52 = vsub.f32 %v1665_v44, %v1669_v11 }
 0xd8b   :  { %v1675_v53 = vmul.f32 1.442695, %v1673_v52 }
 0xd8d   :  { %3056 = vpow2.f32 %v1675_v53 }
 0xd91   :  { %v1757_v54 = vpop.f32.mrf.mxu2 }
 0xd92   :  { %v1763_v55 = vsel %vm3537_vm2, %v1757_v54, -1e+30  ;;  %v1855_v56 = vpop.f32.mrf.mxu0 }
 0xd93   :  { %v1861_v57 = vsel %vm3537_vm2, %v1855_v56, -1e+30  ;;  %v1765_v58 = vsel %vm788_vm3, %v1763_v55, -inf  ;;  %v3057_v63 = vpop.eup %3056 }
 0xd94   :  { %1766 = vmax.xlane.f32.xlu2 %v1765_v58  ;;  %v1863_v59 = vsel %vm788_vm3, %v1861_v57, -inf  ;;  %v1679_v6 = vsel %vm788_vm3, %v3057_v63, 0.0 }
 0xd95   :  { %1864 = vmax.xlane.f32.xlu0 %v1863_v59 }
 0xd96   :  { %v1672_v60 = vpop.xlane.xlu1 %1671 }
 0xd97   :  { %v1674_v61 = vsub.f32 %v1666_v48, %v1672_v60 }
 0xd99   :  { %v1677_v0 = vmul.f32 1.442695, %v1674_v61  ;;  %v1760_v1 = vpop.f32.mrf.mxu2 }
 0xd9a   :  { %v1764_v2 = vsel %vm3544_vm5, %v1760_v1, -1e+30  ;;  %v1858_v3 = vpop.f32.mrf.mxu0 }
 0xd9b   :  { %3058 = vpow2.f32 %v1677_v0  ;;  %v1862_v19 = vsel %vm3544_vm5, %v1858_v3, -1e+30  ;;  %v1768_v4 = vsel %vm788_vm3, %v1764_v2, -inf }
 0xd9c   :  { %1769 = vmax.xlane.f32.xlu2 %v1768_v4  ;;  %v1866_v7 = vsel %vm788_vm3, %v1862_v19, -inf }
 0xd9d   :  { %1680 = vadd.xlane.f32.xlu0 %v1679_v6  ;;  %1867 = vmax.xlane.f32.xlu1 %v1866_v7  ;;  %v2867_v7 = vld [vmem:[%s3951_s9 + $0x18] sm:$0xff] }
 0xd9e   :  { %1982 = vmatpush.bf16.msra.mxu2 %v2867_v7 }
 0xda1   :  { %v3059_v9 = vpop.eup %3058 }
 0xda2   :  { %v1682_v10 = vsel %vm788_vm3, %v3059_v9, 0.0 }
 0xda5   :  { %1683 = vadd.xlane.f32.xlu1 %v1682_v10 }
 0xdb4   :  { %2940 = vrot.lane.b32.xlu2 %v3737_v62, %s4003_s29 }
 0xdbc   :  { %2950 = vrot.lane.b32.xlu2 %v3737_v62, %s4004_s30 }
 0xdbe   :  { %2945 = vrot.lane.b32.xlu1 %v3737_v62, %s4005_s1 }
 0xe07   :  { %v1767_v24 = vpop.xlane.xlu2 %1766 }
 0xe08   :  { %v1865_v12 = vpop.xlane.xlu0 %1864  ;;  %v1771_v15 = vsub.f32 %v1763_v55, %v1767_v24 }
 0xe09   :  { %v1869_v14 = vsub.f32 %v1861_v57, %v1865_v12 }
 0xe0a   :  { %v1773_v17 = vmul.f32 1.442695, %v1771_v15 }
 0xe0b   :  { %v1871_v16 = vmul.f32 1.442695, %v1869_v14 }
 0xe0d   :  { %3060 = vpow2.f32 %v1871_v16 }
 0xe0f   :  { %v1770_v38 = vpop.xlane.xlu2 %1769 }
 0xe10   :  { %v1681_v18 = vpop.xlane.xlu0 %1680  ;;  %v1868_v20 = vpop.xlane.xlu1 %1867  ;;  %v1772_v22 = vsub.f32 %v1764_v2, %v1770_v38 }
 0xe11   :  { %3062 = vrcp.f32 %v1681_v18  ;;  %v1870_v31 = vsub.f32 %v1862_v19, %v1868_v20 }
 0xe12   :  { %3064 = vpow2.f32 %v1773_v17  ;;  %v1775_v23 = vmul.f32 1.442695, %v1772_v22 }
 0xe13   :  { %v3061_v21 = vpop.eup %3060  ;;  %v1873_v33 = vmul.f32 1.442695, %v1870_v31 }
 0xe14   :  { %v1875_v42 = vsel %vm788_vm3, %v3061_v21, 0.0 }
 0xe15   :  { %1876 = vadd.xlane.f32.xlu0 %v1875_v42 }
 0xe17   :  { %v2941_v25 = vpop.permute.xlu2 %2940  ;;  %v3063_v62 = vpop.eup %3062 }
 0xe18   :  { %v2942_v26 = vunpack.i.l.bf16 %v2941_v25  ;;  %v1684_v27 = vpop.xlane.xlu1 %1683  ;;  %v3065_v28 = vpop.eup %3064  ;;  %v2943_v29 = vunpack.i.h.bf16 %v2941_v25  ;;  %v1687_v30 = vmul.f32 %v3063_v62, %v3057_v63 }
 0xe19   :  { %3066 = vrcp.f32 %v1684_v27  ;;  %v1777_v32 = vsel %vm788_vm3, %v3065_v28, 0.0 }
 0xe1a   :  { %1715 = vmatpush.msrb.mxu1 %v2942_v26  ;;  %3068 = vpow2.f32 %v1775_v23 }
 0xe1b   :  { %3070 = vpow2.f32 %v1873_v33 }
 0xe1c   :  { %1716 = vmatpush.msrb.mxu1 %v2943_v29 }
 0xe1d   :  { %1778 = vadd.xlane.f32.xlu0 %v1777_v32  ;;  %2692 = vmatmul.msk.f32.vlgmr.msrb.gmra.mxu1 %vm788_vm3, %v1687_v30 }
 0xe1f   :  { %v2951_v34 = vpop.permute.xlu2 %2950  ;;  %v3067_v35 = vpop.eup %3066 }
 0xe20   :  { %v2952_v37 = vunpack.i.l.bf16 %v2951_v34  ;;  %v3069_v39 = vpop.eup %3068  ;;  %v2953_v40 = vunpack.i.h.bf16 %v2951_v34  ;;  %v1688_v41 = vmul.f32 %v3067_v35, %v3059_v9  ;;  %v2866_v9 = vld [vmem:[%s3951_s9 + $0x10] sm:$0xff] }
 0xe21   :  { %v1780_v43 = vsel %vm788_vm3, %v3069_v39, 0.0  ;;  %v3071_v44 = vpop.eup %3070  ;;  %1983 = vmatpush.bf16.msra.mxu2 %v2866_v9 }
 0xe22   :  { %1911 = vmatpush.msra.mxu1 %v2952_v37  ;;  %v1878_v45 = vsel %vm788_vm3, %v3071_v44, 0.0 }
 0xe24   :  { %1912 = vmatpush.msra.mxu1 %v2953_v40 }
 0xe25   :  { %1781 = vadd.xlane.f32.xlu0 %v1780_v43  ;;  %2693 = vmatmul.msk.f32.gmra.mxu1 %vm788_vm3, %v1688_v41 }
 0xe2d   :  { %1879 = vadd.xlane.f32.xlu0 %v1878_v45 }
 0xe30   :  { %v2946_v46 = vpop.permute.xlu1 %2945 }
 0xe31   :  { %v2947_v5 = vunpack.i.l.bf16 %v2946_v46  ;;  %v2948_v47 = vunpack.i.h.bf16 %v2946_v46 }
 0xe33   :  { %1813 = vmatpush.msra.mxu3 %v2947_v5 }
 0xe35   :  { %1814 = vmatpush.msra.mxu3 %v2948_v47  ;;  %v2868_v47 = vld [vmem:[%s3955_s13 + $0x10] sm:$0xff] }
 0xe88   :  { %v1877_v48 = vpop.xlane.xlu0 %1876 }
 0xe89   :  { %3072 = vrcp.f32 %v1877_v48 }
 0xe8f   :  { %v3073_v49 = vpop.eup %3072 }
 0xe90   :  { %v1883_v11 = vmul.f32 %v3073_v49, %v3061_v21  ;;  %v1779_v52 = vpop.xlane.xlu0 %1778 }
 0xe91   :  { %3074 = vrcp.f32 %v1779_v52 }
 0xe92   :  { %2704 = vmatmul.msk.f32.vlgmr.msra.gmra.mxu1 %vm788_vm3, %v1883_v11 }
 0xe97   :  { %v3075_v53 = vpop.eup %3074 }
 0xe98   :  { %v1785_v54 = vmul.f32 %v3075_v53, %v3065_v28  ;;  %v1782_v55 = vpop.xlane.xlu0 %1781 }
 0xe99   :  { %3076 = vrcp.f32 %v1782_v55 }
 0xe9a   :  { %v1718_v56 = vpop.f32.mrf.mxu1  ;;  %2698 = vmatmul.msk.f32.vlgmr.msra.gmra.mxu3 %vm788_vm3, %v1785_v54 }
 0xe9f   :  { %v3077_v57 = vpop.eup %3076 }
 0xea0   :  { %v1880_v58 = vpop.xlane.xlu0 %1879  ;;  %v1786_v59 = vmul.f32 %v3077_v57, %v3069_v39 }
 0xea1   :  { %3078 = vrcp.f32 %v1880_v58 }
 0xea2   :  { %v1721_v60 = vpop.f32.mrf.mxu1  ;;  %2699 = vmatmul.msk.f32.gmra.mxu3 %vm788_vm3, %v1786_v59 }
 0xea3   :  { %v2954_v61 = vpack.i.bf16 %v1721_v60, %v1718_v56 }
 0xea5   :  { %2955 = vrot.lane.b32.xlu2 %v2954_v61, %s4006_s26 }
 0xea7   :  { %v3079_v63 = vpop.eup %3078 }
 0xea8   :  { %v1884_v0 = vmul.f32 %v3079_v63, %v3071_v44  ;;  %v2869_v44 = vld [vmem:[%s3955_s13 + $0x18] sm:$0xff] }
 0xea9   :  { %2082 = vmatpush.bf16.msrb.mxu3 %v2869_v44 }
 0xeaa   :  { %2705 = vmatmul.msk.f32.gmra.mxu1 %vm788_vm3, %v1884_v0 }
 0xead   :  { %2083 = vmatpush.bf16.msrb.mxu3 %v2868_v47 }
 0xeff   :  { %v2956_v10 = vpop.permute.xlu2 %2955 }
 0xf00   :  { %v2958_v24 = vunpack.i.h.bf16 %v2956_v10  ;;  %v2957_v12 = vunpack.i.l.bf16 %v2956_v10 }
 0xf02   :  { %v1945_v17 = vsel %vm754_vm14, %v3794_v51, %v2958_v24  ;;  %v1944_v38 = vsel %vm754_vm14, %v3792_v50, %v2957_v12  ;;  %v2982_v51 = vld [vmem:[%s3952_s10 + $0x1] ss:$0 sm:$0xff] }
 0xf0f   :  { %v1914_v2 = vpop.f32.mrf.mxu1 }
 0xf1d   :  { %v1816_v1 = vpop.f32.mrf.mxu3 }
 0xf25   :  { %v1819_v3 = vpop.f32.mrf.mxu3 }
 0xf26   :  { %v2959_v19 = vpack.i.bf16 %v1819_v3, %v1816_v1  ;;  %v2983_v1 = vld [vmem:[%s3953_s11 + $0x1] ss:$0 sm:$0xff] }
 0xf27   :  { %v1917_v4 = vpop.f32.mrf.mxu1 }
 0xf28   :  { %v2964_v6 = vpack.i.bf16 %v1917_v4, %v1914_v2  ;;  %2960 = vrot.lane.b32.xlu1 %v2959_v19, %s4007_s3  ;;  %v2984_v4 = vld [vmem:[%s3954_s12 + $0x1] ss:$0 sm:$0xff]  ;;  %s2353_s12 = sshll.u32 %s3963_s21, 4  ;;  %s3142_s3 = smov 128   ;;  %s2354_s12 = int_to_ptr.hbm [resolvable:$true] %s2353_s12 }
 0xf2a   :  { %2965 = vrot.lane.b32.xlu0 %v2964_v6, %s4008_s24 }
 0xf9a   :  { %v2961_v14 = vpop.permute.xlu1 %2960 }
 0xf9b   :  { %v2963_v15 = vunpack.i.h.bf16 %v2961_v14  ;;  %v2962_v16 = vunpack.i.l.bf16 %v2961_v14  ;;  %v2877_v14 = vld [vmem:[%s3957_s15 + $0x78] sm:$0xff] }
 0xf9c   :  { %v2966_v18 = vpop.permute.xlu0 %2965  ;;  %2203 = vmatpush.bf16.msra.mxu0 %v2877_v14 }
 0xf9d   :  { %v1947_v20 = vsel %vm788_vm3, %v1945_v17, %v2963_v15  ;;  %v1946_v21 = vsel %vm788_vm3, %v1944_v38, %v2962_v16  ;;  %v2968_v22 = vunpack.i.h.bf16 %v2966_v18  ;;  %v2967_v42 = vunpack.i.l.bf16 %v2966_v18  ;;  %v2876_v15 = vld [vmem:[%s3957_s15 + $0x70] sm:$0xff]  ;;  %v2875_v16 = vld [vmem:[%s3957_s15 + $0x68] sm:$0xff]  ;;  %v2874_v17 = vld [vmem:[%s3957_s15 + $0x60] sm:$0xff] }
 0xf9e   :  { %v2985_v38 = vld [vmem:[%s3956_s14 + $0x1] ss:$0 sm:$0xff]  ;;  %v2873_v18 = vld [vmem:[%s3957_s15 + $0x58] sm:$0xff] }
 0xf9f   :  { %v1948_v23 = vsel %vm1168_vm6, %v1946_v21, %v2967_v42  ;;  %v1949_v25 = vsel %vm1168_vm6, %v1947_v20, %v2968_v22  ;;  %v2872_v22 = vld [vmem:[%s3957_s15 + $0x50] sm:$0xff] }
 0xfa0   :  { %v1950_v62 = vpack.c.bf16 %v1949_v25, %v1948_v23  ;;  %2204 = vmatpush.bf16.msra.mxu0 %v2876_v15  ;;  %v2871_v25 = vld [vmem:[%s3957_s15 + $0x48] sm:$0xff] }
 0xfa2   :  { %2719 = vmatmul.msk.bf16.vlgmr.msra.gmra.mxu2 %vm578_vm0, %v1950_v62 }
 0xfa4   :  { %2205 = vmatpush.bf16.msra.mxu0 %v2875_v16 }
 0xfa8   :  { %2206 = vmatpush.bf16.msra.mxu0 %v2874_v17 }
 0xfac   :  { %2207 = vmatpush.bf16.msra.mxu0 %v2873_v18 }
 0xfb0   :  { %2208 = vmatpush.bf16.msra.mxu0 %v2872_v22 }
 0xfb4   :  { %2209 = vmatpush.bf16.msra.mxu0 %v2871_v25 }
0x1025   :  { %v1985_v26 = vpop.f32.mrf.mxu2 }
0x1026   :  { %v1986_v50 = vadd.f32 %v2982_v51, %v1985_v26  ;;  %v2870_v26 = vld [vmem:[%s3957_s15 + $0x40] sm:$0xff] }
0x1027   :  { %2210 = vmatpush.bf16.msra.mxu0 %v2870_v26 }
0x1028   :  { %v3848_v27 = vadd.f32 %v1986_v50, %v3696_v8 }
0x102a   :  { %v1996_v28 = vsel %vm578_vm0, %v3848_v27, 0.0 }
0x102b   :  { %1997 = vadd.xlane.f32.xlu2 %v1996_v28 }
0x102d   :  { %v1987_v29 = vpop.f32.mrf.mxu2 }
0x102e   :  { %v1988_v30 = vadd.f32 %v2982_v51, %v1987_v29 }
0x1030   :  { %v3853_v31 = vadd.f32 %v1988_v30, %v3701_v13 }
0x1032   :  { %v1999_v32 = vsel %vm578_vm0, %v3853_v31, 0.0 }
0x1033   :  { %2000 = vadd.xlane.f32.xlu1 %v1999_v32 }
0x109e   :  { %v1998_v33 = vpop.xlane.xlu2 %1997 }
0x109f   :  { %v2002_v34 = vmul.f32 %v1998_v33, %v3441_v36 }
0x10a1   :  { %v2004_v35 = vsub.f32 %v3848_v27, %v2002_v34 }
0x10a3   :  { %v2006_v8 = vmul.f32 %v2004_v35, %v2004_v35 }
0x10a5   :  { %v2008_v37 = vsel %vm578_vm0, %v2006_v8, 0.0 }
0x10a6   :  { %v2001_v39 = vpop.xlane.xlu1 %2000  ;;  %2009 = vadd.xlane.f32.xlu0 %v2008_v37 }
0x10a7   :  { %v2003_v40 = vmul.f32 %v2001_v39, %v3441_v36 }
0x10a9   :  { %v2005_v41 = vsub.f32 %v3853_v31, %v2003_v40 }
0x10ab   :  { %v2007_v13 = vmul.f32 %v2005_v41, %v2005_v41 }
0x10ad   :  { %v2011_v43 = vsel %vm578_vm0, %v2007_v13, 0.0 }
0x10ae   :  { %2012 = vadd.xlane.f32.xlu2 %v2011_v43 }
0x1119   :  { %v2010_v45 = vpop.xlane.xlu0 %2009 }
0x111a   :  { %v2014_v46 = vmul.f32 %v2010_v45, %v3441_v36 }
0x111c   :  { %v2016_v5 = vadd.f32 1e-05, %v2014_v46 }
0x111e   :  { %3080 = vrsqrt.f32 %v2016_v5  ;;  %vm2024_vm2 = vweird.f32 %v2016_v5 }
0x1121   :  { %v2013_v48 = vpop.xlane.xlu2 %2012 }
0x1122   :  { %v2015_v49 = vmul.f32 %v2013_v48, %v3441_v36 }
0x1124   :  { %v3081_v11 = vpop.eup %3080  ;;  %v2017_v52 = vadd.f32 1e-05, %v2015_v49 }
0x1125   :  { %v2019_v53 = vmul.f32 %v3081_v11, %v2016_v5  ;;  %vm2025_vm14 = vweird.f32 %v3081_v11 }
0x1126   :  { %3082 = vrsqrt.f32 %v2017_v52  ;;  %vm2026_vm5 = vmor %vm2024_vm2, %vm2025_vm14  ;;  %vm2034_vm7 = vweird.f32 %v2017_v52 }
0x1127   :  { %v2020_v54 = vmul.f32 %v3081_v11, %v2019_v53 }
0x1129   :  { %v2021_v55 = vmul.f32 0.5, %v2020_v54 }
0x112b   :  { %v2022_v56 = vsub.f32 1.5, %v2021_v55 }
0x112c   :  { %v3083_v57 = vpop.eup %3082 }
0x112d   :  { %v2023_v58 = vmul.f32 %v3081_v11, %v2022_v56  ;;  %v2029_v59 = vmul.f32 %v3083_v57, %v2017_v52  ;;  %vm2035_vm6 = vweird.f32 %v3083_v57 }
0x112e   :  { %vm2036_vm8 = vmor %vm2034_vm7, %vm2035_vm6 }
0x112f   :  { %v2030_v60 = vmul.f32 %v3083_v57, %v2029_v59  ;;  %v2027_v61 = vsel %vm2026_vm5, %v3081_v11, %v2023_v58  ;;  %v2986_v58 = vld [vmem:[%s3958_s16 + $0x1] ss:$0 sm:$0xff] }
0x1130   :  { %v2038_v2 = vmul.f32 %v2027_v61, %v2004_v35 }
0x1131   :  { %v2031_v63 = vmul.f32 0.5, %v2030_v60 }
0x1132   :  { %v2043_v6 = vmul.f32 %v2983_v1, %v2038_v2 }
0x1133   :  { %v2032_v0 = vsub.f32 1.5, %v2031_v63 }
0x1134   :  { %v2048_v10 = vadd.f32 %v2984_v4, %v2043_v6 }
0x1135   :  { %v2033_v3 = vmul.f32 %v3083_v57, %v2032_v0 }
0x1137   :  { %v2037_v19 = vsel %vm2036_vm8, %v3083_v57, %v2033_v3 }
0x1138   :  { %v2039_v7 = vmul.f32 %v2037_v19, %v2005_v41 }
0x113a   :  { %v2044_v9 = vmul.f32 %v2983_v1, %v2039_v7 }
0x113c   :  { %v2049_v24 = vadd.f32 %v2984_v4, %v2044_v9 }
0x113e   :  { %v2050_v12 = vpack.c.bf16 %v2049_v24, %v2048_v10 }
0x1140   :  { %2735 = vmatmul.msk.bf16.vlgmr.msrb.gmra.mxu3 %vm578_vm0, %v2050_v12 }
0x11c3   :  { %v2085_v20 = vpop.f32.mrf.mxu3 }
0x11c4   :  { %v2086_v21 = vadd.f32 %v2985_v38, %v2085_v20 }
0x11c6   :  { %v2736_v42 = vmul.f32 -1.702, %v2086_v21 }
0x11c8   :  { %v2094_v23 = vmul.f32 1.442695, %v2736_v42 }
0x11ca   :  { %3084 = vpow2.f32 %v2094_v23 }
0x11cb   :  { %v2087_v62 = vpop.f32.mrf.mxu3 }
0x11cc   :  { %v2088_v51 = vadd.f32 %v2985_v38, %v2087_v62  ;;  %v2878_v38 = vld [vmem:[%s3961_s19] sm:$0xff] }
0x11ce   :  { %v2737_v50 = vmul.f32 -1.702, %v2088_v51 }
0x11d0   :  { %v3085_v28 = vpop.eup %3084  ;;  %v2096_v29 = vmul.f32 1.442695, %v2737_v50 }
0x11d1   :  { %v2098_v30 = vadd.f32 1.0, %v3085_v28 }
0x11d2   :  { %3086 = vpow2.f32 %v2096_v29 }
0x11d3   :  { %3088 = vrcp.f32 %v2098_v30  ;;  %v2111_v13 = vand.u32 2147483648, %v2098_v30  ;;  %vm2105_vm10 = vweird.f32 %v2098_v30  ;;  %v2109_v43 = vand.u32 2147483647, %v2098_v30 }
0x11d5   :  { %v2112_v48 = vor.u32 1.1754944e-38, %v2111_v13  ;;  %vm2110_vm13 = vcmp.eq.f32.partialorder %v2109_v43, 8.507059e+37 }
0x11d8   :  { %v3087_v32 = vpop.eup %3086 }
0x11d9   :  { %v3089_v33 = vpop.eup %3088  ;;  %v2099_v34 = vadd.f32 1.0, %v3087_v32 }
0x11da   :  { %v2101_v35 = vmul.f32 %v3089_v33, %v2098_v30  ;;  %vm2106_vm9 = vweird.f32 %v3089_v33 }
0x11db   :  { %3090 = vrcp.f32 %v2099_v34  ;;  %vm2107_vm11 = vmor %vm2105_vm10, %vm2106_vm9  ;;  %v2126_v45 = vand.u32 2147483648, %v2099_v34  ;;  %v2124_v47 = vand.u32 2147483647, %v2099_v34  ;;  %vm2120_vm15 = vweird.f32 %v2099_v34 }
0x11dc   :  { %v2102_v8 = vsub.f32 1.0, %v2101_v35 }
0x11dd   :  { %v2127_v52 = vor.u32 1.1754944e-38, %v2126_v45  ;;  %vm2125_vm4 = vcmp.eq.f32.partialorder %v2124_v47, 8.507059e+37 }
0x11de   :  { %v2103_v37 = vmul.f32 %v3089_v33, %v2102_v8  ;;  %v2988_v8 = vld [vmem:[%s3960_s18] ss:$0 sm:$0xff] }
0x11e0   :  { %v2104_v40 = vadd.f32 %v3089_v33, %v2103_v37 }
0x11e1   :  { %v3091_v39 = vpop.eup %3090 }
0x11e2   :  { %v2116_v41 = vmul.f32 %v3091_v39, %v2099_v34  ;;  %v2108_v46 = vsel %vm2107_vm11, %v3089_v33, %v2104_v40  ;;  %vm2121_vm12 = vweird.f32 %v3091_v39 }
0x11e3   :  { %v2113_v11 = vsel %vm2110_vm13, %v2112_v48, %v2108_v46  ;;  %vm2122_vm1 = vmor %vm2120_vm15, %vm2121_vm12 }
0x11e4   :  { %v2117_v44 = vsub.f32 1.0, %v2116_v41  ;;  %v2130_v55 = vmul.f32 %v2113_v11, %v2086_v21 }
0x11e6   :  { %v2118_v5 = vmul.f32 %v3091_v39, %v2117_v44  ;;  %v2989_v44 = vld [vmem:[%s3962_s20] ss:$0 sm:$0xff] }
0x11e8   :  { %v2119_v49 = vadd.f32 %v3091_v39, %v2118_v5 }
0x11ea   :  { %v2123_v53 = vsel %vm2122_vm1, %v3091_v39, %v2119_v49 }
0x11eb   :  { %v2128_v54 = vsel %vm2125_vm4, %v2127_v52, %v2123_v53 }
0x11ec   :  { %v2131_v56 = vmul.f32 %v2128_v54, %v2088_v51 }
0x11ee   :  { %v2132_v57 = vpack.c.bf16 %v2131_v56, %v2130_v55 }
0x11f0   :  { %2211 = vmatmul.bf16.vlgmr.msra.gmra.mxu0 %v2132_v57 }
0x126d   :  { %v2212_v59 = vpop.f32.mrf.mxu0 }
0x126e   :  { %v2213_v60 = vadd.f32 %v2986_v58, %v2212_v59 }
0x1270   :  { %v2217_v61 = vadd.f32 %v2213_v60, %v3848_v27 }
0x1272   :  { %v2221_v63 = vsel %vm578_vm0, %v2217_v61, 0.0 }
0x1273   :  { %2222 = vadd.xlane.f32.xlu1 %v2221_v63 }
0x1275   :  { %v2214_v0 = vpop.f32.mrf.mxu0 }
0x1276   :  { %v2215_v1 = vadd.f32 %v2986_v58, %v2214_v0 }
0x1278   :  { %v2218_v2 = vadd.f32 %v2215_v1, %v3853_v31  ;;  %v2879_v31 = vld [vmem:[%s3961_s19 + $0x8] sm:$0xff] }
0x1279   :  { %2305 = vmatpush.bf16.msrb.mxu1 %v2879_v31 }
0x127a   :  { %v2224_v3 = vsel %vm578_vm0, %v2218_v2, 0.0 }
0x127b   :  { %2225 = vadd.xlane.f32.xlu2 %v2224_v3 }
0x127d   :  { %2306 = vmatpush.bf16.msrb.mxu1 %v2878_v38 }
0x12e6   :  { %v2223_v19 = vpop.xlane.xlu1 %2222 }
0x12e7   :  { %v2227_v4 = vmul.f32 %v2223_v19, %v3441_v36 }
0x12e9   :  { %v2229_v6 = vsub.f32 %v2217_v61, %v2227_v4 }
0x12eb   :  { %v2231_v7 = vmul.f32 %v2229_v6, %v2229_v6 }
0x12ed   :  { %v2233_v9 = vsel %vm578_vm0, %v2231_v7, 0.0 }
0x12ee   :  { %v2226_v10 = vpop.xlane.xlu2 %2225  ;;  %2234 = vadd.xlane.f32.xlu1 %v2233_v9 }
0x12ef   :  { %v2228_v27 = vmul.f32 %v2226_v10, %v3441_v36 }
0x12f1   :  { %v2230_v24 = vsub.f32 %v2218_v2, %v2228_v27 }
0x12f3   :  { %v2232_v12 = vmul.f32 %v2230_v24, %v2230_v24 }
0x12f5   :  { %v2236_v14 = vsel %vm578_vm0, %v2232_v12, 0.0 }
0x12f6   :  { %2237 = vadd.xlane.f32.xlu2 %v2236_v14 }
0x1361   :  { %v2235_v15 = vpop.xlane.xlu1 %2234 }
0x1362   :  { %v2239_v16 = vmul.f32 %v2235_v15, %v3441_v36 }
0x1364   :  { %v2241_v17 = vadd.f32 1e-05, %v2239_v16 }
0x1366   :  { %3092 = vrsqrt.f32 %v2241_v17  ;;  %vm2249_vm2 = vweird.f32 %v2241_v17 }
0x1369   :  { %v2238_v18 = vpop.xlane.xlu2 %2237 }
0x136a   :  { %v2240_v20 = vmul.f32 %v2238_v18, %v3441_v36  ;;  %v2987_v36 = vld [vmem:[%s3959_s17] ss:$0 sm:$0xff]  ;;  %s3141_s17 = smov [#allocation2]  }
0x136b   :  { %s2351_s18 = sshll.u32 %s3141_s17, 4  ;;  %s2352_s18 = int_to_ptr.vmem [resolvable:$true] %s2351_s18 }
0x136c   :  { %v3093_v21 = vpop.eup %3092  ;;  %v2242_v22 = vadd.f32 1e-05, %v2240_v20 }
0x136d   :  { %v2244_v42 = vmul.f32 %v3093_v21, %v2241_v17  ;;  %vm2250_vm14 = vweird.f32 %v3093_v21 }
0x136e   :  { %3094 = vrsqrt.f32 %v2242_v22  ;;  %vm2251_vm5 = vmor %vm2249_vm2, %vm2250_vm14  ;;  %vm2259_vm7 = vweird.f32 %v2242_v22 }
0x136f   :  { %v2245_v23 = vmul.f32 %v3093_v21, %v2244_v42 }
0x1371   :  { %v2246_v25 = vmul.f32 0.5, %v2245_v23 }
0x1373   :  { %v2247_v62 = vsub.f32 1.5, %v2246_v25 }
0x1374   :  { %v3095_v51 = vpop.eup %3094 }
0x1375   :  { %v2248_v26 = vmul.f32 %v3093_v21, %v2247_v62  ;;  %v2254_v50 = vmul.f32 %v3095_v51, %v2242_v22  ;;  %vm2260_vm6 = vweird.f32 %v3095_v51 }
0x1376   :  { %vm2261_vm8 = vmor %vm2259_vm7, %vm2260_vm6 }
0x1377   :  { %v2255_v28 = vmul.f32 %v3095_v51, %v2254_v50  ;;  %v2252_v29 = vsel %vm2251_vm5, %v3093_v21, %v2248_v26 }
0x1378   :  { %v2263_v33 = vmul.f32 %v2252_v29, %v2229_v6 }
0x1379   :  { %v2256_v30 = vmul.f32 0.5, %v2255_v28 }
0x137a   :  { %v2268_v37 = vmul.f32 %v2987_v36, %v2263_v33 }
0x137b   :  { %v2257_v32 = vsub.f32 1.5, %v2256_v30 }
0x137c   :  { %v2273_v41 = vadd.f32 %v2988_v8, %v2268_v37 }
0x137d   :  { %v2258_v34 = vmul.f32 %v3095_v51, %v2257_v32 }
0x137f   :  { %v2262_v35 = vsel %vm2261_vm8, %v3095_v51, %v2258_v34 }
0x1380   :  { %v2264_v39 = vmul.f32 %v2262_v35, %v2230_v24 }
0x1382   :  { %v2269_v40 = vmul.f32 %v2987_v36, %v2264_v39 }
0x1384   :  { %v2274_v13 = vadd.f32 %v2988_v8, %v2269_v40 }
0x1386   :  { %v2275_v43 = vpack.c.bf16 %v2274_v13, %v2273_v41 }
0x1388   :  { %2795 = vmatmul.msk.bf16.vlgmr.msrb.gmra.mxu1 %vm578_vm0, %v2275_v43 }
0x1405   :  { %v2308_v45 = vpop.f32.mrf.mxu1 }
0x1406   :  { %v2309_v46 = vadd.f32 %v2989_v44, %v2308_v45 }
0x1408   :  { %v2313_v5 = vmul.f32 %v2309_v46, %v2309_v46 }
0x140a   :  { %v2315_v47 = vsel %vm788_vm3, %v2313_v5, 0.0 }
0x140b   :  { %2316 = vadd.xlane.f32.xlu0 %v2315_v47 }
0x140d   :  { %v2310_v48 = vpop.f32.mrf.mxu1 }
0x140e   :  { %v2311_v49 = vadd.f32 %v2989_v44, %v2310_v48 }
0x1410   :  { %v2314_v11 = vmul.f32 %v2311_v49, %v2311_v49 }
0x1412   :  { %v2318_v52 = vsel %vm788_vm3, %v2314_v11, 0.0 }
0x1413   :  { %2319 = vadd.xlane.f32.xlu1 %v2318_v52 }
0x147e   :  { %v2317_v53 = vpop.xlane.xlu0 %2316 }
0x147f   :  { %v2321_v54 = vmax.f32 %v2317_v53, 1e-24 }
0x1481   :  { %3096 = vrsqrt.f32 %v2321_v54  ;;  %vm2329_vm9 = vweird.f32 %v2321_v54 }
0x1486   :  { %v2320_v55 = vpop.xlane.xlu1 %2319 }
0x1487   :  { %v3097_v56 = vpop.eup %3096  ;;  %v2322_v57 = vmax.f32 %v2320_v55, 1e-24 }
0x1488   :  { %v2324_v58 = vmul.f32 %v3097_v56, %v2321_v54  ;;  %vm2330_vm0 = vweird.f32 %v3097_v56 }
0x1489   :  { %3098 = vrsqrt.f32 %v2322_v57  ;;  %vm2331_vm10 = vmor %vm2329_vm9, %vm2330_vm0  ;;  %vm2339_vm12 = vweird.f32 %v2322_v57 }
0x148a   :  { %v2325_v59 = vmul.f32 %v3097_v56, %v2324_v58 }
0x148c   :  { %v2326_v60 = vmul.f32 0.5, %v2325_v59 }
0x148e   :  { %v2327_v61 = vsub.f32 1.5, %v2326_v60 }
0x148f   :  { %v3099_v63 = vpop.eup %3098 }
0x1490   :  { %v2328_v0 = vmul.f32 %v3097_v56, %v2327_v61  ;;  %v2334_v1 = vmul.f32 %v3099_v63, %v2322_v57  ;;  %vm2340_vm11 = vweird.f32 %v3099_v63 }
0x1491   :  { %vm2341_vm13 = vmor %vm2339_vm12, %vm2340_vm11 }
0x1492   :  { %v2332_v2 = vsel %vm2331_vm10, %v3097_v56, %v2328_v0  ;;  %v2335_v3 = vmul.f32 %v3099_v63, %v2334_v1 }
0x1493   :  { %v2343_v19 = vmul.f32 %v2332_v2, %v2309_v46 }
0x1494   :  { %v2336_v4 = vmul.f32 0.5, %v2335_v3 }
0x1495   :  { %2345 = vst.msk [vmem:[#allocation2] sm:$0xff] %vm788_vm3, %v2343_v19 }
0x1496   :  { %v2337_v6 = vsub.f32 1.5, %v2336_v4 }
0x1498   :  { %v2338_v7 = vmul.f32 %v3099_v63, %v2337_v6 }
0x149a   :  { %v2342_v9 = vsel %vm2341_vm13, %v3099_v63, %v2338_v7 }
0x149b   :  { %v2344_v10 = vmul.f32 %v2342_v9, %v2311_v49 }
0x149d   :  { %2346 = vst.msk [vmem:[#allocation2 + $0x8] sm:$0xff] %vm788_vm3, %v2344_v10 }
0x149e   :  { %2359 = dma.vmem_to_hbm [thread:$0]  %s2352_s18, 256, %s2354_s12, [#allocation3], %s3142_s3, %s3142_s3, %s4006_s26  }
0x149f   :  { %3124 = dma.done.wait [#allocation3], 256  }
0x14a0   :  { %3125 = vsyncadd [#allocation3], 4294967040 }
0x14a1   :  { %2364 = vsyncpa [#allocation3], 1 }

</bundles_post_ra>
